<compile_context>
chip_gen: v7x
topology: tpu7x:2x2x1
jax: 0.10.0
libtpu: 0.0.40
codegen_flags: <defaults>
</compile_context>

<pallas_src>
import functools

import jax
import jax.numpy as jnp
from jax import lax
from jax.experimental import pallas as pl
from jax.experimental.pallas import tpu as pltpu

# ----------------------------- model sizes (scaled down) ---------------------
B = 2            # batch
CIN = 4          # input image channels
HIN = WIN = 16   # input spatial
C_LOCAL = 32     # "in_planes"  (1024 in the original)
HID = 16         # "hid_planes" (512 in the original)
C_GLOBAL = 64    # "global_dim" (2048 in the original)
GEM_P = 3.0      # TODO(synk): cfg.GEM.P not provided; standard GeM p=3.0, not trainable.


# ============================ fused StructBranch kernel ======================

def _ln_f32(x, g, b, eps=1e-5):
    mu = jnp.mean(x, axis=-1, keepdims=True)
    var = jnp.mean((x - mu) ** 2, axis=-1, keepdims=True)
    return (x - mu) * jax.lax.rsqrt(var + eps) * g + b


def _struct_branch_kernel(x_ref, pos_ref,
                          wconv_ref, bconv_ref, wma_ref, bma_ref,
                          wqkv_ref, bqkv_ref, wo_ref, bo_ref,
                          ln1g_ref, ln1b_ref, w1_ref, b1_ref,
                          w2_ref, b2_ref, ln2g_ref, ln2b_ref,
                          o_ref,
                          pad_ref,
                          *, h, w, c, hid, padc, dilations):
    """One batch element of StructBranch, entirely in VMEM."""
    bf16 = jnp.bfloat16
    f32 = jnp.float32
    L = h * w
    hp = h + 2 * padc
    wp = w + 2 * padc

    # ---- bf16 halo tile: zero only the four border strips -------------------
    # (interior is always fully overwritten; strips are re-zeroed every grid
    #  step so this stays correct under megacore scratch reuse on v7x)
    pad_ref[0:padc, :, :] = jnp.zeros((padc, wp, c), bf16)               # top
    pad_ref[padc + h:hp, :, :] = jnp.zeros((padc, wp, c), bf16)          # bottom
    pad_ref[padc:padc + h, 0:padc, :] = jnp.zeros((h, padc, c), bf16)    # left
    pad_ref[padc:padc + h, padc + w:wp, :] = jnp.zeros((h, padc, c), bf16)  # right
    # interior: one block copy, cast to bf16 once (offset 16 is sublane-aligned)
    pad_ref[padc:padc + h, padc:padc + w, :] = x_ref[0].astype(bf16)

    # ---- two dilated 3x3 convs as 18 per-tap shifted matmuls ----------------
    # wconv_ref: (18, c, hid) bf16, tap index t = dil*9 + ky*3 + kx.
    # No im2col scratch, no zero-block matmul.  At production sizes
    # (C=1024, HID=512) this loop additionally needs an L (token) grid axis and
    # an f32 VMEM accumulator budgeted against v7x's 64 MiB VMEM, with the
    # constant weight BlockSpecs single-buffered (pipeline_mode=pl.Buffered(1))
    # and pltpu.CompilerParams(vmem_limit_bytes=...) set explicitly.
    per_dil = []
    for di, d in enumerate(dilations):
        acc = jnp.zeros((L, hid), f32)
        for ky in range(3):
            for kx in range(3):
                t = di * 9 + ky * 3 + kx
                oy = padc + (ky - 1) * d
                ox = padc + (kx - 1) * d
                plane = pad_ref[oy:oy + h, ox:ox + w, :].reshape(L, c)   # bf16
                acc = acc + jnp.dot(plane, wconv_ref[t],
                                    preferred_element_type=f32)
        per_dil.append(acc)
    feats = jnp.concatenate(per_dil, axis=-1)                 # (L, 2*hid)
    feats = jnp.maximum(feats + bconv_ref[...], 0.0)          # = [relu(a1)|relu(a2)]
    feats = feats + pos_ref[...]                              # + positional embedding

    # ---- merge 1x1 conv + merge_bn + affine transform (folded offline) ------
    m = jnp.dot(feats.astype(bf16), wma_ref[...], preferred_element_type=f32)
    m = m + bma_ref[...]

    # ---- LinearTransformerUnit ----------------------------------------------
    # TODO(synk): LinearTransformerUnit / LinearAttention source not provided;
    # standard elu+1 linear attention + MLP (mlp_ratio=1), post-norm residuals.
    qkv = jnp.dot(m.astype(bf16), wqkv_ref[...], preferred_element_type=f32)
    qkv = qkv + bqkv_ref[...]
    q = qkv[:, 0 * c:1 * c]
    k = qkv[:, 1 * c:2 * c]
    v = qkv[:, 2 * c:3 * c]
    q = jnp.where(q > 0.0, q + 1.0, jnp.exp(q))               # phi(x) = elu(x) + 1
    k = jnp.where(k > 0.0, k + 1.0, jnp.exp(k))

    # linear attention: phi(q) (phi(k)^T v) / (phi(q) . sum_k phi(k))
    # contraction on dim 0 of both operands -> no materialized k.T transpose.
    kv = lax.dot_general(k.astype(bf16), v.astype(bf16),
                         dimension_numbers=(((0,), (0,)), ((), ())),
                         preferred_element_type=f32)          # (c, c)
    ksum = jnp.sum(k, axis=0, keepdims=True)                  # (1, c)
    zden = jnp.sum(q * ksum, axis=-1, keepdims=True) + 1e-6   # (L, 1)
    num = jnp.dot(q.astype(bf16), kv.astype(bf16), preferred_element_type=f32)
    attn = num * pl.reciprocal(zden, approx=True)

    out = jnp.dot(attn.astype(bf16), wo_ref[...], preferred_element_type=f32)
    out = out + bo_ref[...]

    hres = _ln_f32(m + out, ln1g_ref[...], ln1b_ref[...])
    mlp = jnp.dot(hres.astype(bf16), w1_ref[...], preferred_element_type=f32)
    mlp = jnp.maximum(mlp + b1_ref[...], 0.0)
    mlp = jnp.dot(mlp.astype(bf16), w2_ref[...], preferred_element_type=f32)
    mlp = mlp + b2_ref[...]
    hres = _ln_f32(hres + mlp, ln2g_ref[...], ln2b_ref[...])

    o_ref[0] = hres.astype(o_ref.dtype)


def struct_branch(feat, sp):
    """feat: (B, h, w, C_LOCAL) -> (B, h, w, C_LOCAL); one fused pallas_call."""
    Bt, h, w, C = feat.shape
    L = h * w
    pos = position_emb_sin_2d(h, w, 2 * HID).reshape(L, 2 * HID).astype(jnp.float32)
    # halo offset: >= max dilation (12); 16 keeps the interior fill
    # sublane-aligned for bf16 packing (border-only zeroing keeps it cheap).
    padc = 16

    weights = (sp["w_conv"], sp["b_conv"], sp["w_ma"], sp["b_ma"],
               sp["w_qkv"], sp["b_qkv"], sp["w_o"], sp["b_o"],
               sp["ln1_g"], sp["ln1_b"], sp["w1"], sp["b1"],
               sp["w2"], sp["b2"], sp["ln2_g"], sp["ln2_b"])

    def full_spec(a):
        nd = a.ndim
        return pl.BlockSpec(a.shape, lambda b_: (0,) * nd)

    kern = functools.partial(_struct_branch_kernel, h=h, w=w, c=C, hid=HID,
                             padc=padc, dilations=(6, 12))
    # NOTE: on 1-TC chips (v5e/v6e) folding batch into M (grid=()) saves one
    # grid step + doubles MXU row fill; grid=(B,) "parallel" is kept because it
    # maps the batch onto the second TensorCore on v7x.
    out = pl.pallas_call(
        kern,
        out_shape=jax.ShapeDtypeStruct((Bt, L, C), jnp.float32),
        grid=(Bt,),
        in_specs=[pl.BlockSpec((1, h, w, C), lambda b_: (b_, 0, 0, 0)),
                  full_spec(pos)] + [full_spec(a) for a in weights],
        out_specs=pl.BlockSpec((1, L, C), lambda b_: (b_, 0, 0)),
        scratch_shapes=[
            pltpu.VMEM((h + 2 * padc, w + 2 * padc, C), jnp.bfloat16),  # halo tile
        ],
        compiler_params=pltpu.CompilerParams(
            dimension_semantics=("parallel",)),    # batch -> both TCs on v7x
    )(feat.astype(jnp.float32), pos, *weights)
    return out.reshape(Bt, h, w, C)


# ============================ plain-XLA glue ==================================

def position_emb_sin_2d(H, W, C, temperature=10000.0):
    # TODO(synk): PositionEmbSin2D source not provided; standard 2D sin/cos embedding.
    c4 = C // 4
    yy = jnp.broadcast_to(jnp.arange(H, dtype=jnp.float32)[:, None], (H, W))
    xx = jnp.broadcast_to(jnp.arange(W, dtype=jnp.float32)[None, :], (H, W))
    dim_t = temperature ** (jnp.arange(c4, dtype=jnp.float32) / c4)
    ey = yy[..., None] / dim_t
    ex = xx[..., None] / dim_t
    return jnp.concatenate(
        [jnp.sin(ey), jnp.cos(ey), jnp.sin(ex), jnp.cos(ex)], axis=-1)  # (H, W, C)


def avg_pool(x, k):
    Bt, H, W, C = x.shape
    return x.reshape(Bt, H // k, k, W // k, k, C).mean(axis=(2, 4))


def backbone_standin(x, p):
    # TODO(synk): ResNet backbone source not provided; deterministic 1x1-conv +
    # avg-pool stand-in kept in plain XLA (not part of the StructBranch hot path).
    lf = jax.nn.relu(jnp.einsum("bhwc,cd->bhwd", x, p["bbl_w"]) + p["bbl_b"])
    lf = avg_pool(lf, 2)                                           # (B, 8, 8, C_LOCAL)
    gf = jax.nn.relu(jnp.einsum("bhwc,cd->bhwd", x, p["bbg_w"]) + p["bbg_b"])
    gf = avg_pool(gf, 4)                                           # (B, 4, 4, C_GLOBAL)
    return lf, gf


def match_align(global_featmap, f_l):
    # TODO(synk): MatchAlign source not provided; pass global_featmap through unchanged.
    del f_l
    return global_featmap


def gem_pool(x_bhwc, p=GEM_P, eps=1e-6):
    # Plain jnp power-mean (XLA fuses); a dedicated pallas_call here is pure
    # launch overhead.
    x = jnp.maximum(x_bhwc, eps)
    return jnp.mean(x ** p, axis=(1, 2)) ** (1.0 / p)              # (B, C)


def retrievalnet_forward(x_nchw, p):
    x = jnp.transpose(x_nchw, (0, 2, 3, 1)).astype(jnp.float32)    # NCHW -> NHWC
    b = x.shape[0]
    local_featmap, global_featmap = backbone_standin(x, p)
    f_l = struct_branch(local_featmap, p)
    f_g_map = match_align(global_featmap, f_l)
    f_g = gem_pool(f_g_map, p=GEM_P).reshape(b, -1)
    return f_g, f_l


# ============================ offline parameter folding ======================

def _bn_fold(gamma, beta, mean, var, eps=1e-5):
    s = gamma / jnp.sqrt(var + eps)
    return s, beta - mean * s


def _conv_to_mat(wt):
    # torch layout (Cout, Cin, kh, kw) -> (kh*kw*Cin, Cout), rows ordered (ky, kx, cin)
    kh, kw = wt.shape[2], wt.shape[3]
    return jnp.transpose(wt, (2, 3, 1, 0)).reshape(kh * kw * wt.shape[1], wt.shape[0])


def prepare_params(p):
    """Offline folding: BN scales into weights, merge+BN+affine into one matmul,
    q|k|v concatenation, per-tap conv weight layout (no zero blocks), bf16 casts."""
    f32, bf16 = jnp.float32, jnp.bfloat16
    sp = {}
    # backbone stand-in (plain XLA path) passes through unchanged
    for kname in ("bbl_w", "bbl_b", "bbg_w", "bbg_b"):
        sp[kname] = p[kname].astype(f32)

    # dilated convs + BN + ReLU: per-tap weights (18, C, HID) -> no zero blocks
    s1, t1 = _bn_fold(p["bn1_g"], p["bn1_b"], p["bn1_m"], p["bn1_v"])
    s2, t2 = _bn_fold(p["bn2_g"], p["bn2_b"], p["bn2_m"], p["bn2_v"])
    w1m = (_conv_to_mat(p["at1_w"]) * s1[None, :]).reshape(9, C_LOCAL, HID)
    w2m = (_conv_to_mat(p["at2_w"]) * s2[None, :]).reshape(9, C_LOCAL, HID)
    sp["w_conv"] = jnp.concatenate([w1m, w2m], axis=0).astype(bf16)   # (18, C, HID)
    sp["b_conv"] = jnp.concatenate(
        [p["at1_b"] * s1 + t1, p["at2_b"] * s2 + t2])[None, :].astype(f32)

    # merge 1x1 conv + merge_bn + affine transform (exact fold, no nonlinearity between)
    sm, tm_ = _bn_fold(p["mbn_g"], p["mbn_b"], p["mbn_m"], p["mbn_v"])
    wm = p["mrg_w"] * sm[None, :]
    bm = p["mrg_b"] * sm + tm_
    sp["w_ma"] = (wm @ p["aff_w"]).astype(bf16)                     # (2*HID, C)
    sp["b_ma"] = (bm @ p["aff_w"] + p["aff_b"])[None, :].astype(f32)

    # transformer unit: concatenated q|k|v projection
    sp["w_qkv"] = jnp.concatenate([p["wq"], p["wk"], p["wv"]], axis=1).astype(bf16)
    sp["b_qkv"] = jnp.concatenate([p["bq"], p["bk"], p["bv"]])[None, :].astype(f32)
    sp["w_o"] = p["wo"].astype(bf16)
    sp["b_o"] = p["bo"][None, :].astype(f32)
    sp["w1"] = p["w1"].astype(bf16)
    sp["b1"] = p["b1"][None, :].astype(f32)
    sp["w2"] = p["w2"].astype(bf16)
    sp["b2"] = p["b2"][None, :].astype(f32)
    sp["ln1_g"] = p["ln1_g"][None, :].astype(f32)
    sp["ln1_b"] = p["ln1_b"][None, :].astype(f32)
    sp["ln2_g"] = p["ln2_g"][None, :].astype(f32)
    sp["ln2_b"] = p["ln2_b"][None, :].astype(f32)
    return sp


# ============================ deterministic raw parameters ===================

def init_params(key):
    keys = iter(jax.random.split(key, 64))

    def lin(ci, co):
        return jax.random.normal(next(keys), (ci, co), jnp.float32) / jnp.sqrt(ci)

    def vec(n, scale=0.05):
        return scale * jax.random.normal(next(keys), (n,), jnp.float32)

    def bn(n):
        g = 1.0 + 0.1 * jax.random.normal(next(keys), (n,), jnp.float32)
        b = 0.05 * jax.random.normal(next(keys), (n,), jnp.float32)
        m = 0.1 * jax.random.normal(next(keys), (n,), jnp.float32)
        v = 1.0 + 0.1 * jax.random.uniform(next(keys), (n,), jnp.float32)
        return g, b, m, v

    p = {}
    # backbone stand-in
    p["bbl_w"], p["bbl_b"] = lin(CIN, C_LOCAL), vec(C_LOCAL)
    p["bbg_w"], p["bbg_b"] = lin(CIN, C_GLOBAL), vec(C_GLOBAL)
    # atrous convs (torch layout: Cout, Cin, kH, kW)
    p["at1_w"] = jax.random.normal(next(keys), (HID, C_LOCAL, 3, 3), jnp.float32) / jnp.sqrt(9 * C_LOCAL)
    p["at1_b"] = vec(HID)
    p["bn1_g"], p["bn1_b"], p["bn1_m"], p["bn1_v"] = bn(HID)
    p["at2_w"] = jax.random.normal(next(keys), (HID, C_LOCAL, 3, 3), jnp.float32) / jnp.sqrt(9 * C_LOCAL)
    p["at2_b"] = vec(HID)
    p["bn2_g"], p["bn2_b"], p["bn2_m"], p["bn2_v"] = bn(HID)
    # merge 1x1 conv + bn
    p["mrg_w"], p["mrg_b"] = lin(2 * HID, C_LOCAL), vec(C_LOCAL)
    p["mbn_g"], p["mbn_b"], p["mbn_m"], p["mbn_v"] = bn(C_LOCAL)
    # affine transform  (TODO(synk): AffineTransform source not provided; per-pixel linear)
    p["aff_w"], p["aff_b"] = lin(C_LOCAL, C_LOCAL), vec(C_LOCAL)
    # linear transformer unit
    for n in ("q", "k", "v", "o"):
        p[f"w{n}"], p[f"b{n}"] = lin(C_LOCAL, C_LOCAL), vec(C_LOCAL)
    p["w1"], p["b1"] = lin(C_LOCAL, C_LOCAL), vec(C_LOCAL)          # mlp_ratio = 1
    p["w2"], p["b2"] = lin(C_LOCAL, C_LOCAL), vec(C_LOCAL)
    p["ln1_g"], p["ln1_b"] = jnp.ones((C_LOCAL,), jnp.float32), jnp.zeros((C_LOCAL,), jnp.float32)
    p["ln2_g"], p["ln2_b"] = jnp.ones((C_LOCAL,), jnp.float32), jnp.zeros((C_LOCAL,), jnp.float32)
    return p


# ============================ main ============================================

if __name__ == "__main__":
    key = jax.random.PRNGKey(0)
    kx, kp = jax.random.split(key)
    x = jax.random.normal(kx, (B, CIN, HIN, WIN), jnp.float32)      # NCHW like PyTorch
    raw = init_params(kp)
    prep = prepare_params(raw)        # offline folding / bf16 casts (outside jit)

    fwd = jax.jit(retrievalnet_forward)
    f_g, f_l = fwd(x, prep)
    jax.block_until_ready(f_g)
    jax.block_until_ready(f_l)

    assert f_g.shape == (B, C_GLOBAL), f_g.shape
    assert f_l.shape == (B, HIN // 2, WIN // 2, C_LOCAL), f_l.shape
    assert bool(jnp.all(jnp.isfinite(f_g))) and bool(jnp.all(jnp.isfinite(f_l)))
    print("KERNEL_OK")
</pallas_src>

<mosaic_0001>
module attributes {stable_mosaic.version = 11 : i64} {
  func.func @_struct_branch_kernel(%arg0: i32, %arg1: memref<1x8x8x32xf32, #tpu.memory_space<vmem>>, %arg2: memref<64x32xf32, #tpu.memory_space<vmem>>, %arg3: memref<18x32x16xbf16, #tpu.memory_space<vmem>>, %arg4: memref<1x32xf32, #tpu.memory_space<vmem>>, %arg5: memref<32x32xbf16, #tpu.memory_space<vmem>>, %arg6: memref<1x32xf32, #tpu.memory_space<vmem>>, %arg7: memref<32x96xbf16, #tpu.memory_space<vmem>>, %arg8: memref<1x96xf32, #tpu.memory_space<vmem>>, %arg9: memref<32x32xbf16, #tpu.memory_space<vmem>>, %arg10: memref<1x32xf32, #tpu.memory_space<vmem>>, %arg11: memref<1x32xf32, #tpu.memory_space<vmem>>, %arg12: memref<1x32xf32, #tpu.memory_space<vmem>>, %arg13: memref<32x32xbf16, #tpu.memory_space<vmem>>, %arg14: memref<1x32xf32, #tpu.memory_space<vmem>>, %arg15: memref<32x32xbf16, #tpu.memory_space<vmem>>, %arg16: memref<1x32xf32, #tpu.memory_space<vmem>>, %arg17: memref<1x32xf32, #tpu.memory_space<vmem>>, %arg18: memref<1x32xf32, #tpu.memory_space<vmem>>, %arg19: memref<1x64x32xf32, #tpu.memory_space<vmem>>, %arg20: memref<40x40x32xbf16, #tpu.memory_space<vmem>>) attributes {dimension_semantics = [#tpu.dimension_semantics<parallel>], iteration_bounds = array<i64: 2>, scalar_prefetch = 0 : i64, scratch_operands = 1 : i64, tpu.core_type = #tpu.core_type<tc>, window_params = [{transform_indices = @transform_0, window_bounds = array<i64: 1, 8, 8, 32>}, {pipeline_mode = #tpu.pipeline_mode<synchronous>, transform_indices = @transform_1, window_bounds = array<i64: 64, 32>}, {pipeline_mode = #tpu.pipeline_mode<synchronous>, transform_indices = @transform_2, window_bounds = array<i64: 18, 32, 16>}, {pipeline_mode = #tpu.pipeline_mode<synchronous>, transform_indices = @transform_3, window_bounds = array<i64: 1, 32>}, {pipeline_mode = #tpu.pipeline_mode<synchronous>, transform_indices = @transform_4, window_bounds = array<i64: 32, 32>}, {pipeline_mode = #tpu.pipeline_mode<synchronous>, transform_indices = @transform_5, window_bounds = array<i64: 1, 32>}, {pipeline_mode = #tpu.pipeline_mode<synchronous>, transform_indices = @transform_6, window_bounds = array<i64: 32, 96>}, {pipeline_mode = #tpu.pipeline_mode<synchronous>, transform_indices = @transform_7, window_bounds = array<i64: 1, 96>}, {pipeline_mode = #tpu.pipeline_mode<synchronous>, transform_indices = @transform_8, window_bounds = array<i64: 32, 32>}, {pipeline_mode = #tpu.pipeline_mode<synchronous>, transform_indices = @transform_9, window_bounds = array<i64: 1, 32>}, {pipeline_mode = #tpu.pipeline_mode<synchronous>, transform_indices = @transform_10, window_bounds = array<i64: 1, 32>}, {pipeline_mode = #tpu.pipeline_mode<synchronous>, transform_indices = @transform_11, window_bounds = array<i64: 1, 32>}, {pipeline_mode = #tpu.pipeline_mode<synchronous>, transform_indices = @transform_12, window_bounds = array<i64: 32, 32>}, {pipeline_mode = #tpu.pipeline_mode<synchronous>, transform_indices = @transform_13, window_bounds = array<i64: 1, 32>}, {pipeline_mode = #tpu.pipeline_mode<synchronous>, transform_indices = @transform_14, window_bounds = array<i64: 32, 32>}, {pipeline_mode = #tpu.pipeline_mode<synchronous>, transform_indices = @transform_15, window_bounds = array<i64: 1, 32>}, {pipeline_mode = #tpu.pipeline_mode<synchronous>, transform_indices = @transform_16, window_bounds = array<i64: 1, 32>}, {pipeline_mode = #tpu.pipeline_mode<synchronous>, transform_indices = @transform_17, window_bounds = array<i64: 1, 32>}, {transform_indices = @transform_18, window_bounds = array<i64: 1, 64, 32>}]} {
    %cst = arith.constant 0.000000e+00 : bf16
    %0 = vector.broadcast %cst : bf16 to vector<16x40x32xbf16>
    %c0 = arith.constant 0 : index
    %c0_0 = arith.constant 0 : index
    %c0_1 = arith.constant 0 : index
    %1 = vector.load %arg20[%c0, %c0_0, %c0_1] : memref<40x40x32xbf16, #tpu.memory_space<vmem>>, vector<16x40x32xbf16>
    tpu.vector_store %arg20[%c0, %c0_0, %c0_1], %0 {strides = array<i32>} : memref<40x40x32xbf16, #tpu.memory_space<vmem>>, vector<16x40x32xbf16>,
    %cst_2 = arith.constant 0.000000e+00 : bf16
    %2 = vector.broadcast %cst_2 : bf16 to vector<16x40x32xbf16>
    %c24 = arith.constant 24 : index
    %c0_3 = arith.constant 0 : index
    %c0_4 = arith.constant 0 : index
    %3 = vector.load %arg20[%c24, %c0_3, %c0_4] : memref<40x40x32xbf16, #tpu.memory_space<vmem>>, vector<16x40x32xbf16>
    tpu.vector_store %arg20[%c24, %c0_3, %c0_4], %2 {strides = array<i32>} : memref<40x40x32xbf16, #tpu.memory_space<vmem>>, vector<16x40x32xbf16>,
    %cst_5 = arith.constant 0.000000e+00 : bf16
    %4 = vector.broadcast %cst_5 : bf16 to vector<8x16x32xbf16>
    %c16 = arith.constant 16 : index
    %c0_6 = arith.constant 0 : index
    %c0_7 = arith.constant 0 : index
    %5 = vector.load %arg20[%c16, %c0_6, %c0_7] : memref<40x40x32xbf16, #tpu.memory_space<vmem>>, vector<8x16x32xbf16>
    tpu.vector_store %arg20[%c16, %c0_6, %c0_7], %4 {strides = array<i32>} : memref<40x40x32xbf16, #tpu.memory_space<vmem>>, vector<8x16x32xbf16>,
    %cst_8 = arith.constant 0.000000e+00 : bf16
    %6 = vector.broadcast %cst_8 : bf16 to vector<8x16x32xbf16>
    %c16_9 = arith.constant 16 : index
    %c24_10 = arith.constant 24 : index
    %c0_11 = arith.constant 0 : index
    %7 = vector.load %arg20[%c16_9, %c24_10, %c0_11] : memref<40x40x32xbf16, #tpu.memory_space<vmem>>, vector<8x16x32xbf16>
    tpu.vector_store %arg20[%c16_9, %c24_10, %c0_11], %6 {strides = array<i32>} : memref<40x40x32xbf16, #tpu.memory_space<vmem>>, vector<8x16x32xbf16>,
    %c0_12 = arith.constant 0 : index
    %c0_13 = arith.constant 0 : index
    %c0_14 = arith.constant 0 : index
    %c0_15 = arith.constant 0 : index
    %8 = vector.load %arg1[%c0_12, %c0_13, %c0_14, %c0_15] : memref<1x8x8x32xf32, #tpu.memory_space<vmem>>, vector<1x8x8x32xf32>
    %9 = vector.shape_cast %8 : vector<1x8x8x32xf32> to vector<8x8x32xf32>
    %10 = arith.truncf %9 : vector<8x8x32xf32> to vector<8x8x32xbf16>
    %c16_16 = arith.constant 16 : index
    %c16_17 = arith.constant 16 : index
    %c0_18 = arith.constant 0 : index
    %11 = vector.load %arg20[%c16_16, %c16_17, %c0_18] : memref<40x40x32xbf16, #tpu.memory_space<vmem>>, vector<8x8x32xbf16>
    tpu.vector_store %arg20[%c16_16, %c16_17, %c0_18], %10 {strides = array<i32>} : memref<40x40x32xbf16, #tpu.memory_space<vmem>>, vector<8x8x32xbf16>,
    %cst_19 = arith.constant 0.000000e+00 : f32
    %12 = vector.broadcast %cst_19 : f32 to vector<64x16xf32>
    %c10 = arith.constant 10 : index
    %c10_20 = arith.constant 10 : index
    %c0_21 = arith.constant 0 : index
    %13 = vector.load %arg20[%c10, %c10_20, %c0_21] : memref<40x40x32xbf16, #tpu.memory_space<vmem>>, vector<8x8x32xbf16>
    %14 = vector.shape_cast %13 : vector<8x8x32xbf16> to vector<64x32xbf16>
    %c0_22 = arith.constant 0 : index
    %c0_23 = arith.constant 0 : index
    %c0_24 = arith.constant 0 : index
    %15 = vector.load %arg3[%c0_22, %c0_23, %c0_24] : memref<18x32x16xbf16, #tpu.memory_space<vmem>>, vector<1x32x16xbf16>
    %16 = vector.shape_cast %15 : vector<1x32x16xbf16> to vector<32x16xbf16>
    %cst_25 = arith.constant dense<0.000000e+00> : vector<64x16xf32>
    %17 = tpu.matmul %14, %16, %cst_25 {dimension_numbers = #tpu.dot_dimension_numbers<[1], [0], [0], [1], [0, 0, 1, 1], [], []>} : vector<64x32xbf16>, vector<32x16xbf16>, vector<64x16xf32> -> vector<64x16xf32>
    %18 = arith.addf %12, %17 : vector<64x16xf32>
    %c10_26 = arith.constant 10 : index
    %c16_27 = arith.constant 16 : index
    %c0_28 = arith.constant 0 : index
    %19 = vector.load %arg20[%c10_26, %c16_27, %c0_28] : memref<40x40x32xbf16, #tpu.memory_space<vmem>>, vector<8x8x32xbf16>
    %20 = vector.shape_cast %19 : vector<8x8x32xbf16> to vector<64x32xbf16>
    %c1 = arith.constant 1 : index
    %c0_29 = arith.constant 0 : index
    %c0_30 = arith.constant 0 : index
    %21 = vector.load %arg3[%c1, %c0_29, %c0_30] : memref<18x32x16xbf16, #tpu.memory_space<vmem>>, vector<1x32x16xbf16>
    %22 = vector.shape_cast %21 : vector<1x32x16xbf16> to vector<32x16xbf16>
    %cst_31 = arith.constant dense<0.000000e+00> : vector<64x16xf32>
    %23 = tpu.matmul %20, %22, %cst_31 {dimension_numbers = #tpu.dot_dimension_numbers<[1], [0], [0], [1], [0, 0, 1, 1], [], []>} : vector<64x32xbf16>, vector<32x16xbf16>, vector<64x16xf32> -> vector<64x16xf32>
    %24 = arith.addf %18, %23 : vector<64x16xf32>
    %c10_32 = arith.constant 10 : index
    %c22 = arith.constant 22 : index
    %c0_33 = arith.constant 0 : index
    %25 = vector.load %arg20[%c10_32, %c22, %c0_33] : memref<40x40x32xbf16, #tpu.memory_space<vmem>>, vector<8x8x32xbf16>
    %26 = vector.shape_cast %25 : vector<8x8x32xbf16> to vector<64x32xbf16>
    %c2 = arith.constant 2 : index
    %c0_34 = arith.constant 0 : index
    %c0_35 = arith.constant 0 : index
    %27 = vector.load %arg3[%c2, %c0_34, %c0_35] : memref<18x32x16xbf16, #tpu.memory_space<vmem>>, vector<1x32x16xbf16>
    %28 = vector.shape_cast %27 : vector<1x32x16xbf16> to vector<32x16xbf16>
    %cst_36 = arith.constant dense<0.000000e+00> : vector<64x16xf32>
    %29 = tpu.matmul %26, %28, %cst_36 {dimension_numbers = #tpu.dot_dimension_numbers<[1], [0], [0], [1], [0, 0, 1, 1], [], []>} : vector<64x32xbf16>, vector<32x16xbf16>, vector<64x16xf32> -> vector<64x16xf32>
    %30 = arith.addf %24, %29 : vector<64x16xf32>
    %c16_37 = arith.constant 16 : index
    %c10_38 = arith.constant 10 : index
    %c0_39 = arith.constant 0 : index
    %31 = vector.load %arg20[%c16_37, %c10_38, %c0_39] : memref<40x40x32xbf16, #tpu.memory_space<vmem>>, vector<8x8x32xbf16>
    %32 = vector.shape_cast %31 : vector<8x8x32xbf16> to vector<64x32xbf16>
    %c3 = arith.constant 3 : index
    %c0_40 = arith.constant 0 : index
    %c0_41 = arith.constant 0 : index
    %33 = vector.load %arg3[%c3, %c0_40, %c0_41] : memref<18x32x16xbf16, #tpu.memory_space<vmem>>, vector<1x32x16xbf16>
    %34 = vector.shape_cast %33 : vector<1x32x16xbf16> to vector<32x16xbf16>
    %cst_42 = arith.constant dense<0.000000e+00> : vector<64x16xf32>
    %35 = tpu.matmul %32, %34, %cst_42 {dimension_numbers = #tpu.dot_dimension_numbers<[1], [0], [0], [1], [0, 0, 1, 1], [], []>} : vector<64x32xbf16>, vector<32x16xbf16>, vector<64x16xf32> -> vector<64x16xf32>
    %36 = arith.addf %30, %35 : vector<64x16xf32>
    %c16_43 = arith.constant 16 : index
    %c16_44 = arith.constant 16 : index
    %c0_45 = arith.constant 0 : index
    %37 = vector.load %arg20[%c16_43, %c16_44, %c0_45] : memref<40x40x32xbf16, #tpu.memory_space<vmem>>, vector<8x8x32xbf16>
    %38 = vector.shape_cast %37 : vector<8x8x32xbf16> to vector<64x32xbf16>
    %c4 = arith.constant 4 : index
    %c0_46 = arith.constant 0 : index
    %c0_47 = arith.constant 0 : index
    %39 = vector.load %arg3[%c4, %c0_46, %c0_47] : memref<18x32x16xbf16, #tpu.memory_space<vmem>>, vector<1x32x16xbf16>
    %40 = vector.shape_cast %39 : vector<1x32x16xbf16> to vector<32x16xbf16>
    %cst_48 = arith.constant dense<0.000000e+00> : vector<64x16xf32>
    %41 = tpu.matmul %38, %40, %cst_48 {dimension_numbers = #tpu.dot_dimension_numbers<[1], [0], [0], [1], [0, 0, 1, 1], [], []>} : vector<64x32xbf16>, vector<32x16xbf16>, vector<64x16xf32> -> vector<64x16xf32>
    %42 = arith.addf %36, %41 : vector<64x16xf32>
    %c16_49 = arith.constant 16 : index
    %c22_50 = arith.constant 22 : index
    %c0_51 = arith.constant 0 : index
    %43 = vector.load %arg20[%c16_49, %c22_50, %c0_51] : memref<40x40x32xbf16, #tpu.memory_space<vmem>>, vector<8x8x32xbf16>
    %44 = vector.shape_cast %43 : vector<8x8x32xbf16> to vector<64x32xbf16>
    %c5 = arith.constant 5 : index
    %c0_52 = arith.constant 0 : index
    %c0_53 = arith.constant 0 : index
    %45 = vector.load %arg3[%c5, %c0_52, %c0_53] : memref<18x32x16xbf16, #tpu.memory_space<vmem>>, vector<1x32x16xbf16>
    %46 = vector.shape_cast %45 : vector<1x32x16xbf16> to vector<32x16xbf16>
    %cst_54 = arith.constant dense<0.000000e+00> : vector<64x16xf32>
    %47 = tpu.matmul %44, %46, %cst_54 {dimension_numbers = #tpu.dot_dimension_numbers<[1], [0], [0], [1], [0, 0, 1, 1], [], []>} : vector<64x32xbf16>, vector<32x16xbf16>, vector<64x16xf32> -> vector<64x16xf32>
    %48 = arith.addf %42, %47 : vector<64x16xf32>
    %c22_55 = arith.constant 22 : index
    %c10_56 = arith.constant 10 : index
    %c0_57 = arith.constant 0 : index
    %49 = vector.load %arg20[%c22_55, %c10_56, %c0_57] : memref<40x40x32xbf16, #tpu.memory_space<vmem>>, vector<8x8x32xbf16>
    %50 = vector.shape_cast %49 : vector<8x8x32xbf16> to vector<64x32xbf16>
    %c6 = arith.constant 6 : index
    %c0_58 = arith.constant 0 : index
    %c0_59 = arith.constant 0 : index
    %51 = vector.load %arg3[%c6, %c0_58, %c0_59] : memref<18x32x16xbf16, #tpu.memory_space<vmem>>, vector<1x32x16xbf16>
    %52 = vector.shape_cast %51 : vector<1x32x16xbf16> to vector<32x16xbf16>
    %cst_60 = arith.constant dense<0.000000e+00> : vector<64x16xf32>
    %53 = tpu.matmul %50, %52, %cst_60 {dimension_numbers = #tpu.dot_dimension_numbers<[1], [0], [0], [1], [0, 0, 1, 1], [], []>} : vector<64x32xbf16>, vector<32x16xbf16>, vector<64x16xf32> -> vector<64x16xf32>
    %54 = arith.addf %48, %53 : vector<64x16xf32>
    %c22_61 = arith.constant 22 : index
    %c16_62 = arith.constant 16 : index
    %c0_63 = arith.constant 0 : index
    %55 = vector.load %arg20[%c22_61, %c16_62, %c0_63] : memref<40x40x32xbf16, #tpu.memory_space<vmem>>, vector<8x8x32xbf16>
    %56 = vector.shape_cast %55 : vector<8x8x32xbf16> to vector<64x32xbf16>
    %c7 = arith.constant 7 : index
    %c0_64 = arith.constant 0 : index
    %c0_65 = arith.constant 0 : index
    %57 = vector.load %arg3[%c7, %c0_64, %c0_65] : memref<18x32x16xbf16, #tpu.memory_space<vmem>>, vector<1x32x16xbf16>
    %58 = vector.shape_cast %57 : vector<1x32x16xbf16> to vector<32x16xbf16>
    %cst_66 = arith.constant dense<0.000000e+00> : vector<64x16xf32>
    %59 = tpu.matmul %56, %58, %cst_66 {dimension_numbers = #tpu.dot_dimension_numbers<[1], [0], [0], [1], [0, 0, 1, 1], [], []>} : vector<64x32xbf16>, vector<32x16xbf16>, vector<64x16xf32> -> vector<64x16xf32>
    %60 = arith.addf %54, %59 : vector<64x16xf32>
    %c22_67 = arith.constant 22 : index
    %c22_68 = arith.constant 22 : index
    %c0_69 = arith.constant 0 : index
    %61 = vector.load %arg20[%c22_67, %c22_68, %c0_69] : memref<40x40x32xbf16, #tpu.memory_space<vmem>>, vector<8x8x32xbf16>
    %62 = vector.shape_cast %61 : vector<8x8x32xbf16> to vector<64x32xbf16>
    %c8 = arith.constant 8 : index
    %c0_70 = arith.constant 0 : index
    %c0_71 = arith.constant 0 : index
    %63 = vector.load %arg3[%c8, %c0_70, %c0_71] : memref<18x32x16xbf16, #tpu.memory_space<vmem>>, vector<1x32x16xbf16>
    %64 = vector.shape_cast %63 : vector<1x32x16xbf16> to vector<32x16xbf16>
    %cst_72 = arith.constant dense<0.000000e+00> : vector<64x16xf32>
    %65 = tpu.matmul %62, %64, %cst_72 {dimension_numbers = #tpu.dot_dimension_numbers<[1], [0], [0], [1], [0, 0, 1, 1], [], []>} : vector<64x32xbf16>, vector<32x16xbf16>, vector<64x16xf32> -> vector<64x16xf32>
    %66 = arith.addf %60, %65 : vector<64x16xf32>
    %cst_73 = arith.constant 0.000000e+00 : f32
    %67 = vector.broadcast %cst_73 : f32 to vector<64x16xf32>
    %c4_74 = arith.constant 4 : index
    %c4_75 = arith.constant 4 : index
    %c0_76 = arith.constant 0 : index
    %68 = vector.load %arg20[%c4_74, %c4_75, %c0_76] : memref<40x40x32xbf16, #tpu.memory_space<vmem>>, vector<8x8x32xbf16>
    %69 = vector.shape_cast %68 : vector<8x8x32xbf16> to vector<64x32xbf16>
    %c9 = arith.constant 9 : index
    %c0_77 = arith.constant 0 : index
    %c0_78 = arith.constant 0 : index
    %70 = vector.load %arg3[%c9, %c0_77, %c0_78] : memref<18x32x16xbf16, #tpu.memory_space<vmem>>, vector<1x32x16xbf16>
    %71 = vector.shape_cast %70 : vector<1x32x16xbf16> to vector<32x16xbf16>
    %cst_79 = arith.constant dense<0.000000e+00> : vector<64x16xf32>
    %72 = tpu.matmul %69, %71, %cst_79 {dimension_numbers = #tpu.dot_dimension_numbers<[1], [0], [0], [1], [0, 0, 1, 1], [], []>} : vector<64x32xbf16>, vector<32x16xbf16>, vector<64x16xf32> -> vector<64x16xf32>
    %73 = arith.addf %67, %72 : vector<64x16xf32>
    %c4_80 = arith.constant 4 : index
    %c16_81 = arith.constant 16 : index
    %c0_82 = arith.constant 0 : index
    %74 = vector.load %arg20[%c4_80, %c16_81, %c0_82] : memref<40x40x32xbf16, #tpu.memory_space<vmem>>, vector<8x8x32xbf16>
    %75 = vector.shape_cast %74 : vector<8x8x32xbf16> to vector<64x32xbf16>
    %c10_83 = arith.constant 10 : index
    %c0_84 = arith.constant 0 : index
    %c0_85 = arith.constant 0 : index
    %76 = vector.load %arg3[%c10_83, %c0_84, %c0_85] : memref<18x32x16xbf16, #tpu.memory_space<vmem>>, vector<1x32x16xbf16>
    %77 = vector.shape_cast %76 : vector<1x32x16xbf16> to vector<32x16xbf16>
    %cst_86 = arith.constant dense<0.000000e+00> : vector<64x16xf32>
    %78 = tpu.matmul %75, %77, %cst_86 {dimension_numbers = #tpu.dot_dimension_numbers<[1], [0], [0], [1], [0, 0, 1, 1], [], []>} : vector<64x32xbf16>, vector<32x16xbf16>, vector<64x16xf32> -> vector<64x16xf32>
    %79 = arith.addf %73, %78 : vector<64x16xf32>
    %c4_87 = arith.constant 4 : index
    %c28 = arith.constant 28 : index
    %c0_88 = arith.constant 0 : index
    %80 = vector.load %arg20[%c4_87, %c28, %c0_88] : memref<40x40x32xbf16, #tpu.memory_space<vmem>>, vector<8x8x32xbf16>
    %81 = vector.shape_cast %80 : vector<8x8x32xbf16> to vector<64x32xbf16>
    %c11 = arith.constant 11 : index
    %c0_89 = arith.constant 0 : index
    %c0_90 = arith.constant 0 : index
    %82 = vector.load %arg3[%c11, %c0_89, %c0_90] : memref<18x32x16xbf16, #tpu.memory_space<vmem>>, vector<1x32x16xbf16>
    %83 = vector.shape_cast %82 : vector<1x32x16xbf16> to vector<32x16xbf16>
    %cst_91 = arith.constant dense<0.000000e+00> : vector<64x16xf32>
    %84 = tpu.matmul %81, %83, %cst_91 {dimension_numbers = #tpu.dot_dimension_numbers<[1], [0], [0], [1], [0, 0, 1, 1], [], []>} : vector<64x32xbf16>, vector<32x16xbf16>, vector<64x16xf32> -> vector<64x16xf32>
    %85 = arith.addf %79, %84 : vector<64x16xf32>
    %c16_92 = arith.constant 16 : index
    %c4_93 = arith.constant 4 : index
    %c0_94 = arith.constant 0 : index
    %86 = vector.load %arg20[%c16_92, %c4_93, %c0_94] : memref<40x40x32xbf16, #tpu.memory_space<vmem>>, vector<8x8x32xbf16>
    %87 = vector.shape_cast %86 : vector<8x8x32xbf16> to vector<64x32xbf16>
    %c12 = arith.constant 12 : index
    %c0_95 = arith.constant 0 : index
    %c0_96 = arith.constant 0 : index
    %88 = vector.load %arg3[%c12, %c0_95, %c0_96] : memref<18x32x16xbf16, #tpu.memory_space<vmem>>, vector<1x32x16xbf16>
    %89 = vector.shape_cast %88 : vector<1x32x16xbf16> to vector<32x16xbf16>
    %cst_97 = arith.constant dense<0.000000e+00> : vector<64x16xf32>
    %90 = tpu.matmul %87, %89, %cst_97 {dimension_numbers = #tpu.dot_dimension_numbers<[1], [0], [0], [1], [0, 0, 1, 1], [], []>} : vector<64x32xbf16>, vector<32x16xbf16>, vector<64x16xf32> -> vector<64x16xf32>
    %91 = arith.addf %85, %90 : vector<64x16xf32>
    %c16_98 = arith.constant 16 : index
    %c16_99 = arith.constant 16 : index
    %c0_100 = arith.constant 0 : index
    %92 = vector.load %arg20[%c16_98, %c16_99, %c0_100] : memref<40x40x32xbf16, #tpu.memory_space<vmem>>, vector<8x8x32xbf16>
    %93 = vector.shape_cast %92 : vector<8x8x32xbf16> to vector<64x32xbf16>
    %c13 = arith.constant 13 : index
    %c0_101 = arith.constant 0 : index
    %c0_102 = arith.constant 0 : index
    %94 = vector.load %arg3[%c13, %c0_101, %c0_102] : memref<18x32x16xbf16, #tpu.memory_space<vmem>>, vector<1x32x16xbf16>
    %95 = vector.shape_cast %94 : vector<1x32x16xbf16> to vector<32x16xbf16>
    %cst_103 = arith.constant dense<0.000000e+00> : vector<64x16xf32>
    %96 = tpu.matmul %93, %95, %cst_103 {dimension_numbers = #tpu.dot_dimension_numbers<[1], [0], [0], [1], [0, 0, 1, 1], [], []>} : vector<64x32xbf16>, vector<32x16xbf16>, vector<64x16xf32> -> vector<64x16xf32>
    %97 = arith.addf %91, %96 : vector<64x16xf32>
    %c16_104 = arith.constant 16 : index
    %c28_105 = arith.constant 28 : index
    %c0_106 = arith.constant 0 : index
    %98 = vector.load %arg20[%c16_104, %c28_105, %c0_106] : memref<40x40x32xbf16, #tpu.memory_space<vmem>>, vector<8x8x32xbf16>
    %99 = vector.shape_cast %98 : vector<8x8x32xbf16> to vector<64x32xbf16>
    %c14 = arith.constant 14 : index
    %c0_107 = arith.constant 0 : index
    %c0_108 = arith.constant 0 : index
    %100 = vector.load %arg3[%c14, %c0_107, %c0_108] : memref<18x32x16xbf16, #tpu.memory_space<vmem>>, vector<1x32x16xbf16>
    %101 = vector.shape_cast %100 : vector<1x32x16xbf16> to vector<32x16xbf16>
    %cst_109 = arith.constant dense<0.000000e+00> : vector<64x16xf32>
    %102 = tpu.matmul %99, %101, %cst_109 {dimension_numbers = #tpu.dot_dimension_numbers<[1], [0], [0], [1], [0, 0, 1, 1], [], []>} : vector<64x32xbf16>, vector<32x16xbf16>, vector<64x16xf32> -> vector<64x16xf32>
    %103 = arith.addf %97, %102 : vector<64x16xf32>
    %c28_110 = arith.constant 28 : index
    %c4_111 = arith.constant 4 : index
    %c0_112 = arith.constant 0 : index
    %104 = vector.load %arg20[%c28_110, %c4_111, %c0_112] : memref<40x40x32xbf16, #tpu.memory_space<vmem>>, vector<8x8x32xbf16>
    %105 = vector.shape_cast %104 : vector<8x8x32xbf16> to vector<64x32xbf16>
    %c15 = arith.constant 15 : index
    %c0_113 = arith.constant 0 : index
    %c0_114 = arith.constant 0 : index
    %106 = vector.load %arg3[%c15, %c0_113, %c0_114] : memref<18x32x16xbf16, #tpu.memory_space<vmem>>, vector<1x32x16xbf16>
    %107 = vector.shape_cast %106 : vector<1x32x16xbf16> to vector<32x16xbf16>
    %cst_115 = arith.constant dense<0.000000e+00> : vector<64x16xf32>
    %108 = tpu.matmul %105, %107, %cst_115 {dimension_numbers = #tpu.dot_dimension_numbers<[1], [0], [0], [1], [0, 0, 1, 1], [], []>} : vector<64x32xbf16>, vector<32x16xbf16>, vector<64x16xf32> -> vector<64x16xf32>
    %109 = arith.addf %103, %108 : vector<64x16xf32>
    %c28_116 = arith.constant 28 : index
    %c16_117 = arith.constant 16 : index
    %c0_118 = arith.constant 0 : index
    %110 = vector.load %arg20[%c28_116, %c16_117, %c0_118] : memref<40x40x32xbf16, #tpu.memory_space<vmem>>, vector<8x8x32xbf16>
    %111 = vector.shape_cast %110 : vector<8x8x32xbf16> to vector<64x32xbf16>
    %c16_119 = arith.constant 16 : index
    %c0_120 = arith.constant 0 : index
    %c0_121 = arith.constant 0 : index
    %112 = vector.load %arg3[%c16_119, %c0_120, %c0_121] : memref<18x32x16xbf16, #tpu.memory_space<vmem>>, vector<1x32x16xbf16>
    %113 = vector.shape_cast %112 : vector<1x32x16xbf16> to vector<32x16xbf16>
    %cst_122 = arith.constant dense<0.000000e+00> : vector<64x16xf32>
    %114 = tpu.matmul %111, %113, %cst_122 {dimension_numbers = #tpu.dot_dimension_numbers<[1], [0], [0], [1], [0, 0, 1, 1], [], []>} : vector<64x32xbf16>, vector<32x16xbf16>, vector<64x16xf32> -> vector<64x16xf32>
    %115 = arith.addf %109, %114 : vector<64x16xf32>
    %c28_123 = arith.constant 28 : index
    %c28_124 = arith.constant 28 : index
    %c0_125 = arith.constant 0 : index
    %116 = vector.load %arg20[%c28_123, %c28_124, %c0_125] : memref<40x40x32xbf16, #tpu.memory_space<vmem>>, vector<8x8x32xbf16>
    %117 = vector.shape_cast %116 : vector<8x8x32xbf16> to vector<64x32xbf16>
    %c17 = arith.constant 17 : index
    %c0_126 = arith.constant 0 : index
    %c0_127 = arith.constant 0 : index
    %118 = vector.load %arg3[%c17, %c0_126, %c0_127] : memref<18x32x16xbf16, #tpu.memory_space<vmem>>, vector<1x32x16xbf16>
    %119 = vector.shape_cast %118 : vector<1x32x16xbf16> to vector<32x16xbf16>
    %cst_128 = arith.constant dense<0.000000e+00> : vector<64x16xf32>
    %120 = tpu.matmul %117, %119, %cst_128 {dimension_numbers = #tpu.dot_dimension_numbers<[1], [0], [0], [1], [0, 0, 1, 1], [], []>} : vector<64x32xbf16>, vector<32x16xbf16>, vector<64x16xf32> -> vector<64x16xf32>
    %121 = arith.addf %115, %120 : vector<64x16xf32>
    %122 = tpu.concatenate %66, %121 in 1 : vector<64x16xf32>, vector<64x16xf32> -> vector<64x32xf32>
    %c0_129 = arith.constant 0 : index
    %c0_130 = arith.constant 0 : index
    %123 = vector.load %arg4[%c0_129, %c0_130] : memref<1x32xf32, #tpu.memory_space<vmem>>, vector<1x32xf32>
    %124 = vector.broadcast %123 : vector<1x32xf32> to vector<64x32xf32>
    %125 = arith.addf %122, %124 : vector<64x32xf32>
    %cst_131 = arith.constant 0.000000e+00 : f32
    %126 = vector.broadcast %cst_131 : f32 to vector<64x32xf32>
    %127 = arith.maximumf %125, %126 : vector<64x32xf32>
    %c0_132 = arith.constant 0 : index
    %c0_133 = arith.constant 0 : index
    %128 = vector.load %arg2[%c0_132, %c0_133] : memref<64x32xf32, #tpu.memory_space<vmem>>, vector<64x32xf32>
    %129 = arith.addf %127, %128 : vector<64x32xf32>
    %130 = arith.truncf %129 : vector<64x32xf32> to vector<64x32xbf16>
    %c0_134 = arith.constant 0 : index
    %c0_135 = arith.constant 0 : index
    %131 = vector.load %arg5[%c0_134, %c0_135] : memref<32x32xbf16, #tpu.memory_space<vmem>>, vector<32x32xbf16>
    %cst_136 = arith.constant dense<0.000000e+00> : vector<64x32xf32>
    %132 = tpu.matmul %130, %131, %cst_136 {dimension_numbers = #tpu.dot_dimension_numbers<[1], [0], [0], [1], [0, 0, 1, 1], [], []>} : vector<64x32xbf16>, vector<32x32xbf16>, vector<64x32xf32> -> vector<64x32xf32>
    %c0_137 = arith.constant 0 : index
    %c0_138 = arith.constant 0 : index
    %133 = vector.load %arg6[%c0_137, %c0_138] : memref<1x32xf32, #tpu.memory_space<vmem>>, vector<1x32xf32>
    %134 = vector.broadcast %133 : vector<1x32xf32> to vector<64x32xf32>
    %135 = arith.addf %132, %134 : vector<64x32xf32>
    %136 = arith.truncf %135 : vector<64x32xf32> to vector<64x32xbf16>
    %c0_139 = arith.constant 0 : index
    %c0_140 = arith.constant 0 : index
    %137 = vector.load %arg7[%c0_139, %c0_140] : memref<32x96xbf16, #tpu.memory_space<vmem>>, vector<32x96xbf16>
    %cst_141 = arith.constant dense<0.000000e+00> : vector<64x96xf32>
    %138 = tpu.matmul %136, %137, %cst_141 {dimension_numbers = #tpu.dot_dimension_numbers<[1], [0], [0], [1], [0, 0, 1, 1], [], []>} : vector<64x32xbf16>, vector<32x96xbf16>, vector<64x96xf32> -> vector<64x96xf32>
    %c0_142 = arith.constant 0 : index
    %c0_143 = arith.constant 0 : index
    %139 = vector.load %arg8[%c0_142, %c0_143] : memref<1x96xf32, #tpu.memory_space<vmem>>, vector<1x96xf32>
    %140 = vector.broadcast %139 : vector<1x96xf32> to vector<64x96xf32>
    %141 = arith.addf %138, %140 : vector<64x96xf32>
    %142 = vector.extract_strided_slice %141 {offsets = [0, 0], sizes = [64, 32], strides = [1, 1]} : vector<64x96xf32> to vector<64x32xf32>
    %143 = vector.extract_strided_slice %141 {offsets = [0, 32], sizes = [64, 32], strides = [1, 1]} : vector<64x96xf32> to vector<64x32xf32>
    %144 = vector.extract_strided_slice %141 {offsets = [0, 64], sizes = [64, 32], strides = [1, 1]} : vector<64x96xf32> to vector<64x32xf32>
    %cst_144 = arith.constant 0.000000e+00 : f32
    %145 = vector.broadcast %cst_144 : f32 to vector<64x32xf32>
    %146 = arith.cmpf ogt, %142, %145 : vector<64x32xf32>
    %cst_145 = arith.constant 1.000000e+00 : f32
    %147 = vector.broadcast %cst_145 : f32 to vector<64x32xf32>
    %148 = arith.addf %142, %147 : vector<64x32xf32>
    %149 = math.exp %142 : vector<64x32xf32>
    %150 = arith.select %146, %148, %149 : vector<64x32xi1>, vector<64x32xf32>
    %cst_146 = arith.constant 0.000000e+00 : f32
    %151 = vector.broadcast %cst_146 : f32 to vector<64x32xf32>
    %152 = arith.cmpf ogt, %143, %151 : vector<64x32xf32>
    %cst_147 = arith.constant 1.000000e+00 : f32
    %153 = vector.broadcast %cst_147 : f32 to vector<64x32xf32>
    %154 = arith.addf %143, %153 : vector<64x32xf32>
    %155 = math.exp %143 : vector<64x32xf32>
    %156 = arith.select %152, %154, %155 : vector<64x32xi1>, vector<64x32xf32>
    %157 = arith.truncf %156 : vector<64x32xf32> to vector<64x32xbf16>
    %158 = arith.truncf %144 : vector<64x32xf32> to vector<64x32xbf16>
    %cst_148 = arith.constant dense<0.000000e+00> : vector<32x32xf32>
    %159 = tpu.matmul %157, %158, %cst_148 {dimension_numbers = #tpu.dot_dimension_numbers<[0], [0], [1], [1], [0, 1, 1, 1], [], []>} : vector<64x32xbf16>, vector<64x32xbf16>, vector<32x32xf32> -> vector<32x32xf32>
    %cst_149 = arith.constant dense<0.000000e+00> : vector<32xf32>
    %160 = vector.multi_reduction <add>, %156, %cst_149 [0] : vector<64x32xf32> to vector<32xf32>
    %161 = vector.shape_cast %160 : vector<32xf32> to vector<1x32xf32>
    %162 = vector.broadcast %161 : vector<1x32xf32> to vector<64x32xf32>
    %163 = arith.mulf %150, %162 : vector<64x32xf32>
    %cst_150 = arith.constant dense<0.000000e+00> : vector<64xf32>
    %164 = vector.multi_reduction <add>, %163, %cst_150 [1] : vector<64x32xf32> to vector<64xf32>
    %165 = vector.shape_cast %164 : vector<64xf32> to vector<64x1xf32>
    %cst_151 = arith.constant 9.99999997E-7 : f32
    %166 = vector.broadcast %cst_151 : f32 to vector<64x1xf32>
    %167 = arith.addf %165, %166 : vector<64x1xf32>
    %168 = arith.truncf %150 : vector<64x32xf32> to vector<64x32xbf16>
    %169 = arith.truncf %159 : vector<32x32xf32> to vector<32x32xbf16>
    %cst_152 = arith.constant dense<0.000000e+00> : vector<64x32xf32>
    %170 = tpu.matmul %168, %169, %cst_152 {dimension_numbers = #tpu.dot_dimension_numbers<[1], [0], [0], [1], [0, 0, 1, 1], [], []>} : vector<64x32xbf16>, vector<32x32xbf16>, vector<64x32xf32> -> vector<64x32xf32>
    %171 = tpu.reciprocal %167 {approx = true} : vector<64x1xf32> -> vector<64x1xf32>
    %172 = vector.broadcast %171 : vector<64x1xf32> to vector<64x32xf32>
    %173 = arith.mulf %170, %172 : vector<64x32xf32>
    %174 = arith.truncf %173 : vector<64x32xf32> to vector<64x32xbf16>
    %c0_153 = arith.constant 0 : index
    %c0_154 = arith.constant 0 : index
    %175 = vector.load %arg9[%c0_153, %c0_154] : memref<32x32xbf16, #tpu.memory_space<vmem>>, vector<32x32xbf16>
    %cst_155 = arith.constant dense<0.000000e+00> : vector<64x32xf32>
    %176 = tpu.matmul %174, %175, %cst_155 {dimension_numbers = #tpu.dot_dimension_numbers<[1], [0], [0], [1], [0, 0, 1, 1], [], []>} : vector<64x32xbf16>, vector<32x32xbf16>, vector<64x32xf32> -> vector<64x32xf32>
    %c0_156 = arith.constant 0 : index
    %c0_157 = arith.constant 0 : index
    %177 = vector.load %arg10[%c0_156, %c0_157] : memref<1x32xf32, #tpu.memory_space<vmem>>, vector<1x32xf32>
    %178 = vector.broadcast %177 : vector<1x32xf32> to vector<64x32xf32>
    %179 = arith.addf %176, %178 : vector<64x32xf32>
    %180 = arith.addf %135, %179 : vector<64x32xf32>
    %c0_158 = arith.constant 0 : index
    %c0_159 = arith.constant 0 : index
    %181 = vector.load %arg11[%c0_158, %c0_159] : memref<1x32xf32, #tpu.memory_space<vmem>>, vector<1x32xf32>
    %c0_160 = arith.constant 0 : index
    %c0_161 = arith.constant 0 : index
    %182 = vector.load %arg12[%c0_160, %c0_161] : memref<1x32xf32, #tpu.memory_space<vmem>>, vector<1x32xf32>
    %cst_162 = arith.constant dense<0.000000e+00> : vector<64xf32>
    %183 = vector.multi_reduction <add>, %180, %cst_162 [1] : vector<64x32xf32> to vector<64xf32>
    %184 = vector.shape_cast %183 : vector<64xf32> to vector<64x1xf32>
    %cst_163 = arith.constant 3.200000e+01 : f32
    %185 = vector.broadcast %cst_163 : f32 to vector<64x1xf32>
    %186 = arith.divf %184, %185 : vector<64x1xf32>
    %187 = vector.broadcast %186 : vector<64x1xf32> to vector<64x32xf32>
    %188 = arith.subf %180, %187 : vector<64x32xf32>
    %189 = arith.mulf %188, %188 : vector<64x32xf32>
    %cst_164 = arith.constant dense<0.000000e+00> : vector<64xf32>
    %190 = vector.multi_reduction <add>, %189, %cst_164 [1] : vector<64x32xf32> to vector<64xf32>
    %191 = vector.shape_cast %190 : vector<64xf32> to vector<64x1xf32>
    %cst_165 = arith.constant 3.200000e+01 : f32
    %192 = vector.broadcast %cst_165 : f32 to vector<64x1xf32>
    %193 = arith.divf %191, %192 : vector<64x1xf32>
    %194 = vector.broadcast %186 : vector<64x1xf32> to vector<64x32xf32>
    %195 = arith.subf %180, %194 : vector<64x32xf32>
    %cst_166 = arith.constant 9.99999974E-6 : f32
    %196 = vector.broadcast %cst_166 : f32 to vector<64x1xf32>
    %197 = arith.addf %193, %196 : vector<64x1xf32>
    %198 = math.rsqrt %197 : vector<64x1xf32>
    %199 = vector.broadcast %198 : vector<64x1xf32> to vector<64x32xf32>
    %200 = arith.mulf %195, %199 : vector<64x32xf32>
    %201 = vector.broadcast %181 : vector<1x32xf32> to vector<64x32xf32>
    %202 = arith.mulf %200, %201 : vector<64x32xf32>
    %203 = vector.broadcast %182 : vector<1x32xf32> to vector<64x32xf32>
    %204 = arith.addf %202, %203 : vector<64x32xf32>
    %205 = arith.truncf %204 : vector<64x32xf32> to vector<64x32xbf16>
    %c0_167 = arith.constant 0 : index
    %c0_168 = arith.constant 0 : index
    %206 = vector.load %arg13[%c0_167, %c0_168] : memref<32x32xbf16, #tpu.memory_space<vmem>>, vector<32x32xbf16>
    %cst_169 = arith.constant dense<0.000000e+00> : vector<64x32xf32>
    %207 = tpu.matmul %205, %206, %cst_169 {dimension_numbers = #tpu.dot_dimension_numbers<[1], [0], [0], [1], [0, 0, 1, 1], [], []>} : vector<64x32xbf16>, vector<32x32xbf16>, vector<64x32xf32> -> vector<64x32xf32>
    %c0_170 = arith.constant 0 : index
    %c0_171 = arith.constant 0 : index
    %208 = vector.load %arg14[%c0_170, %c0_171] : memref<1x32xf32, #tpu.memory_space<vmem>>, vector<1x32xf32>
    %209 = vector.broadcast %208 : vector<1x32xf32> to vector<64x32xf32>
    %210 = arith.addf %207, %209 : vector<64x32xf32>
    %cst_172 = arith.constant 0.000000e+00 : f32
    %211 = vector.broadcast %cst_172 : f32 to vector<64x32xf32>
    %212 = arith.maximumf %210, %211 : vector<64x32xf32>
    %213 = arith.truncf %212 : vector<64x32xf32> to vector<64x32xbf16>
    %c0_173 = arith.constant 0 : index
    %c0_174 = arith.constant 0 : index
    %214 = vector.load %arg15[%c0_173, %c0_174] : memref<32x32xbf16, #tpu.memory_space<vmem>>, vector<32x32xbf16>
    %cst_175 = arith.constant dense<0.000000e+00> : vector<64x32xf32>
    %215 = tpu.matmul %213, %214, %cst_175 {dimension_numbers = #tpu.dot_dimension_numbers<[1], [0], [0], [1], [0, 0, 1, 1], [], []>} : vector<64x32xbf16>, vector<32x32xbf16>, vector<64x32xf32> -> vector<64x32xf32>
    %c0_176 = arith.constant 0 : index
    %c0_177 = arith.constant 0 : index
    %216 = vector.load %arg16[%c0_176, %c0_177] : memref<1x32xf32, #tpu.memory_space<vmem>>, vector<1x32xf32>
    %217 = vector.broadcast %216 : vector<1x32xf32> to vector<64x32xf32>
    %218 = arith.addf %215, %217 : vector<64x32xf32>
    %219 = arith.addf %204, %218 : vector<64x32xf32>
    %c0_178 = arith.constant 0 : index
    %c0_179 = arith.constant 0 : index
    %220 = vector.load %arg17[%c0_178, %c0_179] : memref<1x32xf32, #tpu.memory_space<vmem>>, vector<1x32xf32>
    %c0_180 = arith.constant 0 : index
    %c0_181 = arith.constant 0 : index
    %221 = vector.load %arg18[%c0_180, %c0_181] : memref<1x32xf32, #tpu.memory_space<vmem>>, vector<1x32xf32>
    %cst_182 = arith.constant dense<0.000000e+00> : vector<64xf32>
    %222 = vector.multi_reduction <add>, %219, %cst_182 [1] : vector<64x32xf32> to vector<64xf32>
    %223 = vector.shape_cast %222 : vector<64xf32> to vector<64x1xf32>
    %cst_183 = arith.constant 3.200000e+01 : f32
    %224 = vector.broadcast %cst_183 : f32 to vector<64x1xf32>
    %225 = arith.divf %223, %224 : vector<64x1xf32>
    %226 = vector.broadcast %225 : vector<64x1xf32> to vector<64x32xf32>
    %227 = arith.subf %219, %226 : vector<64x32xf32>
    %228 = arith.mulf %227, %227 : vector<64x32xf32>
    %cst_184 = arith.constant dense<0.000000e+00> : vector<64xf32>
    %229 = vector.multi_reduction <add>, %228, %cst_184 [1] : vector<64x32xf32> to vector<64xf32>
    %230 = vector.shape_cast %229 : vector<64xf32> to vector<64x1xf32>
    %cst_185 = arith.constant 3.200000e+01 : f32
    %231 = vector.broadcast %cst_185 : f32 to vector<64x1xf32>
    %232 = arith.divf %230, %231 : vector<64x1xf32>
    %233 = vector.broadcast %225 : vector<64x1xf32> to vector<64x32xf32>
    %234 = arith.subf %219, %233 : vector<64x32xf32>
    %cst_186 = arith.constant 9.99999974E-6 : f32
    %235 = vector.broadcast %cst_186 : f32 to vector<64x1xf32>
    %236 = arith.addf %232, %235 : vector<64x1xf32>
    %237 = math.rsqrt %236 : vector<64x1xf32>
    %238 = vector.broadcast %237 : vector<64x1xf32> to vector<64x32xf32>
    %239 = arith.mulf %234, %238 : vector<64x32xf32>
    %240 = vector.broadcast %220 : vector<1x32xf32> to vector<64x32xf32>
    %241 = arith.mulf %239, %240 : vector<64x32xf32>
    %242 = vector.broadcast %221 : vector<1x32xf32> to vector<64x32xf32>
    %243 = arith.addf %241, %242 : vector<64x32xf32>
    %c0_187 = arith.constant 0 : index
    %c0_188 = arith.constant 0 : index
    %c0_189 = arith.constant 0 : index
    %244 = vector.load %arg19[%c0_187, %c0_188, %c0_189] : memref<1x64x32xf32, #tpu.memory_space<vmem>>, vector<1x64x32xf32>
    %245 = vector.shape_cast %244 : vector<1x64x32xf32> to vector<64x32xf32>
    %246 = vector.shape_cast %243 : vector<64x32xf32> to vector<1x64x32xf32>
    tpu.vector_store %arg19[%c0_187, %c0_188, %c0_189], %246 {strides = array<i32>} : memref<1x64x32xf32, #tpu.memory_space<vmem>>, vector<1x64x32xf32>,
    return
  }
  func.func @transform_0(%arg0: i32) -> (i32, i32, i32, i32) {
    %c0_i32 = arith.constant 0 : i32
    %c0_i32_0 = arith.constant 0 : i32
    %c0_i32_1 = arith.constant 0 : i32
    %c0_i32_2 = arith.constant 0 : i32
    return %arg0, %c0_i32, %c0_i32_0, %c0_i32_1 : i32, i32, i32, i32
  }
  func.func @transform_1(%arg0: i32) -> (i32, i32) {
    %c0_i32 = arith.constant 0 : i32
    %c0_i32_0 = arith.constant 0 : i32
    %c0_i32_1 = arith.constant 0 : i32
    return %c0_i32, %c0_i32_0 : i32, i32
  }
  func.func @transform_2(%arg0: i32) -> (i32, i32, i32) {
    %c0_i32 = arith.constant 0 : i32
    %c0_i32_0 = arith.constant 0 : i32
    %c0_i32_1 = arith.constant 0 : i32
    %c0_i32_2 = arith.constant 0 : i32
    return %c0_i32, %c0_i32_0, %c0_i32_1 : i32, i32, i32
  }
  func.func @transform_3(%arg0: i32) -> (i32, i32) {
    %c0_i32 = arith.constant 0 : i32
    %c0_i32_0 = arith.constant 0 : i32
    %c0_i32_1 = arith.constant 0 : i32
    return %c0_i32, %c0_i32_0 : i32, i32
  }
  func.func @transform_4(%arg0: i32) -> (i32, i32) {
    %c0_i32 = arith.constant 0 : i32
    %c0_i32_0 = arith.constant 0 : i32
    %c0_i32_1 = arith.constant 0 : i32
    return %c0_i32, %c0_i32_0 : i32, i32
  }
  func.func @transform_5(%arg0: i32) -> (i32, i32) {
    %c0_i32 = arith.constant 0 : i32
    %c0_i32_0 = arith.constant 0 : i32
    %c0_i32_1 = arith.constant 0 : i32
    return %c0_i32, %c0_i32_0 : i32, i32
  }
  func.func @transform_6(%arg0: i32) -> (i32, i32) {
    %c0_i32 = arith.constant 0 : i32
    %c0_i32_0 = arith.constant 0 : i32
    %c0_i32_1 = arith.constant 0 : i32
    return %c0_i32, %c0_i32_0 : i32, i32
  }
  func.func @transform_7(%arg0: i32) -> (i32, i32) {
    %c0_i32 = arith.constant 0 : i32
    %c0_i32_0 = arith.constant 0 : i32
    %c0_i32_1 = arith.constant 0 : i32
    return %c0_i32, %c0_i32_0 : i32, i32
  }
  func.func @transform_8(%arg0: i32) -> (i32, i32) {
    %c0_i32 = arith.constant 0 : i32
    %c0_i32_0 = arith.constant 0 : i32
    %c0_i32_1 = arith.constant 0 : i32
    return %c0_i32, %c0_i32_0 : i32, i32
  }
  func.func @transform_9(%arg0: i32) -> (i32, i32) {
    %c0_i32 = arith.constant 0 : i32
    %c0_i32_0 = arith.constant 0 : i32
    %c0_i32_1 = arith.constant 0 : i32
    return %c0_i32, %c0_i32_0 : i32, i32
  }
  func.func @transform_10(%arg0: i32) -> (i32, i32) {
    %c0_i32 = arith.constant 0 : i32
    %c0_i32_0 = arith.constant 0 : i32
    %c0_i32_1 = arith.constant 0 : i32
    return %c0_i32, %c0_i32_0 : i32, i32
  }
  func.func @transform_11(%arg0: i32) -> (i32, i32) {
    %c0_i32 = arith.constant 0 : i32
    %c0_i32_0 = arith.constant 0 : i32
    %c0_i32_1 = arith.constant 0 : i32
    return %c0_i32, %c0_i32_0 : i32, i32
  }
  func.func @transform_12(%arg0: i32) -> (i32, i32) {
    %c0_i32 = arith.constant 0 : i32
    %c0_i32_0 = arith.constant 0 : i32
    %c0_i32_1 = arith.constant 0 : i32
    return %c0_i32, %c0_i32_0 : i32, i32
  }
  func.func @transform_13(%arg0: i32) -> (i32, i32) {
    %c0_i32 = arith.constant 0 : i32
    %c0_i32_0 = arith.constant 0 : i32
    %c0_i32_1 = arith.constant 0 : i32
    return %c0_i32, %c0_i32_0 : i32, i32
  }
  func.func @transform_14(%arg0: i32) -> (i32, i32) {
    %c0_i32 = arith.constant 0 : i32
    %c0_i32_0 = arith.constant 0 : i32
    %c0_i32_1 = arith.constant 0 : i32
    return %c0_i32, %c0_i32_0 : i32, i32
  }
  func.func @transform_15(%arg0: i32) -> (i32, i32) {
    %c0_i32 = arith.constant 0 : i32
    %c0_i32_0 = arith.constant 0 : i32
    %c0_i32_1 = arith.constant 0 : i32
    return %c0_i32, %c0_i32_0 : i32, i32
  }
  func.func @transform_16(%arg0: i32) -> (i32, i32) {
    %c0_i32 = arith.constant 0 : i32
    %c0_i32_0 = arith.constant 0 : i32
    %c0_i32_1 = arith.constant 0 : i32
    return %c0_i32, %c0_i32_0 : i32, i32
  }
  func.func @transform_17(%arg0: i32) -> (i32, i32) {
    %c0_i32 = arith.constant 0 : i32
    %c0_i32_0 = arith.constant 0 : i32
    %c0_i32_1 = arith.constant 0 : i32
    return %c0_i32, %c0_i32_0 : i32, i32
  }
  func.func @transform_18(%arg0: i32) -> (i32, i32, i32) {
    %c0_i32 = arith.constant 0 : i32
    %c0_i32_0 = arith.constant 0 : i32
    %c0_i32_1 = arith.constant 0 : i32
    return %arg0, %c0_i32, %c0_i32_0 : i32, i32, i32
  }
}

</mosaic_0001>

<bundles_post_ra>
// kernel: retrievalnet_forward.1
= control target key start
LH: loop header
LB: loop body
LE: loop exit
PB: predicated region body
PF: predicated region fallthrough
CT: control target
= control target key end

     0   :  { %s7522_s0 = inlined_call_operand.vmem [shape: f32[2,8,8,32], index: 0, kind: input, shape index: {}]   ;;  %s7523_s1 = inlined_call_operand.vmem [shape: f32[64,32], index: 1, kind: input, shape index: {}]   ;;  %s7524_s2 = inlined_call_operand.vmem [shape: bf16[18,32,16], index: 2, kind: input, shape index: {}]   ;;  %s7525_s3 = inlined_call_operand.vmem [shape: f32[1,32], index: 3, kind: input, shape index: {}]   ;;  %s7526_s4 = inlined_call_operand.vmem [shape: bf16[32,32], index: 4, kind: input, shape index: {}]   ;;  %s7527_s5 = inlined_call_operand.vmem [shape: f32[1,32], index: 5, kind: input, shape index: {}]   ;;  %s7528_s6 = inlined_call_operand.vmem [shape: bf16[32,96], index: 6, kind: input, shape index: {}]   ;;  %s7529_s7 = inlined_call_operand.vmem [shape: f32[1,96], index: 7, kind: input, shape index: {}]   ;;  %s7530_s8 = inlined_call_operand.vmem [shape: bf16[32,32], index: 8, kind: input, shape index: {}]   ;;  %s7531_s9 = inlined_call_operand.vmem [shape: f32[1,32], index: 9, kind: input, shape index: {}]   ;;  %s7532_s10 = inlined_call_operand.vmem [shape: f32[1,32], index: 10, kind: input, shape index: {}]   ;;  %s7533_s11 = inlined_call_operand.vmem [shape: f32[1,32], index: 11, kind: input, shape index: {}]   ;;  %s7534_s12 = inlined_call_operand.vmem [shape: bf16[32,32], index: 12, kind: input, shape index: {}]   ;;  %s7535_s13 = inlined_call_operand.vmem [shape: f32[1,32], index: 13, kind: input, shape index: {}]   ;;  %s7536_s14 = inlined_call_operand.vmem [shape: bf16[32,32], index: 14, kind: input, shape index: {}]   ;;  %s7537_s15 = inlined_call_operand.vmem [shape: f32[1,32], index: 15, kind: input, shape index: {}]   ;;  %s7538_s16 = inlined_call_operand.vmem [shape: f32[1,32], index: 16, kind: input, shape index: {}]   ;;  %s7539_s17 = inlined_call_operand.vmem [shape: f32[1,32], index: 17, kind: input, shape index: {}]   ;;  %s7540_s18 = inlined_call_operand.hbm [shape: f32[2,64,32], index: 18, kind: output, shape index: {}]  }
   0x1   :  { %7547 = sst [smem:[#allocation10_spill]] %s7522_s0 }
   0x2   :  { %7548 = sst [smem:[#allocation11_spill]] %s7523_s1 }
   0x3   :  { %7549 = sst [smem:[#allocation12_spill]] %s7524_s2 }
   0x4   :  { %7550 = sst [smem:[#allocation13_spill]] %s7525_s3 }
   0x5   :  { %7551 = sst [smem:[#allocation14_spill]] %s7526_s4 }
   0x6   :  { %23 = vsyncpa [#allocation4], 0 }
   0x7   :  { %25 = vsyncpa [#allocation4 + $0x1], 0  ;;  %s6260_s27 = smov 0   ;;  %s6262_s28 = smov 0  }
   0x8   :  { %s6264_s29 = smov 0   ;;  %s6266_s30 = smov 0  }
   0x9 LB: > { %7552 = sst [smem:[#allocation6_spill]] %s6152_s29  ;;  %s6281_s0 = sadd.s32 4294967295, %s6156_s30   ;;  %s6156_s30 = sphi %s6266_s30, %s7570_s30   ;;  %s6152_s29 = sphi %s6264_s29, %s7572_s29   ;;  %s6148_s28 = sphi %s6262_s28, %s7574_s28   ;;  %s6144_s27 = sphi %s6260_s27, %s7573_s27  }
   0xa   : > { %s4941_s19 = sadd.s32 4294967294, %s6156_s30   ;;  %s6285_s1 = sadd.s32 1, %s6156_s30  }
   0xb   : > { %7553 = sst [smem:[#allocation7_spill]] %s6285_s1  ;;  %s421_s20 = sadd.s32 1, %s6152_s29 }
   0xc   : > { %s418_s21 = ssub.s32 %s6156_s30, %s6285_s1  ;;  %p431_p0 = scmp.ne.s32.totalorder %s6152_s29, %s6148_s28 }
   0xd   : > { %p419_p1 = scmp.eq.s32.totalorder %s418_s21, 0  ;;  %p432_p2 = scmp.eq.s32.totalorder %s6281_s0, 1 }
   0xe   : > { %p437_p3 = scmp.ne.s32.totalorder %s6148_s28, %s6144_s27  ;;  %p438_p4 = scmp.eq.s32.totalorder %s4941_s19, 1 }
   0xf   : > { %s6296_s22 = scalar_select %p419_p1, %s6152_s29, %s421_s20  }
  0x10   : > { %p6298_p5 = por %p432_p2, %p431_p0  ;;  %p6302_p6 = por %p438_p4, %p437_p3 }
  0x11   : > { %7554 = sst [smem:[#allocation8_spill]] %s6296_s22  ;;  %p4944_p7 = scmp.ge.s32.totalorder %s6156_s30, 1 }
  0x12   : > { %s7556_s23 = scalar_select %p6302_p6, 1, 0 }
  0x13   : > { %p515_p8 = scmp.lt.s32.totalorder %s6156_s30, 3 }
  0x14   : > { %7557 = sst [smem:[#allocation9_spill]] %s7556_s23 }
  0x15   : > { %p516_p9 = pnand %p4944_p7, %p515_p8 }
  0x16   : > { %s7558_s26 = sld [smem:[#allocation12_spill]] (!%p516_p9)  ;;  %vm575_vm0 = vcmask (!%p516_p9), 257024   ;;  %v6158_v3 = vmov (!%p516_p9), 0   ;;  %p569_p10 = scmp.lt.s32.totalorder (!%p516_p9), %s6281_s0, 1  ;;  %vm827_vm1 = vcmask (!%p516_p9), 1042432   ;;  %vm828_vm2 = vcmask (!%p516_p9), 1046532  }
  0x17   : > { %519 = sbr.rel (%p516_p9) target bundleno = 2998 (0xbb6), region = 92  ;;  %628 = vst.msk [vmem:[#allocation2 + $0xd0] sm:$0xf] (!%p516_p9), %vm575_vm0, %v6158_v3  ;;  %633 = vst.msk [vmem:[#allocation2 + $0xe4] sm:$0xf] (!%p516_p9), %vm575_vm0, %v6158_v3  ;;  %vm911_vm3 = vcmask (!%p516_p9), 261120  }
  0x18   : > { %596 = vst.msk [vmem:[#allocation2 + $0x50] sm:$0xf] (!%p516_p9), %vm575_vm0, %v6158_v3  ;;  %597 = vst.msk [vmem:[#allocation2 + $0x54] sm:$0xf] (!%p516_p9), %vm575_vm0, %v6158_v3  ;;  %s7561_s1 = sld [smem:[#allocation10_spill]] (!%p516_p9)  ;;  %vm2277_vm5 = vcmask (!%p516_p9), 1041408  }
  0x19   : > { %598 = vst.msk [vmem:[#allocation2 + $0x58] sm:$0xf] (!%p516_p9), %vm575_vm0, %v6158_v3  ;;  %599 = vst.msk [vmem:[#allocation2 + $0x5c] sm:$0xf] (!%p516_p9), %vm575_vm0, %v6158_v3  ;;  %vm2278_vm6 = vcmask (!%p516_p9), 1045508   ;;  %vm1122_vm8 = vcmask (!%p516_p9), 1040384  }
  0x1a   : > { %600 = vst.msk [vmem:[#allocation2 + $0x60] sm:$0xf] (!%p516_p9), %vm575_vm0, %v6158_v3  ;;  %601 = vst.msk [vmem:[#allocation2 + $0x64] sm:$0xf] (!%p516_p9), %vm575_vm0, %v6158_v3  ;;  %vm1123_vm9 = vcmask (!%p516_p9), 1044484   ;;  %s7566_s4 = sld [smem:[#allocation14_spill]] (!%p516_p9) }
  0x1b   : > { %602 = vst.msk [vmem:[#allocation2 + $0x68] sm:$0xf] (!%p516_p9), %vm575_vm0, %v6158_v3  ;;  %603 = vst.msk [vmem:[#allocation2 + $0x6c] sm:$0xf] (!%p516_p9), %vm575_vm0, %v6158_v3  ;;  %s6159_s19 = smov (!%p516_p9), 16   ;;  %vm3683_vm11 = vcmask (!%p516_p9), 130048  }
  0x1c   : > { %v6311_v0 = vld [vmem:[%s7558_s26 + $0x10] sm:$0xff] (!%p516_p9)   ;;  %v6316_v1 = vld [vmem:[%s7558_s26 + $0xa0] sm:$0xff] (!%p516_p9)   ;;  %v6322_v2 = vld [vmem:[%s7558_s26 + $0x18] sm:$0xff] (!%p516_p9)   ;;  %604 = vst.msk [vmem:[#allocation2 + $0x70] sm:$0xf] (!%p516_p9), %vm575_vm0, %v6158_v3  ;;  %s7567_s3 = sld [smem:[#allocation13_spill]] (!%p516_p9) }
  0x1d   : > { %5491 = vmatprep.subr.bf16.mxu0 (!%p516_p9), %v6311_v0  ;;  %605 = vst.msk [vmem:[#allocation2 + $0x74] sm:$0xf] (!%p516_p9), %vm575_vm0, %v6158_v3  ;;  %606 = vst.msk [vmem:[#allocation2 + $0x78] sm:$0xf] (!%p516_p9), %vm575_vm0, %v6158_v3  ;;  %5599 = vmatprep.subr.bf16.mxu1 (!%p516_p9), %v6316_v1  ;;  %v5967_v4 = vld [vmem:[%s7558_s26 + $0xa8] sm:$0xff] (!%p516_p9)   ;;  %v5975_v5 = vld [vmem:[%s7558_s26] sm:$0xff] (!%p516_p9)  }
  0x1e   : > { %607 = vst.msk [vmem:[#allocation2 + $0x7c] sm:$0xf] %vm575_vm0, %v6158_v3  ;;  %608 = vst.msk [vmem:[#allocation2 + $0x80] sm:$0xf] %vm575_vm0, %v6158_v3  ;;  %5492 = vmatpush3.bf16.msra.mxu0 %v6311_v0  ;;  %5600 = vmatpush3.bf16.msra.mxu1 %v6316_v1  ;;  %s570_s20 = scalar_select %p569_p10, %s6281_s0, 1  ;;  %v5977_v6 = vld [vmem:[%s7558_s26 + $0x90] sm:$0xff]  }
  0x1f   : > { %609 = vst.msk [vmem:[#allocation2 + $0x84] sm:$0xf] %vm575_vm0, %v6158_v3  ;;  %610 = vst.msk [vmem:[#allocation2 + $0x88] sm:$0xf] %vm575_vm0, %v6158_v3  ;;  %5493 = vmatprep.subr.bf16.mxu0 %v6322_v2  ;;  %5601 = vmatprep.subr.bf16.mxu1 %v5967_v4  ;;  %v5968_v7 = vld [vmem:[#allocation2 + $0xd0] ss:$20 sps:$4 sm:$0xff]  }
  0x20   : > { %611 = vst.msk [vmem:[#allocation2 + $0x8c] sm:$0xf] %vm575_vm0, %v6158_v3  ;;  %612 = vst.msk [vmem:[#allocation2 + $0x90] sm:$0xf] %vm575_vm0, %v6158_v3  ;;  %s5339_s22 = sshll.u32 %s570_s20, 6  ;;  %v5978_v9 = vld [vmem:[%s7558_s26 + $0x8] sm:$0xff]   ;;  %5495 = vmatprep.mubr.msk.bf16.mxu0 %vm911_vm3, %v5968_v7 }
  0x21   : > { %613 = vst.msk [vmem:[#allocation2 + $0x94] sm:$0xf] %vm575_vm0, %v6158_v3  ;;  %614 = vst.msk [vmem:[#allocation2 + $0x98] sm:$0xf] %vm575_vm0, %v6158_v3  ;;  %v5979_v12 = vld [vmem:[%s7558_s26 + $0x98] sm:$0xff]   ;;  %s6627_s23 = scalar_lea.vmem %s7561_s1, %s5339_s22  ;;  %v6653_v49 = vld [vmem:[%s7558_s26 + $0x20] sm:$0xff]  }
  0x22   : > { %615 = vst.msk [vmem:[#allocation2 + $0x9c] sm:$0xf] %vm575_vm0, %v6158_v3  ;;  %616 = vst.msk [vmem:[#allocation2 + $0xa0] sm:$0xf] %vm575_vm0, %v6158_v3  ;;  %5494 = vmatpush3.bf16.msra.mxu0 %v6322_v2  ;;  %5602 = vmatpush3.bf16.msra.mxu1 %v5967_v4  ;;  %v5969_v8 = vld [vmem:[#allocation2 + $0x58] ss:$20 sps:$4 sm:$0xff]  }
  0x23   : > { %617 = vst.msk [vmem:[#allocation2 + $0xa4] sm:$0xf] %vm575_vm0, %v6158_v3  ;;  %618 = vst.msk [vmem:[#allocation2 + $0xa8] sm:$0xf] %vm575_vm0, %v6158_v3  ;;  %5503 = vmatprep.subr.bf16.mxu0 %v5975_v5  ;;  %5611 = vmatprep.subr.bf16.mxu1 %v5977_v6  ;;  %v770_v16 = vld [vmem:[%s6627_s23] sm:$0xff]  ;;  %v771_v17 = vld [vmem:[%s6627_s23 + $0x8] sm:$0xff] }
  0x24   : > { %619 = vst.msk [vmem:[#allocation2 + $0xac] sm:$0xf] %vm575_vm0, %v6158_v3  ;;  %620 = vst.msk [vmem:[#allocation2 + $0xb0] sm:$0xf] %vm575_vm0, %v6158_v3  ;;  %5603 = vmatprep.mubr.msk.bf16.mxu1 %vm911_vm3, %v5969_v8  ;;  %v778_v18 = vpack.c.bf16 %v770_v16, %v770_v16  ;;  %v779_v19 = vpack.c.bf16 %v771_v17, %v771_v17  ;;  %v5976_v20 = vld [vmem:[#allocation2 + $0xd0] ss:$20 sps:$4 sm:$0xff]  }
  0x25   : > { %621 = vst.msk [vmem:[#allocation2 + $0xb4] sm:$0xf] %vm575_vm0, %v6158_v3  ;;  %622 = vst.msk [vmem:[#allocation2 + $0xb8] sm:$0xf] %vm575_vm0, %v6158_v3  ;;  %v796_v22 = vld [vmem:[#allocation2 + $0xd0] sm:$0x1] }
  0x26   : > { %623 = vst.msk [vmem:[#allocation2 + $0xbc] sm:$0xf] %vm575_vm0, %v6158_v3  ;;  %624 = vst.msk [vmem:[#allocation2 + $0xc0] sm:$0xf] %vm575_vm0, %v6158_v3  ;;  %v798_v24 = vld [vmem:[#allocation2 + $0xe4] sm:$0x1] }
  0x27   : > { %625 = vst.msk [vmem:[#allocation2 + $0xc4] sm:$0xf] %vm575_vm0, %v6158_v3  ;;  %626 = vst.msk [vmem:[#allocation2 + $0xc8] sm:$0xf] %vm575_vm0, %v6158_v3  ;;  %v832_v26 = vrot.slane %v796_v22, 5  ;;  %v836_v28 = vrot.slane %v798_v24, 5 }
  0x28   : > { %627 = vst.msk [vmem:[#allocation2 + $0xcc] sm:$0xf] %vm575_vm0, %v6158_v3  ;;  %629 = vst.msk [vmem:[#allocation2 + $0xd4] sm:$0xf] %vm575_vm0, %v6158_v3  ;;  %v5971_v13 = vld [vmem:[#allocation2 + $0x80] ss:$20 sps:$4 sm:$0xff]  }
  0x29   : > { %630 = vst.msk [vmem:[#allocation2 + $0xd8] sm:$0xf] %vm575_vm0, %v6158_v3  ;;  %631 = vst.msk [vmem:[#allocation2 + $0xdc] sm:$0xf] %vm575_vm0, %v6158_v3  ;;  %5604 = vmatmul.mubr.msk.bf16.vlgmr.msra.gmra.mrb[0].mxu1 %vm911_vm3, %v5971_v13  ;;  %v2245_v29 = vld [vmem:[#allocation2 + $0x50] sm:$0xc] }
  0x2a   : > { %632 = vst.msk [vmem:[#allocation2 + $0xe0] sm:$0xf] %vm575_vm0, %v6158_v3  ;;  %634 = vst.msk [vmem:[#allocation2 + $0xe8] sm:$0xf] %vm575_vm0, %v6158_v3  ;;  %5612 = vmatpush3.bf16.msra.mxu1 %v5977_v6  ;;  %v2246_v31 = vld [vmem:[#allocation2 + $0x54] sm:$0x3] }
  0x2b   : > { %635 = vst.msk [vmem:[#allocation2 + $0xec] sm:$0xf] %vm575_vm0, %v6158_v3  ;;  %637 = vst.msk [vmem:[#allocation2 + $0xf4] sm:$0xf] %vm575_vm0, %v6158_v3  ;;  %5613 = vmatprep.subr.bf16.mxu1 %v5979_v12  ;;  %v2247_v32 = vld [vmem:[#allocation2 + $0x64] sm:$0xc] }
  0x2c   : > { %638 = vst.msk [vmem:[#allocation2 + $0xf8] sm:$0xf] %vm575_vm0, %v6158_v3  ;;  %639 = vst.msk [vmem:[#allocation2 + $0xfc] sm:$0xf] %vm575_vm0, %v6158_v3  ;;  %v2248_v33 = vld [vmem:[#allocation2 + $0x68] sm:$0x3] }
  0x2d   : > { %642 = vst.msk [vmem:[#allocation2 + $0x108] sm:$0xf] %vm575_vm0, %v6158_v3  ;;  %643 = vst.msk [vmem:[#allocation2 + $0x10c] sm:$0xf] %vm575_vm0, %v6158_v3  ;;  %v5973_v15 = vld [vmem:[#allocation2 + $0xa8] ss:$20 sps:$4 sm:$0xff]  }
  0x2e   : > { %644 = vst.msk [vmem:[#allocation2 + $0x110] sm:$0xf] %vm575_vm0, %v6158_v3  ;;  %647 = vst.msk [vmem:[#allocation2 + $0x11c] sm:$0xf] %vm575_vm0, %v6158_v3  ;;  %5607 = vmatprep.mubr.msk.bf16.mxu1 %vm911_vm3, %v5973_v15  ;;  %5614 = vmatpush3.bf16.msra.mxu1 %v5979_v12  ;;  %v5118_v34 = vrot.slane %v2245_v29, 10  ;;  %v2282_v35 = vrot.slane %v2246_v31, 6 }
  0x2f   : > { %648 = vst.msk [vmem:[#allocation2 + $0x120] sm:$0xf] %vm575_vm0, %v6158_v3  ;;  %649 = vst.msk [vmem:[#allocation2 + $0x124] sm:$0xf] %vm575_vm0, %v6158_v3  ;;  %v795_v21 = vld [vmem:[#allocation2 + $0xcc] sm:$0xe] }
  0x30   : > { %652 = vst.msk [vmem:[#allocation2 + $0x130] sm:$0xf] %vm575_vm0, %v6158_v3  ;;  %653 = vst.msk [vmem:[#allocation2 + $0x134] sm:$0xf] %vm575_vm0, %v6158_v3  ;;  %v4948_v25 = vrot.slane %v795_v21, 9  ;;  %v5119_v40 = vrot.slane %v2247_v32, 10 }
  0x31   : > { %654 = vst.msk [vmem:[#allocation2 + $0x138] sm:$0xf] %vm575_vm0, %v6158_v3  ;;  %658 = vst.msk [vmem:[#allocation2 + $0x1e4] sm:$0xf] %vm575_vm0, %v6158_v3  ;;  %v797_v23 = vld [vmem:[#allocation2 + $0xe0] sm:$0xe]  ;;  %5608 = vmatmul.mubr.msk.bf16.gmra.mrb[4].mxu1 %vm911_vm3, %v5976_v20 }
  0x32   : > { %659 = vst.msk [vmem:[#allocation2 + $0x1e8] sm:$0xf] %vm575_vm0, %v6158_v3  ;;  %660 = vst.msk [vmem:[#allocation2 + $0x1ec] sm:$0xf] %vm575_vm0, %v6158_v3  ;;  %v4949_v27 = vrot.slane %v797_v23, 9  ;;  %v2286_v41 = vrot.slane %v2248_v33, 6 }
  0x33   : > { %663 = vst.msk [vmem:[#allocation2 + $0x1f8] sm:$0xf] %vm575_vm0, %v6158_v3  ;;  %664 = vst.msk [vmem:[#allocation2 + $0x1fc] sm:$0xf] %vm575_vm0, %v6158_v3  ;;  %v799_v36 = vld [vmem:[#allocation2 + $0xf4] sm:$0xe] }
  0x34   : > { %665 = vst.msk [vmem:[#allocation2 + $0x200] sm:$0xf] %vm575_vm0, %v6158_v3  ;;  %668 = vst.msk [vmem:[#allocation2 + $0x20c] sm:$0xf] %vm575_vm0, %v6158_v3  ;;  %v5970_v11 = vld [vmem:[#allocation2 + $0xf8] ss:$20 sps:$4 sm:$0xff]  }
  0x35   : > { %669 = vst.msk [vmem:[#allocation2 + $0x210] sm:$0xf] %vm575_vm0, %v6158_v3  ;;  %670 = vst.msk [vmem:[#allocation2 + $0x214] sm:$0xf] %vm575_vm0, %v6158_v3  ;;  %5496 = vmatmul.mubr.msk.bf16.vlgmr.msra.gmra.mrb[0].mxu0 %vm911_vm3, %v5970_v11  ;;  %v800_v37 = vld [vmem:[#allocation2 + $0xf8] sm:$0x1] }
  0x36   : > { %673 = vst.msk [vmem:[#allocation2 + $0x220] sm:$0xf] %vm575_vm0, %v6158_v3  ;;  %674 = vst.msk [vmem:[#allocation2 + $0x224] sm:$0xf] %vm575_vm0, %v6158_v3  ;;  %5504 = vmatpush3.bf16.msra.mxu0 %v5975_v5  ;;  %v801_v42 = vld [vmem:[#allocation2 + $0x108] sm:$0xe] }
  0x37   : > { %675 = vst.msk [vmem:[#allocation2 + $0x228] sm:$0xf] %vm575_vm0, %v6158_v3  ;;  %677 = vst.msk [vmem:[#allocation2 + $0x230] sm:$0xf] %vm575_vm0, %v6158_v3  ;;  %v5972_v14 = vld [vmem:[#allocation2 + $0x120] ss:$20 sps:$4 sm:$0xff]   ;;  %5505 = vmatprep.subr.bf16.mxu0 %v5978_v9 }
  0x38   : > { %678 = vst.msk [vmem:[#allocation2 + $0x234] sm:$0xf] %vm575_vm0, %v6158_v3  ;;  %679 = vst.msk [vmem:[#allocation2 + $0x238] sm:$0xf] %vm575_vm0, %v6158_v3  ;;  %5499 = vmatprep.mubr.msk.bf16.mxu0 %vm911_vm3, %v5972_v14  ;;  %v802_v43 = vld [vmem:[#allocation2 + $0x10c] sm:$0x1] }
  0x39   : > { %680 = vst.msk [vmem:[#allocation2 + $0x23c] sm:$0xf] %vm575_vm0, %v6158_v3  ;;  %681 = vst.msk [vmem:[#allocation2 + $0x240] sm:$0xf] %vm575_vm0, %v6158_v3  ;;  %v4950_v45 = vrot.slane %v799_v36, 9  ;;  %v840_v46 = vrot.slane %v800_v37, 5 }
  0x3a   : > { %682 = vst.msk [vmem:[#allocation2 + $0x244] sm:$0xf] %vm575_vm0, %v6158_v3  ;;  %683 = vst.msk [vmem:[#allocation2 + $0x248] sm:$0xf] %vm575_vm0, %v6158_v3  ;;  %5506 = vmatpush3.bf16.msra.mxu0 %v5978_v9  ;;  %v4951_v47 = vrot.slane %v801_v42, 9  ;;  %v844_v51 = vrot.slane %v802_v43, 5 }
  0x3b   : > { %684 = vst.msk [vmem:[#allocation2 + $0x24c] sm:$0xf] %vm575_vm0, %v6158_v3  ;;  %685 = vst.msk [vmem:[#allocation2 + $0x250] sm:$0xf] %vm575_vm0, %v6158_v3  ;;  %v2249_v48 = vld [vmem:[#allocation2 + $0x78] sm:$0xc]  ;;  %5515 = vmatprep.subr.bf16.mxu0 %v6653_v49 }
  0x3c   : > { %686 = vst.msk [vmem:[#allocation2 + $0x254] sm:$0xf] %vm575_vm0, %v6158_v3  ;;  %687 = vst.msk [vmem:[#allocation2 + $0x258] sm:$0xf] %vm575_vm0, %v6158_v3  ;;  %v2250_v52 = vld [vmem:[#allocation2 + $0x7c] sm:$0x3] }
  0x3d   : > { %688 = vst.msk [vmem:[#allocation2 + $0x25c] sm:$0xf] %vm575_vm0, %v6158_v3  ;;  %689 = vst.msk [vmem:[#allocation2 + $0x260] sm:$0xf] %vm575_vm0, %v6158_v3  ;;  %v2251_v53 = vld [vmem:[#allocation2 + $0x8c] sm:$0xc] }
  0x3e   : > { %690 = vst.msk [vmem:[#allocation2 + $0x264] sm:$0xf] %vm575_vm0, %v6158_v3  ;;  %691 = vst.msk [vmem:[#allocation2 + $0x268] sm:$0xf] %vm575_vm0, %v6158_v3  ;;  %v5120_v54 = vrot.slane %v2249_v48, 10  ;;  %v2290_v58 = vrot.slane %v2250_v52, 6 }
  0x3f   : > { %692 = vst.msk [vmem:[#allocation2 + $0x26c] sm:$0xf] %vm575_vm0, %v6158_v3  ;;  %693 = vst.msk [vmem:[#allocation2 + $0x270] sm:$0xf] %vm575_vm0, %v6158_v3  ;;  %v2252_v57 = vld [vmem:[#allocation2 + $0x90] sm:$0x3] }
  0x40   : > { %694 = vst.msk [vmem:[#allocation2 + $0x274] sm:$0xf] %vm575_vm0, %v6158_v3  ;;  %695 = vst.msk [vmem:[#allocation2 + $0x278] sm:$0xf] %vm575_vm0, %v6158_v3  ;;  %v5121_v59 = vrot.slane %v2251_v53, 10  ;;  %v2294_v63 = vrot.slane %v2252_v57, 6 }
  0x41   : > { %696 = vst.msk [vmem:[#allocation2 + $0x27c] sm:$0xf] %vm575_vm0, %v6158_v3  ;;  %697 = vst.msk [vmem:[#allocation2 + $0x280] sm:$0xf] %vm575_vm0, %v6158_v3  ;;  %v803_v60 = vld [vmem:[#allocation2 + $0x11c] sm:$0xe] }
  0x42   : > { %698 = vst.msk [vmem:[#allocation2 + $0x284] sm:$0xf] %vm575_vm0, %v6158_v3  ;;  %699 = vst.msk [vmem:[#allocation2 + $0x288] sm:$0xf] %vm575_vm0, %v6158_v3  ;;  %v804_v0 = vld [vmem:[#allocation2 + $0x120] sm:$0x1] }
  0x43   : > { %700 = vst.msk [vmem:[#allocation2 + $0x28c] sm:$0xf] %vm575_vm0, %v6158_v3  ;;  %701 = vst.msk [vmem:[#allocation2 + $0x290] sm:$0xf] %vm575_vm0, %v6158_v3  ;;  %v805_v1 = vld [vmem:[#allocation2 + $0x130] sm:$0xe] }
  0x44   : > { %702 = vst.msk [vmem:[#allocation2 + $0x294] sm:$0xf] %vm575_vm0, %v6158_v3  ;;  %703 = vst.msk [vmem:[#allocation2 + $0x298] sm:$0xf] %vm575_vm0, %v6158_v3  ;;  %v4952_v2 = vrot.slane %v803_v60, 9  ;;  %v848_v5 = vrot.slane %v804_v0, 5 }
  0x45   : > { %704 = vst.msk [vmem:[#allocation2 + $0x29c] sm:$0xf] %vm575_vm0, %v6158_v3  ;;  %705 = vst.msk [vmem:[#allocation2 + $0x2a0] sm:$0xf] %vm575_vm0, %v6158_v3  ;;  %v806_v4 = vld [vmem:[#allocation2 + $0x134] sm:$0x1] }
  0x46   : > { %706 = vst.msk [vmem:[#allocation2 + $0x2a4] sm:$0xf] %vm575_vm0, %v6158_v3  ;;  %707 = vst.msk [vmem:[#allocation2 + $0x2a8] sm:$0xf] %vm575_vm0, %v6158_v3  ;;  %v4953_v6 = vrot.slane %v805_v1, 9  ;;  %v852_v11 = vrot.slane %v806_v4, 5 }
  0x47   : > { %708 = vst.msk [vmem:[#allocation2 + $0x2ac] sm:$0xf] %vm575_vm0, %v6158_v3  ;;  %709 = vst.msk [vmem:[#allocation2 + $0x2b0] sm:$0xf] %vm575_vm0, %v6158_v3  ;;  %v2253_v7 = vld [vmem:[#allocation2 + $0xa0] sm:$0xc] }
  0x48   : > { %710 = vst.msk [vmem:[#allocation2 + $0x2b4] sm:$0xf] %vm575_vm0, %v6158_v3  ;;  %711 = vst.msk [vmem:[#allocation2 + $0x2b8] sm:$0xf] %vm575_vm0, %v6158_v3  ;;  %v2254_v12 = vld [vmem:[#allocation2 + $0xa4] sm:$0x3] }
  0x49   : > { %712 = vst.msk [vmem:[#allocation2 + $0x2bc] sm:$0xf] %vm575_vm0, %v6158_v3  ;;  %713 = vst.msk [vmem:[#allocation2 + $0x2c0] sm:$0xf] %vm575_vm0, %v6158_v3  ;;  %v2255_v13 = vld [vmem:[#allocation2 + $0xb4] sm:$0xc] }
  0x4a   : > { %714 = vst.msk [vmem:[#allocation2 + $0x2c4] sm:$0xf] %vm575_vm0, %v6158_v3  ;;  %715 = vst.msk [vmem:[#allocation2 + $0x2c8] sm:$0xf] %vm575_vm0, %v6158_v3  ;;  %v5122_v14 = vrot.slane %v2253_v7, 10  ;;  %v5983_v52 = vld [vmem:[%s7558_s26 + $0xb8] sm:$0xff]  }
  0x4b   : > { %716 = vst.msk [vmem:[#allocation2 + $0x2cc] sm:$0xf] %vm575_vm0, %v6158_v3  ;;  %738 = vst.msk [vmem:[#allocation2 + $0x140] sm:$0xf] %vm575_vm0, %v6158_v3  ;;  %v2256_v17 = vld [vmem:[#allocation2 + $0xb8] sm:$0x3] }
  0x4c   : > { %739 = vst.msk [vmem:[#allocation2 + $0x144] sm:$0xf] %vm575_vm0, %v6158_v3  ;;  %740 = vst.msk [vmem:[#allocation2 + $0x154] sm:$0xf] %vm575_vm0, %v6158_v3  ;;  %v2302_v22 = vrot.slane %v2256_v17, 6  ;;  %v6020_v30 = vld [vmem:[%s7566_s4] sm:$0xff]  }
  0x4d   : > { %741 = vst.msk [vmem:[#allocation2 + $0x158] sm:$0xf] %vm575_vm0, %v6158_v3  ;;  %742 = vst.msk [vmem:[#allocation2 + $0x168] sm:$0xf] %vm575_vm0, %v6158_v3  ;;  %v2257_v32 = vld [vmem:[#allocation2 + $0xc8] sm:$0xc] }
  0x4e   : > { %743 = vst.msk [vmem:[#allocation2 + $0x16c] sm:$0xf] %vm575_vm0, %v6158_v3  ;;  %744 = vst.msk [vmem:[#allocation2 + $0x17c] sm:$0xf] %vm575_vm0, %v6158_v3  ;;  %v2258_v36 = vld [vmem:[#allocation2 + $0xcc] sm:$0x3] }
  0x4f   : > { %745 = vst.msk [vmem:[#allocation2 + $0x180] sm:$0xf] %vm575_vm0, %v6158_v3  ;;  %746 = vst.msk [vmem:[#allocation2 + $0x190] sm:$0xf] %vm575_vm0, %v6158_v3  ;;  %v2259_v37 = vld [vmem:[#allocation2 + $0xdc] sm:$0xc] }
  0x50   : > { %747 = vst.msk [vmem:[#allocation2 + $0x194] sm:$0xf] %vm575_vm0, %v6158_v3  ;;  %748 = vst.msk [vmem:[#allocation2 + $0x1a4] sm:$0xf] %vm575_vm0, %v6158_v3  ;;  %v5125_v42 = vrot.slane %v2259_v37, 10  ;;  %v6021_v43 = vld [vmem:[%s7566_s4 + $0x8] sm:$0xff]  }
  0x51   : > { %749 = vst.msk [vmem:[#allocation2 + $0x1a8] sm:$0xf] %vm575_vm0, %v6158_v3  ;;  %750 = vst.msk [vmem:[#allocation2 + $0x1b8] sm:$0xf] %vm575_vm0, %v6158_v3  ;;  %v1090_v53 = vld [vmem:[#allocation2 + $0xd0] sm:$0x8] }
  0x52   : > { %751 = vst.msk [vmem:[#allocation2 + $0x1bc] sm:$0xf] %vm575_vm0, %v6158_v3  ;;  %752 = vst.msk [vmem:[#allocation2 + $0x1cc] sm:$0xf] %vm575_vm0, %v6158_v3  ;;  %v1093_v57 = vld [vmem:[#allocation2 + $0xe8] sm:$0x7] }
  0x53   : > { %753 = vst.msk [vmem:[#allocation2 + $0x1d0] sm:$0xf] %vm575_vm0, %v6158_v3  ;;  %754 = vst.msk [vmem:[#allocation2 + $0x14c] sm:$0xf] %vm575_vm0, %v6158_v3  ;;  %v807_v20 = vld [vmem:[#allocation2 + $0x144] sm:$0xe] }
  0x54   : > { %755 = vst.msk [vmem:[#allocation2 + $0x150] sm:$0xf] %vm575_vm0, %v6158_v3  ;;  %756 = vst.msk [vmem:[#allocation2 + $0x160] sm:$0xf] %vm575_vm0, %v6158_v3  ;;  %v809_v24 = vld [vmem:[#allocation2 + $0x158] sm:$0xe] }
  0x55   : > { %757 = vst.msk [vmem:[#allocation2 + $0x164] sm:$0xf] %vm575_vm0, %v6158_v3  ;;  %758 = vst.msk [vmem:[#allocation2 + $0x174] sm:$0xf] %vm575_vm0, %v6158_v3  ;;  %v4955_v31 = vrot.slane %v809_v24, 9  ;;  %vm4091_vm12 = vcmask 523520  }
  0x56   : > { %759 = vst.msk [vmem:[#allocation2 + $0x178] sm:$0xf] %vm575_vm0, %v6158_v3  ;;  %760 = vst.msk [vmem:[#allocation2 + $0x188] sm:$0xf] %vm575_vm0, %v6158_v3  ;;  %v2541_v0 = vld [vmem:[#allocation2 + $0x60] sm:$0x3] }
  0x57   : > { %761 = vst.msk [vmem:[#allocation2 + $0x18c] sm:$0xf] %vm575_vm0, %v6158_v3  ;;  %762 = vst.msk [vmem:[#allocation2 + $0x19c] sm:$0xf] %vm575_vm0, %v6158_v3  ;;  %v2542_v1 = vld [vmem:[#allocation2 + $0x70] sm:$0xc] }
  0x58   : > { %763 = vst.msk [vmem:[#allocation2 + $0x1a0] sm:$0xf] %vm575_vm0, %v6158_v3  ;;  %764 = vst.msk [vmem:[#allocation2 + $0x1b0] sm:$0xf] %vm575_vm0, %v6158_v3  ;;  %v1095_v7 = vld [vmem:[#allocation2 + $0xfc] sm:$0x7] }
  0x59   : > { %765 = vst.msk [vmem:[#allocation2 + $0x1b4] sm:$0xf] %vm575_vm0, %v6158_v3  ;;  %766 = vst.msk [vmem:[#allocation2 + $0x1c4] sm:$0xf] %vm575_vm0, %v6158_v3  ;;  %v6011_v10 = vld [vmem:[#allocation2 + $0x260] ss:$20 sps:$4 sm:$0xff]  }
  0x5a   : > { %767 = vst.msk [vmem:[#allocation2 + $0x1c8] sm:$0xf] %vm575_vm0, %v6158_v3  ;;  %768 = vst.msk [vmem:[#allocation2 + $0x1d8] sm:$0xf] %vm575_vm0, %v6158_v3  ;;  %s6160_s24 = smov 96   ;;  %s6161_s25 = smov 64  }
  0x5b   : > { %769 = vst.msk [vmem:[#allocation2 + $0x1dc] sm:$0xf] %vm575_vm0, %v6158_v3  ;;  %vm6615_vm4 = vmor %vm827_vm1, %vm828_vm2  ;;  %s5340_s22 = sshll.u32 %s6281_s0, 10 }
  0x5c   : > { %786 = vst.msk [vmem:[#allocation2 + $0x148] sm:$0xf] %vm575_vm0, %v778_v18  ;;  %787 = vst.msk [vmem:[#allocation2 + $0x15c] sm:$0xf] %vm575_vm0, %v779_v19  ;;  %v833_v38 = vsel %vm6615_vm4, %v4948_v25, %v832_v26  ;;  %v837_v39 = vsel %vm6615_vm4, %v4949_v27, %v836_v28  ;;  %v841_v3 = vsel %vm6615_vm4, %v4950_v45, %v840_v46  ;;  %v2298_v18 = vrot.slane %v2254_v12, 6  ;;  %v5981_v45 = vld [vmem:[%s7558_s26 + $0xb0] sm:$0xff]   ;;  %s7471_s20 = scalar_lea.hbm %s7540_s18, %s5340_s22 }
  0x5d   : > { %vm6639_vm7 = vmor %vm2277_vm5, %vm2278_vm6  ;;  %v4970_v55 = vcombine.low %v833_v38, %v837_v39  ;;  %v845_v8 = vsel %vm6615_vm4, %v4951_v47, %v844_v51  ;;  %v849_v16 = vsel %vm6615_vm4, %v4952_v2, %v848_v5  ;;  %v5123_v19 = vrot.slane %v2255_v13, 10  ;;  %v5982_v47 = vld [vmem:[%s7558_s26 + $0x28] sm:$0xff]   ;;  %5623 = vmatprep.subr.bf16.mxu1 %v5981_v45  ;;  %v2543_v2 = vld [vmem:[#allocation2 + $0x74] sm:$0x3]  ;;  %s6162_s22 = smov [#allocation3]  }
  0x5e   : > { %v2283_v44 = vsel %vm6639_vm7, %v5118_v34, %v2282_v35  ;;  %v2287_v50 = vsel %vm6639_vm7, %v5119_v40, %v2286_v41  ;;  %v2291_v62 = vsel %vm6639_vm7, %v5120_v54, %v2290_v58  ;;  %v2295_v9 = vsel %vm6639_vm7, %v5121_v59, %v2294_v63  ;;  %v2260_v40 = vld [vmem:[#allocation2 + $0xe0] sm:$0x3]  ;;  %vm6680_vm10 = vmor %vm1122_vm8, %vm1123_vm9  ;;  %v1096_v12 = vld [vmem:[#allocation2 + $0x10c] sm:$0x8]  ;;  %s6098_s29 = sshll.u32 %s6162_s22, 4  ;;  %s6099_s29 = int_to_ptr.vmem [resolvable:$false] %s6098_s29 }
  0x5f   : > { %v5144_v56 = vcombine.low %v2283_v44, %v2287_v50  ;;  %v5145_v15 = vcombine.low %v2291_v62, %v2295_v9  ;;  %v853_v21 = vsel %vm6615_vm4, %v4953_v6, %v852_v11  ;;  %v4954_v25 = vrot.slane %v807_v20, 9  ;;  %v2540_v62 = vld [vmem:[#allocation2 + $0x5c] sm:$0xc]  ;;  %v1094_v6 = vld [vmem:[#allocation2 + $0xf8] sm:$0x8] }
  0x60   : > { %v4971_v26 = vcombine.low %v841_v3, %v845_v8  ;;  %v2299_v27 = vsel %vm6639_vm7, %v5122_v14, %v2298_v18  ;;  %v4972_v33 = vcombine.low %v849_v16, %v853_v21  ;;  %v2303_v34 = vsel %vm6639_vm7, %v5123_v19, %v2302_v22  ;;  %v1097_v13 = vld [vmem:[#allocation2 + $0x110] sm:$0x7]  ;;  %v2544_v18 = vld [vmem:[#allocation2 + $0x84] sm:$0xc]  ;;  %v2545_v22 = vld [vmem:[#allocation2 + $0x88] sm:$0x3] }
  0x61   : > { %5615 = vmatprep.mubr.msk.bf16.mxu1 %vm911_vm3, %v5144_v56  ;;  %v5124_v38 = vrot.slane %v2257_v32, 10  ;;  %v5146_v39 = vcombine.low %v2299_v27, %v2303_v34  ;;  %v2306_v41 = vrot.slane %v2258_v36, 6  ;;  %v2310_v44 = vrot.slane %v2260_v40, 6  ;;  %v1092_v56 = vld [vmem:[#allocation2 + $0xe4] sm:$0x8]  ;;  %v5984_v19 = vld [vmem:[%s7558_s26 + $0x30] sm:$0xff]  }
  0x62   : > { %5616 = vmatmul.mubr.msk.bf16.vlgmr.msra.gmra.mrb[0].mxu1 %vm911_vm3, %v5145_v15  ;;  %v4980_v58 = vrot.slane %v1090_v53, 11  ;;  %v4981_v60 = vrot.slane %v1092_v56, 11  ;;  %v5154_v4 = vrot.slane %v2540_v62, 10  ;;  %v2574_v5 = vrot.slane %v2541_v0, 6  ;;  %v2547_v27 = vld [vmem:[#allocation2 + $0x9c] sm:$0x3] }
  0x63   : > { %v5974_v61 = vld [vmem:[#allocation2 + $0x148] ss:$20 sps:$4 sm:$0xff]   ;;  %5619 = vmatprep.mubr.msk.bf16.mxu1 %vm911_vm3, %v5146_v39  ;;  %v2307_v46 = vsel %vm6639_vm7, %v5124_v38, %v2306_v41  ;;  %v2311_v51 = vsel %vm6639_vm7, %v5125_v42, %v2310_v44  ;;  %5624 = vmatpush3.bf16.msra.mxu1 %v5981_v45  ;;  %v5155_v9 = vrot.slane %v2542_v1, 10  ;;  %v2578_v11 = vrot.slane %v2543_v2, 6  ;;  %v1099_v34 = vld [vmem:[#allocation2 + $0x124] sm:$0x7] }
  0x64   : > { %5500 = vmatmul.mubr.msk.bf16.gmra.mrb[4].mxu0 %vm911_vm3, %v5974_v61  ;;  %v808_v23 = vld [vmem:[#allocation2 + $0x148] sm:$0x1]  ;;  %v810_v28 = vld [vmem:[#allocation2 + $0x15c] sm:$0x1]  ;;  %v5147_v54 = vcombine.low %v2307_v46, %v2311_v51  ;;  %5625 = vmatprep.subr.bf16.mxu1 %v5983_v52  ;;  %v1131_v61 = vrot.slane %v1093_v57, 7  ;;  %v2575_v14 = vsel %vm6639_vm7, %v5154_v4, %v2574_v5  ;;  %v4982_v15 = vrot.slane %v1094_v6, 11 }
  0x65   : > { %5507 = vmatprep.mubr.msk.bf16.mxu0 %vm911_vm3, %v4970_v55  ;;  %v856_v29 = vrot.slane %v808_v23, 5  ;;  %v860_v35 = vrot.slane %v810_v28, 5  ;;  %v1091_v55 = vld [vmem:[#allocation2 + $0xd4] sm:$0x7]  ;;  %v1135_v16 = vrot.slane %v1095_v7, 7  ;;  %v4983_v17 = vrot.slane %v1096_v12, 11 }
  0x66   : > { %v1127_v59 = vrot.slane %v1091_v55, 7  ;;  %v1132_v3 = vsel %vm6680_vm10, %v4981_v60, %v1131_v61  ;;  %v2579_v20 = vsel %vm6639_vm7, %v5155_v9, %v2578_v11  ;;  %v1139_v21 = vrot.slane %v1097_v13, 7  ;;  %v2546_v23 = vld [vmem:[#allocation2 + $0x98] sm:$0xc]  ;;  %v2548_v41 = vld [vmem:[#allocation2 + $0xac] sm:$0xc] }
  0x67   : > { %v857_v48 = vsel %vm6615_vm4, %v4954_v25, %v856_v29  ;;  %v861_v50 = vsel %vm6615_vm4, %v4955_v31, %v860_v35  ;;  %5626 = vmatpush3.bf16.msra.mxu1 %v5983_v52  ;;  %v5156_v24 = vrot.slane %v2544_v18, 10  ;;  %v5166_v25 = vcombine.low %v2575_v14, %v2579_v20  ;;  %v1098_v31 = vld [vmem:[#allocation2 + $0x120] sm:$0x8]  ;;  %v1100_v35 = vld [vmem:[#allocation2 + $0x134] sm:$0x8] }
  0x68   : > { %v4973_v63 = vcombine.low %v857_v48, %v861_v50  ;;  %v2582_v28 = vrot.slane %v2545_v22, 6  ;;  %v5157_v29 = vrot.slane %v2546_v23, 10  ;;  %v1140_v32 = vsel %vm6680_vm10, %v4983_v17, %v1139_v21  ;;  %v1101_v38 = vld [vmem:[#allocation2 + $0x138] sm:$0x7]  ;;  %v2549_v46 = vld [vmem:[#allocation2 + $0xb0] sm:$0x3] }
  0x69   : > { %v4984_v36 = vrot.slane %v1098_v31, 11  ;;  %v1143_v39 = vrot.slane %v1099_v34, 7  ;;  %v4985_v40 = vrot.slane %v1100_v35, 11  ;;  %v1147_v45 = vrot.slane %v1101_v38, 7  ;;  %v2551_v52 = vld [vmem:[#allocation2 + $0xc4] sm:$0x3] }
  0x6a   : > { %5620 = vmatmul.mubr.msk.bf16.gmra.mrb[4].mxu1 %vm911_vm3, %v5147_v54  ;;  %v2583_v37 = vsel %vm6639_vm7, %v5156_v24, %v2582_v28  ;;  %v5158_v48 = vrot.slane %v2548_v41, 10  ;;  %v2590_v53 = vrot.slane %v2549_v46, 6  ;;  %v1102_v55 = vld [vmem:[#allocation2 + $0x148] sm:$0x8]  ;;  %v2594_v57 = vrot.slane %v2551_v52, 6  ;;  %v5985_v4 = vld [vmem:[%s7558_s26 + $0xc0] sm:$0xff]  }
  0x6b   : > { %5627 = vmatprep.mubr.msk.bf16.mxu1 %vm911_vm3, %v5166_v25  ;;  %v1144_v51 = vsel %vm6680_vm10, %v4984_v36, %v1143_v39  ;;  %v1148_v56 = vsel %vm6680_vm10, %v4985_v40, %v1147_v45  ;;  %v4986_v60 = vrot.slane %v1102_v55, 11  ;;  %v2553_v7 = vld [vmem:[#allocation2 + $0xd8] sm:$0x3]  ;;  %v2555_v9 = vld [vmem:[#allocation2 + $0xec] sm:$0x3]  ;;  %5635 = vmatprep.subr.bf16.mxu1 %v5985_v4  ;;  %vm4035_vm6 = vcmask 523264  }
  0x6c   : > { %5508 = vmatmul.mubr.msk.bf16.vlgmr.msra.gmra.mrb[0].mxu0 %vm911_vm3, %v4971_v26  ;;  %v1136_v26 = vsel %vm6680_vm10, %v4982_v15, %v1135_v16  ;;  %v4994_v61 = vcombine.low %v1144_v51, %v1148_v56  ;;  %v2591_v62 = vsel %vm6639_vm7, %v5158_v48, %v2590_v53  ;;  %v2598_v13 = vrot.slane %v2553_v7, 6  ;;  %v5986_v15 = vld [vmem:[%s7558_s26 + $0x38] sm:$0xff]   ;;  %v5987_v17 = vld [vmem:[%s7558_s26 + $0xc8] sm:$0xff]   ;;  %v1271_v21 = vld [vmem:[#allocation2 + $0x144] sm:$0xe] }
  0x6d   : > { %5511 = vmatprep.mubr.msk.bf16.mxu0 %vm911_vm3, %v4972_v33  ;;  %5516 = vmatpush3.bf16.msra.mxu0 %v6653_v49  ;;  %v1128_v49 = vsel %vm6680_vm10, %v4980_v58, %v1127_v59  ;;  %v2586_v33 = vrot.slane %v2547_v27, 6  ;;  %v4993_v42 = vcombine.low %v1136_v26, %v1140_v32  ;;  %v1103_v58 = vld [vmem:[#allocation2 + $0x14c] sm:$0x7]  ;;  %v1104_v59 = vld [vmem:[#allocation2 + $0x15c] sm:$0x8]  ;;  %v2602_v16 = vrot.slane %v2555_v9, 6 }
  0x6e   : > { %5517 = vmatprep.subr.bf16.mxu0 %v5982_v47  ;;  %v4992_v8 = vcombine.low %v1128_v49, %v1132_v3  ;;  %v1151_v0 = vrot.slane %v1103_v58, 7  ;;  %v4987_v1 = vrot.slane %v1104_v59, 11  ;;  %v2552_v3 = vld [vmem:[#allocation2 + $0xd4] sm:$0xc]  ;;  %v1272_v22 = vld [vmem:[#allocation2 + $0x148] sm:$0x1] }
  0x6f   : > { %v2587_v44 = vsel %vm6639_vm7, %v5157_v29, %v2586_v33  ;;  %v5160_v12 = vrot.slane %v2552_v3, 10  ;;  %v1273_v23 = vld [vmem:[#allocation2 + $0x158] sm:$0xe]  ;;  %v1274_v25 = vld [vmem:[#allocation2 + $0x15c] sm:$0x1]  ;;  %v5002_v26 = vrot.slane %v1271_v21, 9 }
  0x70   : > { %v5167_v50 = vcombine.low %v2583_v37, %v2587_v44  ;;  %v1152_v6 = vsel %vm6680_vm10, %v4986_v60, %v1151_v0  ;;  %v1305_v27 = vrot.slane %v1272_v22, 5  ;;  %v5003_v28 = vrot.slane %v1273_v23, 9  ;;  %v772_v29 = vld [vmem:[%s6627_s23 + $0x10] sm:$0xff]  ;;  %v2718_v32 = vld [vmem:[#allocation2 + $0x140] sm:$0xc]  ;;  %v773_v34 = vld [vmem:[%s6627_s23 + $0x18] sm:$0xff] }
  0x71   : > { %5518 = vmatpush3.bf16.msra.mxu0 %v5982_v47  ;;  %v2550_v47 = vld [vmem:[#allocation2 + $0xc0] sm:$0xc]  ;;  %v1309_v31 = vrot.slane %v1274_v25, 5  ;;  %v2719_v33 = vld [vmem:[#allocation2 + $0x144] sm:$0x3]  ;;  %v780_v35 = vpack.c.bf16 %v772_v29, %v772_v29  ;;  %v5176_v39 = vrot.slane %v2718_v32, 10  ;;  %v781_v41 = vpack.c.bf16 %v773_v34, %v773_v34 }
  0x72   : > { %5527 = vmatprep.subr.bf16.mxu0 %v5984_v19  ;;  %v5159_v54 = vrot.slane %v2550_v47, 10  ;;  %5628 = vmatmul.mubr.msk.bf16.vlgmr.msra.gmra.mrb[0].mxu1 %vm911_vm3, %v5167_v50  ;;  %v1306_v36 = vsel %vm6615_vm4, %v5002_v26, %v1305_v27  ;;  %v2720_v37 = vld [vmem:[#allocation2 + $0x154] sm:$0xc]  ;;  %v2721_v38 = vld [vmem:[#allocation2 + $0x158] sm:$0x3]  ;;  %v2752_v40 = vrot.slane %v2719_v33, 6 }
  0x73   : > { %5636 = vmatpush3.bf16.msra.mxu1 %v5985_v4  ;;  %v5177_v44 = vrot.slane %v2720_v37, 10  ;;  %v2756_v45 = vrot.slane %v2721_v38, 6  ;;  %788 = vst.msk [vmem:[#allocation2 + $0x170] sm:$0xf] %vm575_vm0, %v780_v35  ;;  %v6766_v46 = vld [vmem:[#allocation2 + $0x16c] sm:$0xe] }
  0x74   : > { %5512 = vmatmul.mubr.msk.bf16.gmra.mrb[4].mxu0 %vm911_vm3, %v4973_v63  ;;  %v1105_v63 = vld [vmem:[#allocation2 + $0x160] sm:$0x7]  ;;  %v2595_v2 = vsel %vm6639_vm7, %v5159_v54, %v2594_v57  ;;  %5637 = vmatprep.subr.bf16.mxu1 %v5987_v17  ;;  %v2753_v50 = vsel %vm6639_vm7, %v5176_v39, %v2752_v40  ;;  %789 = vst.msk [vmem:[#allocation2 + $0x184] sm:$0xf] %vm575_vm0, %v781_v41  ;;  %v5004_v51 = vrot.slane %v6766_v46, 9  ;;  %v775_v0 = vld [vmem:[%s6627_s23 + $0x28] sm:$0xff] }
  0x75   : > { %5519 = vmatprep.mubr.msk.bf16.mxu0 %vm911_vm3, %v4992_v8  ;;  %v1155_v49 = vrot.slane %v1105_v63, 7  ;;  %v5168_v5 = vcombine.low %v2591_v62, %v2595_v2  ;;  %v2554_v8 = vld [vmem:[#allocation2 + $0xe8] sm:$0xc]  ;;  %v6768_v47 = vld [vmem:[#allocation2 + $0x180] sm:$0xe]  ;;  %v2757_v55 = vsel %vm6639_vm7, %v5177_v44, %v2756_v45  ;;  %v783_v3 = vpack.c.bf16 %v775_v0, %v775_v0  ;;  %v776_v7 = vld [vmem:[%s6627_s23 + $0x30] sm:$0xff] }
  0x76   : > { %v5161_v14 = vrot.slane %v2554_v8, 10  ;;  %v5005_v52 = vrot.slane %v6768_v47, 9  ;;  %v2722_v53 = vld [vmem:[#allocation2 + $0x168] sm:$0xc]  ;;  %v2723_v54 = vld [vmem:[#allocation2 + $0x16c] sm:$0x3]  ;;  %v5188_v60 = vcombine.low %v2753_v50, %v2757_v55 }
  0x77   : > { %v1156_v11 = vsel %vm6680_vm10, %v4987_v1, %v1155_v49  ;;  %5631 = vmatprep.mubr.msk.bf16.mxu1 %vm911_vm3, %v5168_v5  ;;  %5638 = vmatpush3.bf16.msra.mxu1 %v5987_v17  ;;  %v2724_v56 = vld [vmem:[#allocation2 + $0x17c] sm:$0xc]  ;;  %v2725_v57 = vld [vmem:[#allocation2 + $0x180] sm:$0x3]  ;;  %v5178_v58 = vrot.slane %v2722_v53, 10  ;;  %v2760_v59 = vrot.slane %v2723_v54, 6 }
  0x78   : > { %v4995_v18 = vcombine.low %v1152_v6, %v1156_v11  ;;  %v2603_v20 = vsel %vm6639_vm7, %v5161_v14, %v2602_v16  ;;  %v2764_v62 = vrot.slane %v2725_v57, 6  ;;  %v774_v63 = vld [vmem:[%s6627_s23 + $0x20] sm:$0xff]  ;;  %v6780_v1 = vld [vmem:[#allocation2 + $0x194] sm:$0xe]  ;;  %v6784_v4 = vld [vmem:[#allocation2 + $0x1a8] sm:$0xe]  ;;  %v784_v14 = vpack.c.bf16 %v776_v7, %v776_v7 }
  0x79   : > { %v2761_v2 = vsel %vm6639_vm7, %v5178_v58, %v2760_v59  ;;  %v782_v49 = vpack.c.bf16 %v774_v63, %v774_v63  ;;  %v5006_v5 = vrot.slane %v6780_v1, 9  ;;  %v2726_v6 = vld [vmem:[#allocation2 + $0x190] sm:$0xc]  ;;  %v5007_v9 = vrot.slane %v6784_v4, 9  ;;  %v2727_v11 = vld [vmem:[#allocation2 + $0x194] sm:$0x3] }
  0x7a   : > { %791 = vst.msk [vmem:[#allocation2 + $0x1ac] sm:$0xf] %vm575_vm0, %v783_v3  ;;  %v2729_v16 = vld [vmem:[#allocation2 + $0x1a8] sm:$0x3]  ;;  %v2768_v17 = vrot.slane %v2727_v11, 6  ;;  %v5989_v25 = vld [vmem:[%s7558_s26 + $0xd0] sm:$0xff]  }
  0x7b   : > { %790 = vst.msk [vmem:[#allocation2 + $0x198] sm:$0xf] %vm575_vm0, %v782_v49  ;;  %v1276_v21 = vld [vmem:[#allocation2 + $0x170] sm:$0x1]  ;;  %v2772_v22 = vrot.slane %v2729_v16, 6  ;;  %5647 = vmatprep.subr.bf16.mxu1 %v5989_v25  ;;  %v5990_v46 = vld [vmem:[%s7558_s26 + $0x48] sm:$0xff]  }
  0x7c   : > { %5520 = vmatmul.mubr.msk.bf16.vlgmr.msra.gmra.mrb[0].mxu0 %vm911_vm3, %v4993_v42  ;;  %v1310_v42 = vsel %vm6615_vm4, %v5003_v28, %v1309_v31  ;;  %792 = vst.msk [vmem:[#allocation2 + $0x1c0] sm:$0xf] %vm575_vm0, %v784_v14  ;;  %v1278_v26 = vld [vmem:[#allocation2 + $0x184] sm:$0x1]  ;;  %v1313_v27 = vrot.slane %v1276_v21, 5  ;;  %v5991_v50 = vld [vmem:[%s7558_s26 + $0xd8] sm:$0xff]  }
  0x7d   : > { %5523 = vmatprep.mubr.msk.bf16.mxu0 %vm911_vm3, %v4994_v61  ;;  %5528 = vmatpush3.bf16.msra.mxu0 %v5984_v19  ;;  %v2599_v19 = vsel %vm6639_vm7, %v5160_v12, %v2598_v13  ;;  %v5014_v48 = vcombine.low %v1306_v36, %v1310_v42  ;;  %v5179_v61 = vrot.slane %v2724_v56, 10  ;;  %v2728_v12 = vld [vmem:[#allocation2 + $0x1a4] sm:$0xc]  ;;  %v5180_v13 = vrot.slane %v2726_v6, 10  ;;  %v1285_v29 = vld [vmem:[#allocation2 + $0x1d0] sm:$0xe] }
  0x7e   : > { %5529 = vmatprep.subr.bf16.mxu0 %v5986_v15  ;;  %v5169_v24 = vcombine.low %v2599_v19, %v2603_v20  ;;  %v777_v19 = vld [vmem:[%s6627_s23 + $0x38] sm:$0xff]  ;;  %v5988_v20 = vld [vmem:[%s7558_s26 + $0x40] sm:$0xff]   ;;  %v1317_v32 = vrot.slane %v1278_v26, 5  ;;  %v5009_v34 = vrot.slane %v1285_v29, 9  ;;  %v1314_v35 = vsel %vm6615_vm4, %v5004_v51, %v1313_v27  ;;  %v2732_v39 = vld [vmem:[#allocation2 + $0x1cc] sm:$0xc] }
  0x7f   : > { %v2765_v8 = vsel %vm6639_vm7, %v5179_v61, %v2764_v62  ;;  %v785_v23 = vpack.c.bf16 %v777_v19, %v777_v19  ;;  %v2769_v28 = vsel %vm6639_vm7, %v5180_v13, %v2768_v17  ;;  %v2730_v37 = vld [vmem:[#allocation2 + $0x1b8] sm:$0xc]  ;;  %v2731_v38 = vld [vmem:[#allocation2 + $0x1bc] sm:$0x3]  ;;  %v2733_v41 = vld [vmem:[#allocation2 + $0x1d0] sm:$0x3] }
  0x80   : > { %5632 = vmatmul.mubr.msk.bf16.gmra.mrb[4].mxu1 %vm911_vm3, %v5169_v24  ;;  %v1283_v24 = vld [vmem:[#allocation2 + $0x1bc] sm:$0xe]  ;;  %v1318_v40 = vsel %vm6615_vm4, %v5005_v52, %v1317_v32  ;;  %v5182_v42 = vrot.slane %v2730_v37, 10  ;;  %v2776_v44 = vrot.slane %v2731_v38, 6  ;;  %v5183_v45 = vrot.slane %v2732_v39, 10  ;;  %v5997_v1 = vld [vmem:[%s7558_s26 + $0xe0] sm:$0xff]  }
  0x81   : > { %5530 = vmatpush3.bf16.msra.mxu0 %v5986_v15  ;;  %5639 = vmatprep.mubr.msk.bf16.mxu1 %vm911_vm3, %v5188_v60  ;;  %v5189_v15 = vcombine.low %v2761_v2, %v2765_v8  ;;  %v5008_v31 = vrot.slane %v1283_v24, 9  ;;  %793 = vst.msk [vmem:[#allocation2 + $0x1d4] sm:$0xf] %vm575_vm0, %v785_v23  ;;  %v5015_v47 = vcombine.low %v1314_v35, %v1318_v40  ;;  %v1282_v53 = vld [vmem:[#allocation2 + $0x1ac] sm:$0x1]  ;;  %v5996_v60 = vld [vmem:[%s7558_s26 + $0x50] sm:$0xff]  }
  0x82   : > { %5539 = vmatprep.subr.bf16.mxu0 %v5988_v20  ;;  %v1280_v51 = vld [vmem:[#allocation2 + $0x198] sm:$0x1]  ;;  %v2777_v52 = vsel %vm6639_vm7, %v5182_v42, %v2776_v44  ;;  %v1325_v55 = vrot.slane %v1282_v53, 5  ;;  %v5992_v3 = vld [vmem:[#allocation2 + $0x148] ss:$20 sps:$4 sm:$0xff]   ;;  %v6858_v21 = vld [vmem:[%s7558_s26 + $0xf0] sm:$0xff]  }
  0x83   : > { %v1321_v54 = vrot.slane %v1280_v51, 5  ;;  %v1284_v56 = vld [vmem:[#allocation2 + $0x1c0] sm:$0x1]  ;;  %v5993_v6 = vld [vmem:[#allocation2 + $0x170] ss:$20 sps:$4 sm:$0xff]   ;;  %v5999_v8 = vld [vmem:[%s7558_s26 + $0xe8] sm:$0xff]  }
  0x84   : > { %5524 = vmatmul.mubr.msk.bf16.gmra.mrb[4].mxu0 %vm911_vm3, %v4995_v18  ;;  %v5181_v18 = vrot.slane %v2728_v12, 10  ;;  %v1329_v58 = vrot.slane %v1284_v56, 5  ;;  %v1326_v62 = vsel %vm6615_vm4, %v5007_v9, %v1325_v55  ;;  %v5994_v7 = vld [vmem:[#allocation2 + $0x198] ss:$20 sps:$4 sm:$0xff]   ;;  %v1579_v9 = vld [vmem:[#allocation2 + $0x148] sm:$0x8] }
  0x85   : > { %5531 = vmatprep.mubr.msk.bf16.mxu0 %vm911_vm3, %v5014_v48  ;;  %v2780_v48 = vrot.slane %v2733_v41, 6  ;;  %v1322_v61 = vsel %vm6615_vm4, %v5006_v5, %v1321_v54  ;;  %v1580_v11 = vld [vmem:[#allocation2 + $0x14c] sm:$0x7]  ;;  %v1581_v12 = vld [vmem:[#allocation2 + $0x15c] sm:$0x8]  ;;  %v5038_v14 = vrot.slane %v1579_v9, 11 }
  0x86   : > { %v2773_v33 = vsel %vm6639_vm7, %v5181_v18, %v2772_v22  ;;  %v5016_v0 = vcombine.low %v1322_v61, %v1326_v62  ;;  %v1330_v2 = vsel %vm6615_vm4, %v5008_v31, %v1329_v58  ;;  %v1582_v13 = vld [vmem:[#allocation2 + $0x160] sm:$0x7]  ;;  %v5039_v16 = vrot.slane %v1581_v12, 11  ;;  %v5998_v17 = vld [vmem:[%s7558_s26 + $0x58] sm:$0xff]   ;;  %v2986_v19 = vld [vmem:[#allocation2 + $0x14c] sm:$0xc] }
  0x87   : > { %v5190_v36 = vcombine.low %v2769_v28, %v2773_v33  ;;  %v2781_v57 = vsel %vm6639_vm7, %v5183_v45, %v2780_v48  ;;  %v1617_v18 = vrot.slane %v1582_v13, 7  ;;  %v2988_v23 = vld [vmem:[#allocation2 + $0x160] sm:$0xc]  ;;  %v2989_v24 = vld [vmem:[#allocation2 + $0x164] sm:$0x3]  ;;  %s7568_s23 = sld [smem:[#allocation11_spill]] }
  0x88   : > { %5640 = vmatmul.mubr.msk.bf16.vlgmr.msra.gmra.mrb[0].mxu1 %vm911_vm3, %v5189_v15  ;;  %v5191_v59 = vcombine.low %v2777_v52, %v2781_v57  ;;  %v1286_v63 = vld [vmem:[#allocation2 + $0x1d4] sm:$0x1]  ;;  %v1613_v15 = vrot.slane %v1580_v11, 7  ;;  %v5209_v27 = vrot.slane %v2988_v23, 10  ;;  %v3024_v28 = vrot.slane %v2989_v24, 6  ;;  %v6873_v42 = vld [vmem:[%s7558_s26 + $0x60] sm:$0xff]  }
  0x89   : > { %5648 = vmatpush3.bf16.msra.mxu1 %v5989_v25  ;;  %5643 = vmatprep.mubr.msk.bf16.mxu1 %vm911_vm3, %v5190_v36  ;;  %v1333_v49 = vrot.slane %v1286_v63, 5  ;;  %v6860_v22 = vld [vmem:[#allocation2 + $0x1c0] ss:$20 sps:$4 sm:$0xff]   ;;  %v5208_v25 = vrot.slane %v2986_v19, 10  ;;  %v1583_v29 = vld [vmem:[#allocation2 + $0x170] sm:$0x8]  ;;  %v1618_v51 = vsel %vm6680_vm10, %v5039_v16, %v1617_v18 }
  0x8a   : > { %5649 = vmatprep.subr.bf16.mxu1 %v5991_v50  ;;  %v1584_v31 = vld [vmem:[#allocation2 + $0x174] sm:$0x7]  ;;  %v6864_v33 = vld [vmem:[#allocation2 + $0x184] sm:$0x8]  ;;  %v5040_v35 = vrot.slane %v1583_v29, 11  ;;  %v3025_v37 = vsel %vm6639_vm7, %v5209_v27, %v3024_v28 }
  0x8b   : > { %v1334_v4 = vsel %vm6615_vm4, %v5009_v34, %v1333_v49  ;;  %v1586_v34 = vld [vmem:[#allocation2 + $0x188] sm:$0x7]  ;;  %v1621_v36 = vrot.slane %v1584_v31, 7  ;;  %v5041_v38 = vrot.slane %v6864_v33, 11  ;;  %v2990_v40 = vld [vmem:[#allocation2 + $0x174] sm:$0xc] }
  0x8c   : > { %5532 = vmatmul.mubr.msk.bf16.vlgmr.msra.gmra.mrb[0].mxu0 %vm911_vm3, %v5015_v47  ;;  %v5017_v5 = vcombine.low %v1330_v2, %v1334_v4  ;;  %v1625_v39 = vrot.slane %v1586_v34, 7  ;;  %v2991_v41 = vld [vmem:[#allocation2 + $0x178] sm:$0x3]  ;;  %v2992_v45 = vld [vmem:[#allocation2 + $0x188] sm:$0xc]  ;;  %v5210_v47 = vrot.slane %v2990_v40, 10 }
  0x8d   : > { %5540 = vmatpush3.bf16.msra.mxu0 %v5988_v20  ;;  %5650 = vmatpush3.bf16.msra.mxu1 %v5991_v50  ;;  %v2987_v20 = vld [vmem:[#allocation2 + $0x150] sm:$0x3]  ;;  %v3028_v48 = vrot.slane %v2991_v41, 6  ;;  %v1614_v50 = vsel %vm6680_vm10, %v5038_v14, %v1613_v15  ;;  %v5211_v53 = vrot.slane %v2992_v45, 10  ;;  %v1587_v54 = vld [vmem:[#allocation2 + $0x198] sm:$0x8]  ;;  %v1622_v16 = vsel %vm6680_vm10, %v5040_v35, %v1621_v36 }
  0x8e   : > { %5541 = vmatprep.subr.bf16.mxu0 %v5990_v46  ;;  %5535 = vmatprep.mubr.msk.bf16.mxu0 %vm911_vm3, %v5016_v0  ;;  %v3020_v26 = vrot.slane %v2987_v20, 6  ;;  %v1588_v55 = vld [vmem:[#allocation2 + $0x19c] sm:$0x7]  ;;  %v1589_v56 = vld [vmem:[#allocation2 + $0x1ac] sm:$0x8]  ;;  %v5042_v58 = vrot.slane %v1587_v54, 11  ;;  %v5050_v49 = vcombine.low %v1614_v50, %v1618_v51  ;;  %v1626_v20 = vsel %vm6680_vm10, %v5041_v38, %v1625_v39 }
  0x8f   : > { %5659 = vmatprep.subr.bf16.mxu1 %v5997_v1  ;;  %v1590_v57 = vld [vmem:[#allocation2 + $0x1b0] sm:$0x7]  ;;  %v5043_v62 = vrot.slane %v1589_v56, 11  ;;  %v2994_v0 = vld [vmem:[#allocation2 + $0x19c] sm:$0xc]  ;;  %v5051_v36 = vcombine.low %v1622_v16, %v1626_v20  ;;  %v6002_v38 = vld [vmem:[%s7558_s26 + $0x68] sm:$0xff]  }
  0x90   : > { %5644 = vmatmul.mubr.msk.bf16.gmra.mrb[4].mxu1 %vm911_vm3, %v5191_v59  ;;  %v3021_v32 = vsel %vm6639_vm7, %v5208_v25, %v3020_v26  ;;  %v1629_v59 = vrot.slane %v1588_v55, 7  ;;  %v1633_v63 = vrot.slane %v1590_v57, 7  ;;  %v2995_v2 = vld [vmem:[#allocation2 + $0x1a0] sm:$0x3]  ;;  %v5212_v4 = vrot.slane %v2994_v0, 10  ;;  %v6003_v35 = vld [vmem:[%s7558_s26 + $0xf8] sm:$0xff]  }
  0x91   : > { %5542 = vmatpush3.bf16.msra.mxu0 %v5990_v46  ;;  %5651 = vmatprep.mubr.msk.bf16.mxu1 %vm911_vm3, %v5992_v3  ;;  %v5220_v44 = vcombine.low %v3021_v32, %v3025_v37  ;;  %v2993_v46 = vld [vmem:[#allocation2 + $0x18c] sm:$0x3]  ;;  %v1592_v9 = vld [vmem:[#allocation2 + $0x1c4] sm:$0x7]  ;;  %v1593_v13 = vld [vmem:[#allocation2 + $0x1d4] sm:$0x8] }
  0x92   : > { %5551 = vmatprep.subr.bf16.mxu0 %v5996_v60  ;;  %v3032_v52 = vrot.slane %v2993_v46, 6  ;;  %v1594_v14 = vld [vmem:[#allocation2 + $0x1d8] sm:$0x7]  ;;  %v1637_v18 = vrot.slane %v1592_v9, 7  ;;  %v5045_v19 = vrot.slane %v1593_v13, 11  ;;  %v1630_v23 = vsel %vm6680_vm10, %v5042_v58, %v1629_v59 }
  0x93   : > { %v1634_v24 = vsel %vm6680_vm10, %v5043_v62, %v1633_v63  ;;  %v2998_v25 = vld [vmem:[#allocation2 + $0x1c4] sm:$0xc]  ;;  %v2999_v26 = vld [vmem:[#allocation2 + $0x1c8] sm:$0x3]  ;;  %v3000_v27 = vld [vmem:[#allocation2 + $0x1d8] sm:$0xc] }
  0x94   : > { %5536 = vmatmul.mubr.msk.bf16.gmra.mrb[4].mxu0 %vm911_vm3, %v5017_v5  ;;  %v3033_v61 = vsel %vm6639_vm7, %v5211_v53, %v3032_v52  ;;  %v3036_v5 = vrot.slane %v2995_v2, 6  ;;  %v1641_v28 = vrot.slane %v1594_v14, 7  ;;  %v3001_v29 = vld [vmem:[#allocation2 + $0x1dc] sm:$0x3]  ;;  %v5214_v31 = vrot.slane %v2998_v25, 10 }
  0x95   : > { %5543 = vmatprep.mubr.msk.bf16.mxu0 %vm911_vm3, %v5992_v3  ;;  %v2996_v3 = vld [vmem:[#allocation2 + $0x1b0] sm:$0xc]  ;;  %v3044_v32 = vrot.slane %v2999_v26, 6  ;;  %v5215_v33 = vrot.slane %v3000_v27, 10  ;;  %v3048_v34 = vrot.slane %v3001_v29, 6  ;;  %v5052_v39 = vcombine.low %v1630_v23, %v1634_v24 }
  0x96   : > { %v3037_v12 = vsel %vm6639_vm7, %v5212_v4, %v3036_v5  ;;  %v1758_v41 = vld [vmem:[#allocation2 + $0x1bc] sm:$0xe]  ;;  %v1760_v45 = vld [vmem:[#allocation2 + $0x1d0] sm:$0xe]  ;;  %v1761_v46 = vld [vmem:[#allocation2 + $0x1d4] sm:$0x1]  ;;  %v1642_v59 = vsel %vm6680_vm10, %v5045_v19, %v1641_v28 }
  0x97   : > { %v3045_v37 = vsel %vm6639_vm7, %v5214_v31, %v3044_v32  ;;  %v3049_v40 = vsel %vm6639_vm7, %v5215_v33, %v3048_v34  ;;  %v5061_v51 = vrot.slane %v1760_v45, 9  ;;  %v1796_v53 = vrot.slane %v1761_v46, 5  ;;  %v3165_v52 = vld [vmem:[#allocation2 + $0x230] sm:$0xc]  ;;  %v3167_v55 = vld [vmem:[#allocation2 + $0x244] sm:$0xc] }
  0x98   : > { %5652 = vmatmul.mubr.msk.bf16.vlgmr.msra.gmra.mrb[0].mxu1 %vm911_vm3, %v5993_v6  ;;  %v5223_v50 = vcombine.low %v3045_v37, %v3049_v40  ;;  %v3168_v56 = vld [vmem:[#allocation2 + $0x248] sm:$0x3]  ;;  %v5230_v57 = vrot.slane %v3165_v52, 10  ;;  %v1762_v63 = vld [vmem:[#allocation2 + $0x1e4] sm:$0xe] }
  0x99   : > { %5655 = vmatprep.mubr.msk.bf16.mxu1 %vm911_vm3, %v5994_v7  ;;  %5660 = vmatpush3.bf16.msra.mxu1 %v5997_v1  ;;  %v2997_v1 = vld [vmem:[#allocation2 + $0x1b4] sm:$0x3]  ;;  %v3203_v62 = vrot.slane %v3168_v56, 6  ;;  %v1763_v0 = vld [vmem:[#allocation2 + $0x1e8] sm:$0x1]  ;;  %v1797_v2 = vsel %vm6615_vm4, %v5061_v51, %v1796_v53  ;;  %v5062_v4 = vrot.slane %v1762_v63, 9 }
  0x9a   : > { %5661 = vmatprep.subr.bf16.mxu1 %v5999_v8  ;;  %v1800_v5 = vrot.slane %v1763_v0, 5  ;;  %v3170_v9 = vld [vmem:[#allocation2 + $0x25c] sm:$0x3]  ;;  %v3171_v13 = vld [vmem:[#allocation2 + $0x26c] sm:$0xc] }
  0x9b   : > { %v3172_v14 = vld [vmem:[#allocation2 + $0x270] sm:$0x3]  ;;  %v3207_v16 = vrot.slane %v3170_v9, 6  ;;  %v1766_v20 = vld [vmem:[#allocation2 + $0x20c] sm:$0xe] }
  0x9c   : > { %5544 = vmatmul.mubr.msk.bf16.vlgmr.msra.gmra.mrb[0].mxu0 %vm911_vm3, %v5993_v6  ;;  %v5213_v6 = vrot.slane %v2996_v3, 10  ;;  %v1764_v3 = vld [vmem:[#allocation2 + $0x1f8] sm:$0xe]  ;;  %v3211_v19 = vrot.slane %v3172_v14, 6  ;;  %v1767_v23 = vld [vmem:[#allocation2 + $0x210] sm:$0x1] }
  0x9d   : > { %5662 = vmatpush3.bf16.msra.mxu1 %v5999_v8  ;;  %5547 = vmatprep.mubr.msk.bf16.mxu0 %vm911_vm3, %v5994_v7  ;;  %v3040_v7 = vrot.slane %v2997_v1, 6  ;;  %v1591_v8 = vld [vmem:[#allocation2 + $0x1c0] sm:$0x8]  ;;  %v1765_v1 = vld [vmem:[#allocation2 + $0x1fc] sm:$0x1]  ;;  %v5064_v26 = vrot.slane %v1766_v20, 9 }
  0x9e   : > { %5552 = vmatpush3.bf16.msra.mxu0 %v5996_v60  ;;  %5671 = vmatprep.subr.bf16.mxu1 %v6858_v21  ;;  %v3029_v60 = vsel %vm6639_vm7, %v5210_v47, %v3028_v48  ;;  %v5044_v15 = vrot.slane %v1591_v8, 11  ;;  %v5060_v47 = vrot.slane %v1758_v41, 9  ;;  %v3169_v8 = vld [vmem:[#allocation2 + $0x258] sm:$0xc]  ;;  %v1769_v25 = vld [vmem:[#allocation2 + $0x224] sm:$0x1] }
  0x9f   : > { %5553 = vmatprep.subr.bf16.mxu0 %v5998_v17  ;;  %v5221_v11 = vcombine.low %v3029_v60, %v3033_v61  ;;  %v5231_v61 = vrot.slane %v3167_v55, 10  ;;  %v1808_v27 = vrot.slane %v1767_v23, 5  ;;  %v1812_v31 = vrot.slane %v1769_v25, 5  ;;  %v3173_v32 = vld [vmem:[#allocation2 + $0x280] sm:$0xc]  ;;  %v6018_v20 = vld [vmem:[%s7558_s26 + $0x88] sm:$0xff]  }
  0xa0   : > { %5656 = vmatmul.mubr.msk.bf16.gmra.mrb[4].mxu1 %vm911_vm3, %v6860_v22  ;;  %v1638_v54 = vsel %vm6680_vm10, %v5044_v15, %v1637_v18  ;;  %v5232_v15 = vrot.slane %v3169_v8, 10  ;;  %v5233_v18 = vrot.slane %v3171_v13, 10  ;;  %v3174_v33 = vld [vmem:[#allocation2 + $0x284] sm:$0x3]  ;;  %v5234_v37 = vrot.slane %v3173_v32, 10 }
  0xa1   : > { %5663 = vmatprep.mubr.msk.bf16.mxu1 %vm911_vm3, %v5220_v44  ;;  %v1759_v44 = vld [vmem:[#allocation2 + $0x1c0] sm:$0x1]  ;;  %v1770_v45 = vld [vmem:[#allocation2 + $0x234] sm:$0xe]  ;;  %v1771_v46 = vld [vmem:[#allocation2 + $0x238] sm:$0x1] }
  0xa2   : > { %5554 = vmatpush3.bf16.msra.mxu0 %v5998_v17  ;;  %v3041_v17 = vsel %vm6639_vm7, %v5213_v6, %v3040_v7  ;;  %v1792_v48 = vrot.slane %v1759_v44, 5  ;;  %v5063_v6 = vrot.slane %v1764_v3, 9  ;;  %v1804_v7 = vrot.slane %v1765_v1, 5  ;;  %v1772_v51 = vld [vmem:[#allocation2 + $0x248] sm:$0xe] }
  0xa3   : > { %5563 = vmatprep.subr.bf16.mxu0 %v6873_v42  ;;  %v3208_v24 = vsel %vm6639_vm7, %v5232_v15, %v3207_v16  ;;  %v3212_v28 = vsel %vm6639_vm7, %v5233_v18, %v3211_v19  ;;  %v1773_v53 = vld [vmem:[#allocation2 + $0x24c] sm:$0x1]  ;;  %v5066_v52 = vrot.slane %v1770_v45, 9  ;;  %v5067_v55 = vrot.slane %v1772_v51, 9  ;;  %v3179_v63 = vld [vmem:[#allocation2 + $0x2bc] sm:$0xc] }
  0xa4   : > { %5548 = vmatmul.mubr.msk.bf16.gmra.mrb[4].mxu0 %vm911_vm3, %v6860_v22  ;;  %v5222_v22 = vcombine.low %v3037_v12, %v3041_v17  ;;  %v1793_v60 = vsel %vm6615_vm4, %v5060_v47, %v1792_v48  ;;  %v5243_v34 = vcombine.low %v3208_v24, %v3212_v28  ;;  %v1805_v40 = vsel %vm6615_vm4, %v5063_v6, %v1804_v7  ;;  %v3180_v0 = vld [vmem:[#allocation2 + $0x2c0] sm:$0x3]  ;;  %v6006_v6 = vld [vmem:[%s7558_s26 + $0x78] sm:$0xff]   ;;  %v6012_v18 = vld [vmem:[#allocation2 + $0x210] ss:$20 sps:$4 sm:$0xff]  }
  0xa5   : > { %5555 = vmatprep.mubr.msk.bf16.mxu0 %vm911_vm3, %v5050_v49  ;;  %v5072_v17 = vcombine.low %v1793_v60, %v1797_v2  ;;  %v1809_v47 = vsel %vm6615_vm4, %v5064_v26, %v1808_v27  ;;  %v3177_v60 = vld [vmem:[#allocation2 + $0x2a8] sm:$0xc]  ;;  %v5237_v3 = vrot.slane %v3179_v63, 10  ;;  %v3227_v1 = vrot.slane %v3180_v0, 6  ;;  %v6008_v14 = vld [vmem:[#allocation2 + $0x1c0] ss:$20 sps:$4 sm:$0xff]  }
  0xa6   : > { %v5236_v2 = vrot.slane %v3177_v60, 10  ;;  %v6013_v15 = vld [vmem:[#allocation2 + $0x288] ss:$20 sps:$4 sm:$0xff]   ;;  %v6015_v16 = vld [vmem:[%s7558_s26 + $0x80] sm:$0xff]   ;;  %v6017_v19 = vld [vmem:[%s7558_s26 + $0x110] sm:$0xff]  }
  0xa7   : > { %v6016_v23 = vld [vmem:[#allocation2 + $0x2b0] ss:$20 sps:$4 sm:$0xff]   ;;  %v6019_v24 = vld [vmem:[%s7558_s26 + $0x118] sm:$0xff]   ;;  %v2068_v26 = vld [vmem:[#allocation2 + $0x1d4] sm:$0x8] }
  0xa8   : > { %5664 = vmatmul.mubr.msk.bf16.vlgmr.msra.gmra.mrb[0].mxu1 %vm911_vm3, %v5221_v11  ;;  %v5053_v11 = vcombine.low %v1638_v54, %v1642_v59  ;;  %v1816_v54 = vrot.slane %v1771_v46, 5  ;;  %v6004_v59 = vld [vmem:[%s7558_s26 + $0x70] sm:$0xff]   ;;  %v2067_v25 = vld [vmem:[#allocation2 + $0x1c4] sm:$0x7]  ;;  %v2069_v27 = vld [vmem:[#allocation2 + $0x1d8] sm:$0x7] }
  0xa9   : > { %5667 = vmatprep.mubr.msk.bf16.mxu1 %vm911_vm3, %v5222_v22  ;;  %5672 = vmatpush3.bf16.msra.mxu1 %v6858_v21  ;;  %v3166_v21 = vld [vmem:[#allocation2 + $0x234] sm:$0x3]  ;;  %v1768_v22 = vld [vmem:[#allocation2 + $0x220] sm:$0xe]  ;;  %v2104_v32 = vrot.slane %v2069_v27, 7 }
  0xaa   : > { %5673 = vmatprep.subr.bf16.mxu1 %v6003_v35  ;;  %v3199_v58 = vrot.slane %v3166_v21, 6  ;;  %v5065_v29 = vrot.slane %v1768_v22, 9  ;;  %v1817_v7 = vsel %vm6615_vm4, %v5066_v52, %v1816_v54  ;;  %v2066_v22 = vld [vmem:[#allocation2 + $0x1c0] sm:$0x8]  ;;  %v2071_v45 = vld [vmem:[#allocation2 + $0x1ec] sm:$0x7] }
  0xab   : > { %v5096_v28 = vrot.slane %v2066_v22, 11  ;;  %v6014_v46 = vld [vmem:[#allocation2 + $0x238] ss:$20 sps:$4 sm:$0xff]   ;;  %v2073_v51 = vld [vmem:[#allocation2 + $0x200] sm:$0x7]  ;;  %v2108_v52 = vrot.slane %v2071_v45, 7 }
  0xac   : > { %5556 = vmatmul.mubr.msk.bf16.vlgmr.msra.gmra.mrb[0].mxu0 %vm911_vm3, %v5051_v36  ;;  %v3200_v49 = vsel %vm6639_vm7, %v5230_v57, %v3199_v58  ;;  %v3176_v36 = vld [vmem:[#allocation2 + $0x298] sm:$0x3]  ;;  %v1813_v48 = vsel %vm6615_vm4, %v5065_v29, %v1812_v31  ;;  %v1820_v58 = vrot.slane %v1773_v53, 5  ;;  %v2100_v29 = vrot.slane %v2067_v25, 7  ;;  %v3480_v60 = vld [vmem:[#allocation2 + $0x27c] sm:$0x3] }
  0xad   : > { %5674 = vmatpush3.bf16.msra.mxu1 %v6003_v35  ;;  %5559 = vmatprep.mubr.msk.bf16.mxu0 %vm911_vm3, %v5052_v39  ;;  %v3175_v35 = vld [vmem:[#allocation2 + $0x294] sm:$0xc]  ;;  %v1801_v39 = vsel %vm6615_vm4, %v5062_v4, %v1800_v5  ;;  %v3219_v44 = vrot.slane %v3176_v36, 6  ;;  %v6005_v5 = vld [vmem:[%s7558_s26 + $0x100] sm:$0xff]   ;;  %v5097_v31 = vrot.slane %v2068_v26, 11 }
  0xae   : > { %5564 = vmatpush3.bf16.msra.mxu0 %v6873_v42  ;;  %v3204_v42 = vsel %vm6639_vm7, %v5231_v61, %v3203_v62  ;;  %v5235_v41 = vrot.slane %v3175_v35, 10  ;;  %v5073_v56 = vcombine.low %v1801_v39, %v1805_v40  ;;  %v3178_v61 = vld [vmem:[#allocation2 + $0x2ac] sm:$0x3]  ;;  %v5074_v62 = vcombine.low %v1809_v47, %v1813_v48  ;;  %5683 = vmatprep.subr.bf16.mxu1 %v6005_v5  ;;  %v3475_v35 = vld [vmem:[#allocation2 + $0x250] sm:$0xc] }
  0xaf   : > { %5565 = vmatprep.subr.bf16.mxu0 %v6002_v38  ;;  %v5242_v12 = vcombine.low %v3200_v49, %v3204_v42  ;;  %v3223_v49 = vrot.slane %v3178_v61, 6  ;;  %v3228_v42 = vsel %vm6639_vm7, %v5237_v3, %v3227_v1  ;;  %v1821_v8 = vsel %vm6615_vm4, %v5067_v55, %v1820_v58  ;;  %v3476_v36 = vld [vmem:[#allocation2 + $0x254] sm:$0x3]  ;;  %v2079_v22 = vld [vmem:[#allocation2 + $0x23c] sm:$0x7] }
  0xb0   : > { %5668 = vmatmul.mubr.msk.bf16.gmra.mrb[4].mxu1 %vm911_vm3, %v5223_v50  ;;  %v3220_v21 = vsel %vm6639_vm7, %v5235_v41, %v3219_v44  ;;  %v5075_v13 = vcombine.low %v1817_v7, %v1821_v8  ;;  %v2101_v39 = vsel %vm6680_vm10, %v5096_v28, %v2100_v29  ;;  %v5267_v40 = vrot.slane %v3475_v35, 10  ;;  %v2070_v44 = vld [vmem:[#allocation2 + $0x1e8] sm:$0x8]  ;;  %v2075_v3 = vld [vmem:[#allocation2 + $0x214] sm:$0x7] }
  0xb1   : > { %5675 = vmatprep.mubr.msk.bf16.mxu1 %vm911_vm3, %v5242_v12  ;;  %v3224_v4 = vsel %vm6639_vm7, %v5236_v2, %v3223_v49  ;;  %v6009_v12 = vld [vmem:[#allocation2 + $0x238] ss:$20 sps:$4 sm:$0xff]   ;;  %v3511_v41 = vrot.slane %v3476_v36, 6  ;;  %v2105_v47 = vsel %vm6680_vm10, %v5097_v31, %v2104_v32  ;;  %v5098_v53 = vrot.slane %v2070_v44, 11  ;;  %v2074_v49 = vld [vmem:[#allocation2 + $0x210] sm:$0x8] }
  0xb2   : > { %5566 = vmatpush3.bf16.msra.mxu0 %v6002_v38  ;;  %v3215_v38 = vrot.slane %v3174_v33, 6  ;;  %v5245_v9 = vcombine.low %v3224_v4, %v3228_v42  ;;  %v3473_v33 = vld [vmem:[#allocation2 + $0x23c] sm:$0xc]  ;;  %v2112_v55 = vrot.slane %v2073_v51, 7  ;;  %v5108_v63 = vcombine.low %v2101_v39, %v2105_v47  ;;  %v2076_v4 = vld [vmem:[#allocation2 + $0x224] sm:$0x8] }
  0xb3   : > { %5575 = vmatprep.subr.bf16.mxu0 %v6004_v59  ;;  %v3519_v2 = vrot.slane %v3480_v60, 6  ;;  %v5100_v42 = vrot.slane %v2074_v49, 11  ;;  %v5101_v8 = vrot.slane %v2076_v4, 11  ;;  %v2080_v27 = vld [vmem:[#allocation2 + $0x24c] sm:$0x8]  ;;  %v2124_v31 = vrot.slane %v2079_v22, 7 }
  0xb4   : > { %5560 = vmatmul.mubr.msk.bf16.gmra.mrb[4].mxu0 %vm911_vm3, %v5053_v11  ;;  %v3216_v50 = vsel %vm6639_vm7, %v5234_v37, %v3215_v38  ;;  %v6007_v11 = vld [vmem:[%s7558_s26 + $0x108] sm:$0xff]   ;;  %v5266_v37 = vrot.slane %v3473_v33, 10  ;;  %v2081_v28 = vld [vmem:[#allocation2 + $0x250] sm:$0x7]  ;;  %v5103_v33 = vrot.slane %v2080_v27, 11 }
  0xb5   : > { %5567 = vmatprep.mubr.msk.bf16.mxu0 %vm911_vm3, %v5072_v17  ;;  %v5244_v57 = vcombine.low %v3216_v50, %v3220_v21  ;;  %v6010_v17 = vld [vmem:[#allocation2 + $0x1e8] ss:$20 sps:$4 sm:$0xff]   ;;  %v3512_v21 = vsel %vm6639_vm7, %v5267_v40, %v3511_v41  ;;  %v3485_v35 = vld [vmem:[#allocation2 + $0x2b4] sm:$0xc]  ;;  %v3486_v36 = vld [vmem:[#allocation2 + $0x2b8] sm:$0x3] }
  0xb6   : > { %v2072_v50 = vld [vmem:[#allocation2 + $0x1fc] sm:$0x8]  ;;  %v3487_v39 = vld [vmem:[#allocation2 + $0x2c8] sm:$0xc]  ;;  %v3488_v40 = vld [vmem:[#allocation2 + $0x2cc] sm:$0x3] }
  0xb7   : > { %v5099_v54 = vrot.slane %v2072_v50, 11  ;;  %v5272_v41 = vrot.slane %v3485_v35, 10  ;;  %v3531_v44 = vrot.slane %v3486_v36, 6  ;;  %v3535_v47 = vrot.slane %v3488_v40, 6  ;;  %v3716_v22 = vld [vmem:[%s7568_s23 + $0x8] sm:$0xff] }
  0xb8   : > { %5676 = vmatmul.mubr.msk.bf16.vlgmr.msra.gmra.mrb[0].mxu1 %vm911_vm3, %v5243_v34  ;;  %v3474_v34 = vld [vmem:[#allocation2 + $0x240] sm:$0x3] }
  0xb9   : > { %5679 = vmatprep.mubr.msk.bf16.mxu1 %vm911_vm3, %v5244_v57  ;;  %5684 = vmatpush3.bf16.msra.mxu1 %v6005_v5  ;;  %v3507_v38 = vrot.slane %v3474_v34, 6  ;;  %v3478_v57 = vld [vmem:[#allocation2 + $0x268] sm:$0x3]  ;;  %v2128_v34 = vrot.slane %v2081_v28, 7 }
  0xba   : > { %5685 = vmatprep.subr.bf16.mxu1 %v6007_v11  ;;  %v2077_v5 = vld [vmem:[#allocation2 + $0x228] sm:$0x7] }
  0xbb   : > { %v3508_v48 = vsel %vm6639_vm7, %v5266_v37, %v3507_v38 }
  0xbc   : > { %5568 = vmatmul.mubr.msk.bf16.vlgmr.msra.gmra.mrb[0].mxu0 %vm911_vm3, %v5073_v56  ;;  %v3477_v56 = vld [vmem:[#allocation2 + $0x264] sm:$0xc]  ;;  %v5278_v58 = vcombine.low %v3508_v48, %v3512_v21  ;;  %v3532_v48 = vsel %vm6639_vm7, %v5272_v41, %v3531_v44  ;;  %v3720_v44 = vld [vmem:[%s7568_s23 + $0x28] sm:$0xff] }
  0xbd   : > { %5571 = vmatprep.mubr.msk.bf16.mxu0 %vm911_vm3, %v5074_v62  ;;  %5576 = vmatpush3.bf16.msra.mxu0 %v6004_v59  ;;  %v3479_v59 = vld [vmem:[#allocation2 + $0x278] sm:$0xc]  ;;  %v5268_v61 = vrot.slane %v3477_v56, 10  ;;  %v3515_v62 = vrot.slane %v3478_v57, 6  ;;  %v3719_v41 = vld [vmem:[%s7568_s23 + $0x20] sm:$0xff] }
  0xbe   : > { %5577 = vmatprep.subr.bf16.mxu0 %v6006_v6  ;;  %5686 = vmatpush3.bf16.msra.mxu1 %v6007_v11  ;;  %v5269_v0 = vrot.slane %v3479_v59, 10  ;;  %v3481_v11 = vld [vmem:[#allocation2 + $0x28c] sm:$0xc] }
  0xbf   : > { %5695 = vmatprep.subr.bf16.mxu1 %v6017_v19  ;;  %v3516_v1 = vsel %vm6639_vm7, %v5268_v61, %v3515_v62 }
  0xc0   : > { %5680 = vmatmul.mubr.msk.bf16.gmra.mrb[4].mxu1 %vm911_vm3, %v5245_v9  ;;  %v3520_v7 = vsel %vm6639_vm7, %v5269_v0, %v3519_v2  ;;  %v2120_v9 = vrot.slane %v2077_v5, 7  ;;  %v5288_v5 = vld [vmem:[%s7567_s3] ss:$0 sm:$0xff] }
  0xc1   : > { %5687 = vmatprep.mubr.msk.bf16.mxu1 %vm911_vm3, %v6009_v12  ;;  %5578 = vmatpush3.bf16.msra.mxu0 %v6006_v6  ;;  %v2116_v6 = vrot.slane %v2075_v3, 7  ;;  %v3482_v12 = vld [vmem:[#allocation2 + $0x290] sm:$0x3] }
  0xc2   : > { %5587 = vmatprep.subr.bf16.mxu0 %v6015_v16  ;;  %v2121_v25 = vsel %vm6680_vm10, %v5101_v8, %v2120_v9 }
  0xc4   : > { %5572 = vmatmul.mubr.msk.bf16.gmra.mrb[4].mxu0 %vm911_vm3, %v5075_v13  ;;  %v2109_v13 = vsel %vm6680_vm10, %v5098_v53, %v2108_v52  ;;  %v2129_v52 = vsel %vm6680_vm10, %v5103_v33, %v2128_v34 }
  0xc5   : > { %5579 = vmatprep.mubr.msk.bf16.mxu0 %vm911_vm3, %v6008_v14  ;;  %v5279_v14 = vcombine.low %v3516_v1, %v3520_v7 }
  0xc8   : > { %5688 = vmatmul.mubr.msk.bf16.vlgmr.msra.gmra.mrb[0].mxu1 %vm911_vm3, %v6011_v10  ;;  %v3483_v10 = vld [vmem:[#allocation2 + $0x2a0] sm:$0xc] }
  0xc9   : > { %5691 = vmatprep.mubr.msk.bf16.mxu1 %vm911_vm3, %v6013_v15  ;;  %5696 = vmatpush3.bf16.msra.mxu1 %v6017_v19  ;;  %v3484_v15 = vld [vmem:[#allocation2 + $0x2a4] sm:$0x3]  ;;  %v2117_v19 = vsel %vm6680_vm10, %v5100_v42, %v2116_v6 }
  0xca   : > { %5697 = vmatprep.subr.bf16.mxu1 %v6019_v24  ;;  %v5110_v45 = vcombine.low %v2117_v19, %v2121_v25  ;;  %v3718_v19 = vld [vmem:[%s7568_s23 + $0x18] sm:$0xff] }
  0xcc   : > { %5580 = vmatmul.mubr.msk.bf16.vlgmr.msra.gmra.mrb[0].mxu0 %vm911_vm3, %v6010_v17  ;;  %v3523_v17 = vrot.slane %v3482_v12, 6 }
  0xcd   : > { %5583 = vmatprep.mubr.msk.bf16.mxu0 %vm911_vm3, %v6012_v18  ;;  %5588 = vmatpush3.bf16.msra.mxu0 %v6015_v16  ;;  %v5270_v16 = vrot.slane %v3481_v11, 10  ;;  %v2113_v18 = vsel %vm6680_vm10, %v5099_v54, %v2112_v55 }
  0xce   : > { %5589 = vmatprep.subr.bf16.mxu0 %v6018_v20  ;;  %5698 = vmatpush3.bf16.msra.mxu1 %v6019_v24  ;;  %v2078_v24 = vld [vmem:[#allocation2 + $0x238] sm:$0x8]  ;;  %v5109_v37 = vcombine.low %v2109_v13, %v2113_v18 }
  0xcf   : > { %v3524_v26 = vsel %vm6639_vm7, %v5270_v16, %v3523_v17  ;;  %v5102_v29 = vrot.slane %v2078_v24, 11  ;;  %v3717_v17 = vld [vmem:[%s7568_s23 + $0x10] sm:$0xff] }
  0xd0   : > { %5692 = vmatmul.mubr.msk.bf16.gmra.mrb[4].mxu1 %vm911_vm3, %v6016_v23  ;;  %v3527_v23 = vrot.slane %v3484_v15, 6 }
  0xd1   : > { %5590 = vmatpush3.bf16.msra.mxu0 %v6018_v20  ;;  %5699 = vmatprep.mubr.msk.bf16.mxu1 %vm911_vm3, %v5278_v58  ;;  %v5271_v20 = vrot.slane %v3483_v10, 10  ;;  %v2125_v53 = vsel %vm6680_vm10, %v5102_v29, %v2124_v31 }
  0xd2   : > { %v5111_v21 = vcombine.low %v2125_v53, %v2129_v52  ;;  %5707 = vmatprep.subr.bf16.mxu0 %v6020_v30 }
  0xd3   : > { %v3528_v32 = vsel %vm6639_vm7, %v5271_v20, %v3527_v23  ;;  %v3715_v23 = vld [vmem:[%s7568_s23] sm:$0xff] }
  0xd4   : > { %5584 = vmatmul.mubr.msk.bf16.gmra.mrb[4].mxu0 %vm911_vm3, %v6014_v46  ;;  %v5280_v38 = vcombine.low %v3524_v26, %v3528_v32  ;;  %v5273_v46 = vrot.slane %v3487_v39, 10 }
  0xd5   : > { %5591 = vmatprep.mubr.msk.bf16.mxu0 %vm911_vm3, %v5108_v63 }
  0xd6   : > { %v3536_v50 = vsel %vm6639_vm7, %v5273_v46, %v3535_v47 }
  0xd7   : > { %v5281_v51 = vcombine.low %v3532_v48, %v3536_v50 }
  0xd8   : > { %5700 = vmatmul.mubr.msk.bf16.vlgmr.msra.gmra.mrb[0].mxu1 %vm911_vm3, %v5279_v14 }
  0xd9   : > { %5703 = vmatprep.mubr.msk.bf16.mxu1 %vm911_vm3, %v5280_v38 }
  0xdc   : > { %5592 = vmatmul.mubr.msk.bf16.vlgmr.msra.gmra.mrb[0].mxu0 %vm911_vm3, %v5109_v37 }
  0xdd   : > { %5595 = vmatprep.mubr.msk.bf16.mxu0 %vm911_vm3, %v5110_v45  ;;  %5708 = vmatpush3.bf16.msra.mxu0 %v6020_v30  ;;  %v3721_v30 = vld [vmem:[%s7568_s23 + $0x30] sm:$0xff] }
  0xde   : > { %5709 = vmatprep.subr.bf16.mxu0 %v6021_v43 }
  0xe0   : > { %5704 = vmatmul.mubr.msk.bf16.gmra.mrb[4].mxu1 %vm911_vm3, %v5281_v51 }
  0xe1   : > { %5710 = vmatpush3.bf16.msra.mxu0 %v6021_v43 }
  0xe4   : > { %5596 = vmatmul.mubr.msk.bf16.gmra.mrb[4].mxu0 %vm911_vm3, %v5111_v21 }
 0x1ab   : > { %v5701_v54 = vpop.f32.mrb[0].mxu1 }
 0x1ac   : > { %3663 = vrot.lane.b32.xlu1 %v5701_v54, %s6159_s19  ;;  %v3612_v55 = vpop.f32.mrb[1].mxu1  ;;  %v3722_v54 = vld [vmem:[%s7568_s23 + $0x38] sm:$0xff] }
 0x1ad   : > { %3659 = vrot.lane.b32.xlu0 %v3612_v55, %s6159_s19  ;;  %v5702_v56 = vpop.f32.mrb[2].mxu1 }
 0x1ae   : > { %v3615_v57 = vpop.f32.mrb[3].mxu1 }
 0x1af   : > { %v5593_v58 = vpop.f32.mrb[0].mxu0 }
 0x1b0   : > { %3665 = vrot.lane.b32.xlu1 %v5702_v56, %s6159_s19  ;;  %v2205_v59 = vpop.f32.mrb[1].mxu0 }
 0x1b1   : > { %3661 = vrot.lane.b32.xlu0 %v3615_v57, %s6159_s19  ;;  %v5594_v60 = vpop.f32.mrb[2].mxu0 }
 0x1b2   : > { %v2208_v61 = vpop.f32.mrb[3].mxu0 }
 0x1b3   : > { %v5705_v62 = vpop.f32.mrb[4].mxu1 }
 0x1b4   : > { %v3628_v63 = vpop.f32.mrb[5].mxu1 }
 0x1b5   : > { %3667 = vrot.lane.b32.xlu0 %v3628_v63, %s6159_s19  ;;  %v5706_v0 = vpop.f32.mrb[6].mxu1 }
 0x1b6   : > { %v3631_v2 = vpop.f32.mrb[7].mxu1 }
 0x1b7   : > { %3669 = vrot.lane.b32.xlu1 %v3631_v2, %s6159_s19  ;;  %v5597_v49 = vpop.f32.mrb[4].mxu0 }
 0x1b8   : > { %v2221_v3 = vpop.f32.mrb[5].mxu0 }
 0x1b9   : > { %3671 = vrot.lane.b32.xlu0 %v5705_v62, %s6159_s19  ;;  %v5598_v1 = vpop.f32.mrb[6].mxu0  ;;  %v5289_v62 = vld [vmem:[%s7527_s5] ss:$0 sm:$0xff] }
 0x1ba   : > { %v2224_v4 = vpop.f32.mrb[7].mxu0 }
 0x1bb   : > { %3673 = vrot.lane.b32.xlu1 %v5706_v0, %s6159_s19 }
 0x21e   : > { %v3664_v42 = vpop.permute.xlu1 %3663 }
 0x21f   : > { %v3686_v6 = vsel %vm3683_vm11, %v5593_v58, %v3664_v42  ;;  %v3660_v7 = vpop.permute.xlu0 %3659 }
 0x220   : > { %v3701_v8 = vadd.f32 %v5288_v5, %v3686_v6  ;;  %v3684_v9 = vsel %vm3683_vm11, %v2205_v59, %v3660_v7  ;;  %v6022_v59 = vld [vmem:[%s7528_s6] sm:$0xff]  }
 0x221   : > { %v3699_v11 = vadd.f32 %v5288_v5, %v3684_v9  ;;  %5719 = vmatprep.subr.bf16.mxu1 %v6022_v59 }
 0x222   : > { %v3666_v12 = vpop.permute.xlu1 %3665  ;;  %v3709_v10 = vmax.f32 %v3701_v8, 0.0  ;;  %5720 = vmatpush3.bf16.msra.mxu1 %v6022_v59 }
 0x223   : > { %v3687_v13 = vsel %vm3683_vm11, %v5594_v60, %v3666_v12  ;;  %v3662_v14 = vpop.permute.xlu0 %3661  ;;  %v3707_v18 = vmax.f32 %v3699_v11, 0.0  ;;  %v6023_v60 = vld [vmem:[%s7528_s6 + $0x8] sm:$0xff]  }
 0x224   : > { %v3702_v15 = vadd.f32 %v5288_v5, %v3687_v13  ;;  %v3685_v16 = vsel %vm3683_vm11, %v2208_v61, %v3662_v14  ;;  %v3725_v27 = vadd.f32 %v3717_v17, %v3709_v10  ;;  %5721 = vmatprep.subr.bf16.mxu1 %v6023_v60 }
 0x225   : > { %v3700_v20 = vadd.f32 %v5288_v5, %v3685_v16  ;;  %v3723_v31 = vadd.f32 %v3715_v23, %v3707_v18  ;;  %v5296_v16 = vld [vmem:[%s7529_s7] ss:$0 sm:$0xff] }
 0x226   : > { %v3710_v24 = vmax.f32 %v3702_v15, 0.0  ;;  %5722 = vmatpush3.bf16.msra.mxu1 %v6023_v60 }
 0x227   : > { %v3708_v25 = vmax.f32 %v3700_v20, 0.0  ;;  %v3668_v26 = vpop.permute.xlu0 %3667 }
 0x228   : > { %v3726_v28 = vadd.f32 %v3718_v19, %v3710_v24  ;;  %v3688_v29 = vsel %vm3683_vm11, %v2221_v3, %v3668_v26 }
 0x229   : > { %v3724_v32 = vadd.f32 %v3716_v22, %v3708_v25  ;;  %v3703_v33 = vadd.f32 %v5288_v5, %v3688_v29  ;;  %v3670_v34 = vpop.permute.xlu1 %3669 }
 0x22a   : > { %v3732_v35 = vpack.c.bf16 %v3726_v28, %v3725_v27  ;;  %v3689_v36 = vsel %vm3683_vm11, %v2224_v4, %v3670_v34 }
 0x22b   : > { %v3731_v37 = vpack.c.bf16 %v3724_v32, %v3723_v31  ;;  %v3711_v38 = vmax.f32 %v3703_v33, 0.0  ;;  %v3704_v39 = vadd.f32 %v5288_v5, %v3689_v36  ;;  %v3672_v40 = vpop.permute.xlu0 %3671 }
 0x22c   : > { %v3690_v45 = vsel %vm3683_vm11, %v5597_v49, %v3672_v40 }
 0x22d   : > { %v3712_v46 = vmax.f32 %v3704_v39, 0.0  ;;  %v3705_v47 = vadd.f32 %v5288_v5, %v3690_v45  ;;  %v3674_v48 = vpop.permute.xlu1 %3673  ;;  %5711 = vmatprep.mubr.msk.bf16.mxu0 %vm911_vm3, %v3731_v37  ;;  %v3727_v51 = vadd.f32 %v3719_v41, %v3711_v38 }
 0x22e   : > { %v3691_v50 = vsel %vm3683_vm11, %v5598_v1, %v3674_v48  ;;  %5712 = vmatmul.mubr.msk.bf16.vlgmr.msra.gmra.mrb[8].mxu0 %vm911_vm3, %v3732_v35 }
 0x22f   : > { %v3728_v53 = vadd.f32 %v3720_v44, %v3712_v46  ;;  %v3713_v52 = vmax.f32 %v3705_v47, 0.0  ;;  %v3706_v21 = vadd.f32 %v5288_v5, %v3691_v50 }
 0x231   : > { %v3733_v55 = vpack.c.bf16 %v3728_v53, %v3727_v51  ;;  %v3714_v56 = vmax.f32 %v3706_v21, 0.0  ;;  %v3729_v43 = vadd.f32 %v3721_v30, %v3713_v52 }
 0x233   : > { %v3730_v57 = vadd.f32 %v3722_v54, %v3714_v56  ;;  %5715 = vmatprep.mubr.msk.bf16.mxu0 %vm911_vm3, %v3733_v55 }
 0x235   : > { %v3734_v58 = vpack.c.bf16 %v3730_v57, %v3729_v43 }
 0x237   : > { %5716 = vmatmul.mubr.msk.bf16.gmra.mrb[12].mxu0 %vm911_vm3, %v3734_v58 }
 0x301   : > { %v5713_v61 = vpop.f32.mrb[8].mxu0 }
 0x302   : > { %v3804_v63 = vpop.f32.mrb[9].mxu0  ;;  %v7098_v4 = vadd.f32 %v5713_v61, %v5289_v62 }
 0x303   : > { %v5714_v0 = vpop.f32.mrb[10].mxu0  ;;  %v7094_v3 = vadd.f32 %v5289_v62, %v3804_v63 }
 0x304   : > { %v7092_v2 = vadd.f32 %v5714_v0, %v5289_v62  ;;  %v3807_v49 = vpop.f32.mrb[11].mxu0 }
 0x305   : > { %v7096_v1 = vadd.f32 %v5289_v62, %v3807_v49 }
 0x306   : > { %v3836_v42 = vpack.c.bf16 %v7092_v2, %v7098_v4 }
 0x307   : > { %v3835_v5 = vpack.c.bf16 %v7096_v1, %v7094_v3 }
 0x309   : > { %5723 = vmatprep.mubr.msk.bf16.mxu1 %vm911_vm3, %v3835_v5 }
 0x30a   : > { %v5717_v6 = vpop.f32.mrb[12].mxu0  ;;  %5724 = vmatmul.mubr.msk.bf16.vlgmr.msra.gmra.mrb[8].mxu1 %vm911_vm3, %v3836_v42 }
 0x30b   : > { %v3820_v7 = vpop.f32.mrb[13].mxu0  ;;  %v7112_v14 = vadd.f32 %v5717_v6, %v5289_v62 }
 0x30c   : > { %v5718_v8 = vpop.f32.mrb[14].mxu0  ;;  %v7108_v12 = vadd.f32 %v5289_v62, %v3820_v7 }
 0x30d   : > { %v7106_v9 = vadd.f32 %v5718_v8, %v5289_v62  ;;  %v3823_v11 = vpop.f32.mrb[15].mxu0 }
 0x30e   : > { %v7110_v13 = vadd.f32 %v5289_v62, %v3823_v11 }
 0x30f   : > { %v3838_v15 = vpack.c.bf16 %v7106_v9, %v7112_v14 }
 0x310   : > { %v3837_v10 = vpack.c.bf16 %v7110_v13, %v7108_v12 }
 0x312   : > { %5727 = vmatprep.mubr.msk.bf16.mxu1 %vm911_vm3, %v3837_v10 }
 0x313   : > { %5728 = vmatmul.mubr.msk.bf16.gmra.mrb[12].mxu1 %vm911_vm3, %v3838_v15 }
 0x3dd   : > { %v5725_v17 = vpop.f32.mrb[8].mxu1 }
 0x3de   : > { %v7123_v18 = vadd.f32 %v5725_v17, %v5296_v16  ;;  %v3908_v19 = vpop.f32.mrb[9].mxu1 }
 0x3df   : > { %v7125_v20 = vadd.f32 %v5296_v16, %v3908_v19  ;;  %v5726_v23 = vpop.f32.mrb[10].mxu1 }
 0x3e0   : > { %v3959_v24 = vmul.f32 1.442695, %v7123_v18  ;;  %v7128_v22 = vadd.f32 %v5726_v23, %v5296_v16  ;;  %v3911_v25 = vpop.f32.mrb[11].mxu1  ;;  %v3949_v45 = vadd.f32 1.0, %v7123_v18  ;;  %vm3941_vm13 = vcmp.gt.f32.partialorder %v7123_v18, 0.0 }
 0x3e1   : > { %v3955_v26 = vmul.f32 1.442695, %v7125_v20  ;;  %v7131_v27 = vadd.f32 %v5296_v16, %v3911_v25  ;;  %v3947_v48 = vadd.f32 1.0, %v7125_v20  ;;  %vm3939_vm14 = vcmp.gt.f32.partialorder %v7125_v20, 0.0 }
 0x3e2   : > { %6030 = vpow2.f32 %v3959_v24  ;;  %v3961_v28 = vmul.f32 1.442695, %v7128_v22  ;;  %v3984_v31 = vpack.c.bf16 %v7128_v22, %v7123_v18  ;;  %v3950_v53 = vadd.f32 1.0, %v7128_v22 }
 0x3e3   : > { %6032 = vpow2.f32 %v3955_v26  ;;  %v3957_v29 = vmul.f32 1.442695, %v7131_v27  ;;  %v3983_v32 = vpack.c.bf16 %v7131_v27, %v7125_v20  ;;  %v3948_v54 = vadd.f32 1.0, %v7131_v27 }
 0x3e4   : > { %6034 = vpow2.f32 %v3961_v28  ;;  %vm3942_vm15 = vcmp.gt.f32.partialorder %v7128_v22, 0.0  ;;  %vm3940_vm0 = vcmp.gt.f32.partialorder %v7131_v27, 0.0 }
 0x3e5   : > { %6036 = vpow2.f32 %v3957_v29 }
 0x3e6   : > { %v5729_v33 = vpop.f32.mrb[12].mxu1 }
 0x3e7   : > { %v7139_v34 = vadd.f32 %v5729_v33, %v5296_v16  ;;  %v3924_v35 = vpop.f32.mrb[13].mxu1 }
 0x3e8   : > { %v7141_v36 = vadd.f32 %v5296_v16, %v3924_v35  ;;  %v5730_v37 = vpop.f32.mrb[14].mxu1 }
 0x3e9   : > { %v3967_v38 = vmul.f32 1.442695, %v7139_v34  ;;  %v7144_v39 = vadd.f32 %v5730_v37, %v5296_v16  ;;  %v3927_v40 = vpop.f32.mrb[15].mxu1  ;;  %v3953_v8 = vadd.f32 1.0, %v7139_v34  ;;  %vm3945_vm2 = vcmp.gt.f32.partialorder %v7139_v34, 0.0 }
 0x3ea   : > { %v3963_v41 = vmul.f32 1.442695, %v7141_v36  ;;  %v7147_v44 = vadd.f32 %v5296_v16, %v3927_v40  ;;  %v3951_v42 = vadd.f32 1.0, %v7141_v36  ;;  %vm3943_vm1 = vcmp.gt.f32.partialorder %v7141_v36, 0.0 }
 0x3eb   : > { %6038 = vpow2.f32 %v3967_v38  ;;  %v3969_v46 = vmul.f32 1.442695, %v7144_v39  ;;  %v3986_v52 = vpack.c.bf16 %v7144_v39, %v7139_v34  ;;  %v3954_v11 = vadd.f32 1.0, %v7144_v39 }
 0x3ec   : > { %v6031_v47 = vpop.eup %6030  ;;  %6040 = vpow2.f32 %v3963_v41  ;;  %v3965_v50 = vmul.f32 1.442695, %v7147_v44  ;;  %v3985_v21 = vpack.c.bf16 %v7147_v44, %v7141_v36  ;;  %v3952_v16 = vadd.f32 1.0, %v7147_v44 }
 0x3ed   : > { %v6033_v51 = vpop.eup %6032  ;;  %6042 = vpow2.f32 %v3969_v46  ;;  %v7166_v43 = vsel %vm3941_vm13, %v3949_v45, %v6031_v47  ;;  %vm3946_vm4 = vcmp.gt.f32.partialorder %v7144_v39, 0.0  ;;  %vm3944_vm5 = vcmp.gt.f32.partialorder %v7147_v44, 0.0 }
 0x3ee   : > { %v6035_v30 = vpop.eup %6034  ;;  %6044 = vpow2.f32 %v3965_v50  ;;  %v7162_v55 = vsel %vm3939_vm14, %v3947_v48, %v6033_v51  ;;  %v4095_v0 = vsel %vm4091_vm12, %v7166_v43, 0.0 }
 0x3ef   : > { %v6037_v56 = vpop.eup %6036  ;;  %v7168_v57 = vsel %vm3942_vm15, %v3950_v53, %v6035_v30  ;;  %v4092_v61 = vsel %vm4091_vm12, %v7162_v55, 0.0 }
 0x3f0   : > { %v7173_v58 = vpack.c.bf16 %v7168_v57, %v7166_v43  ;;  %v7175_v59 = vsel %vm3940_vm0, %v3948_v54, %v6037_v56  ;;  %v4097_v6 = vsel %vm4091_vm12, %v7168_v57, 0.0 }
 0x3f1   : > { %v3979_v60 = vpack.c.bf16 %v7175_v59, %v7162_v55  ;;  %v4093_v62 = vsel %vm4091_vm12, %v7175_v59, 0.0 }
 0x3f2   : > { %3993 = vrot.lane.b32.xlu1 %v7173_v58, %s6160_s24  ;;  %v4094_v63 = vadd.f32 %v4093_v62, %v4092_v61 }
 0x3f3   : > { %3991 = vrot.lane.b32.xlu0 %v3979_v60, %s6160_s24  ;;  %5747 = vmatprep.mubr.msk.bf16.mxu1 %vm911_vm3, %v3979_v60 }
 0x3f4   : > { %v4096_v49 = vadd.f32 %v4095_v0, %v4094_v63 }
 0x3f5   : > { %v6039_v5 = vpop.eup %6038 }
 0x3f6   : > { %v6041_v7 = vpop.eup %6040  ;;  %v4098_v10 = vadd.f32 %v4097_v6, %v4096_v49  ;;  %v3977_v23 = vsel %vm3945_vm2, %v3953_v8, %v6039_v5 }
 0x3f7   : > { %v6043_v15 = vpop.eup %6042  ;;  %v7198_v17 = vsel %vm3943_vm1, %v3951_v42, %v6041_v7  ;;  %v4103_v36 = vsel %vm4091_vm12, %v3977_v23, 0.0 }
 0x3f8   : > { %v6045_v19 = vpop.eup %6044  ;;  %v7200_v24 = vsel %vm3946_vm4, %v3954_v11, %v6043_v15  ;;  %v4099_v25 = vsel %vm4091_vm12, %v7198_v17, 0.0 }
 0x3f9   : > { %v7206_v26 = vpack.c.bf16 %v7200_v24, %v3977_v23  ;;  %v3976_v28 = vsel %vm3944_vm5, %v3952_v16, %v6045_v19  ;;  %v4100_v29 = vadd.f32 %v4099_v25, %v4098_v10  ;;  %v4105_v38 = vsel %vm4091_vm12, %v7200_v24, 0.0  ;;  %v6024_v16 = vld [vmem:[%s7530_s8] sm:$0xff]  }
 0x3fa   : > { %v7209_v33 = vpack.c.bf16 %v3976_v28, %v7198_v17  ;;  %v4101_v34 = vsel %vm4091_vm12, %v3976_v28, 0.0 }
 0x3fb   : > { %3997 = vrot.lane.b32.xlu1 %v7206_v26, %s6160_s24  ;;  %v4102_v35 = vadd.f32 %v4101_v34, %v4100_v29 }
 0x3fc   : > { %3995 = vrot.lane.b32.xlu0 %v7209_v33, %s6160_s24 }
 0x3fd   : > { %v4104_v37 = vadd.f32 %v4103_v36, %v4102_v35 }
 0x3ff   : > { %4025 = vrot.lane.b32.xlu1 %v3984_v31, %s6161_s25  ;;  %v4106_v39 = vadd.f32 %v4105_v38, %v4104_v37 }
 0x400   : > { %4023 = vrot.lane.b32.xlu0 %v3983_v32, %s6161_s25 }
 0x401   : > { %v4107_v40 = vrot.slane %v4106_v39, 4 }
 0x403   : > { %4029 = vrot.lane.b32.xlu1 %v3986_v52, %s6161_s25  ;;  %v4108_v41 = vadd.f32 %v4107_v40, %v4106_v39 }
 0x404   : > { %4027 = vrot.lane.b32.xlu0 %v3985_v21, %s6161_s25 }
 0x405   : > { %v4109_v44 = vrot.slane %v4108_v41, 2 }
 0x407   : > { %v4110_v45 = vadd.f32 %v4109_v44, %v4108_v41 }
 0x409   : > { %v4111_v46 = vrot.slane %v4110_v45, 1 }
 0x40b   : > { %v4112_v47 = vadd.f32 %v4111_v46, %v4110_v45 }
 0x40d   : > { %4114 = vrot.lane.b32.xlu1 %v4112_v47, %s6160_s24  ;;  %s566_s24 = sand.u32 1, %s6148_s28  }
 0x40e   : > { %s4945_s19 = sshll.u32 %s566_s24, 6  ;;  %s7481_s0 = scalar_lea.sflag [#allocation4], %s566_s24 }
 0x40f   : > { %s7447_s1 = scalar_lea.vmem [#allocation3], %s4945_s19  ;;  %s6100_s19 = scalar_lea.vmem %s6099_s29, 2048 }
 0x410   : > { %s4879_s25 = sshll.u32 %s7447_s1, 4  ;;  %s7473_s25 = int_to_ptr.vmem [resolvable:$true] %s4879_s25 }
 0x411   : > { %s6094_s21 = scalar_lea.vmem %s7473_s25, 1024  ;;  %p6101_p0 = scmp.lt.s32.totalorder %s7473_s25, %s6099_s29 }
 0x412   : > { %p6095_p11 = scmp.ne.s32.totalorder %s7473_s25, %s6094_s21  ;;  %p6102_p1 = scmp.lt.s32.totalorder %s6100_s19, %s6094_s21 }
 0x414   : > { %p6096_p12 = pnand %p6095_p11, %p6298_p5  ;;  %p6103_p2 = por %p6102_p1, %p6101_p0 }
 0x416   : > { %p6097_p13 = pneg %p6096_p12 }
 0x418   : > { %p6104_p3 = pnand %p6103_p2, %p6097_p13 }
 0x464   : > { %v3994_v50 = vpop.permute.xlu1 %3993 }
 0x465   : > { %v3992_v48 = vpop.permute.xlu0 %3991 }
 0x466   : > { %4003 = vxpose.xlu0.c.b16.start [1/4] (short) (narrow) %v3992_v48, 32 }
 0x46a   : > { %4004 = vxpose.xlu0.c.b16.cont [2/4] (short) (narrow) %v3994_v50, 32 }
 0x46d   : > { %v3998_v18 = vpop.permute.xlu1 %3997 }
 0x46e   : > { %v3996_v22 = vpop.permute.xlu0 %3995 }
 0x46f   : > { %4005 = vxpose.xlu0.c.b16.cont [3/4] (short) (narrow) %v3996_v22, 32 }
 0x471   : > { %v4026_v20 = vpop.permute.xlu1 %4025 }
 0x472   : > { %v4024_v31 = vpop.permute.xlu0 %4023 }
 0x473   : > { %4006 = vxpose.xlu0.c.b16.end [4/4] (short) (narrow) %v3998_v18, 32  ;;  %5731 = vmatprep.subr.bf16.mxu0 %v4024_v31 }
 0x474   : > { %5732 = vmatpush3.bf16.msra.mxu0 %v4024_v31 }
 0x475   : > { %5733 = vmatprep.subr.bf16.mxu0 %v4026_v20  ;;  %v4030_v32 = vpop.permute.xlu1 %4029 }
 0x476   : > { %v4028_v27 = vpop.permute.xlu0 %4027 }
 0x478   : > { %5734 = vmatpush3.bf16.msra.mxu0 %v4026_v20 }
 0x479   : > { %5735 = vmatprep.subr.bf16.mxu0 %v4028_v27 }
 0x47c   : > { %5736 = vmatpush3.bf16.msra.mxu0 %v4028_v27 }
 0x47d   : > { %5737 = vmatprep.subr.bf16.mxu0 %v4030_v32 }
 0x47f   : > { %v4115_v51 = vpop.permute.xlu1 %4114 }
 0x480   : > { %5738 = vmatpush3.bf16.msra.mxu0 %v4030_v32  ;;  %v4117_v53 = vmul.f32 %v4115_v51, %v7162_v55  ;;  %v4119_v52 = vmul.f32 %v4115_v51, %v7166_v43  ;;  %v4118_v54 = vmul.f32 %v4115_v51, %v7175_v59  ;;  %v4123_v56 = vmul.f32 %v4115_v51, %v3977_v23 }
 0x481   : > { %v4120_v62 = vmul.f32 %v4115_v51, %v7168_v57  ;;  %v4121_v43 = vmul.f32 %v4115_v51, %v7198_v17  ;;  %v4122_v0 = vmul.f32 %v4115_v51, %v3976_v28  ;;  %v4124_v49 = vmul.f32 %v4115_v51, %v7200_v24  ;;  %5755 = vmatprep.subr.bf16.mxu0 %v6024_v16  ;;  %v6025_v17 = vld [vmem:[%s7530_s8 + $0x8] sm:$0xff]  }
 0x482   : > { %v4125_v21 = vsel %vm911_vm3, %v4117_v53, 0.0  ;;  %v4131_v30 = vsel %vm911_vm3, %v4119_v52, 0.0  ;;  %v4128_v60 = vsel %vm911_vm3, %v4118_v54, 0.0  ;;  %v4143_v61 = vsel %vm911_vm3, %v4123_v56, 0.0 }
 0x483   : > { %4126 = vadd.xlane.f32.xlu1 %v4125_v21  ;;  %4132 = vadd.xlane.f32.xlu0 %v4131_v30  ;;  %v4134_v55 = vsel %vm911_vm3, %v4120_v62, 0.0  ;;  %v4137_v63 = vsel %vm911_vm3, %v4121_v43, 0.0  ;;  %v4140_v59 = vsel %vm911_vm3, %v4122_v0, 0.0  ;;  %v4146_v5 = vsel %vm911_vm3, %v4124_v49, 0.0  ;;  %v5309_v49 = vld [vmem:[%s7531_s9] ss:$0 sm:$0xff] }
 0x487   : > { %4129 = vadd.xlane.f32.xlu1 %v4128_v60  ;;  %4144 = vadd.xlane.f32.xlu0 %v4143_v61 }
 0x48b   : > { %4135 = vadd.xlane.f32.xlu1 %v4134_v55 }
 0x48f   : > { %4138 = vadd.xlane.f32.xlu1 %v4137_v63 }
 0x493   : > { %4141 = vadd.xlane.f32.xlu1 %v4140_v59 }
 0x497   : > { %4147 = vadd.xlane.f32.xlu1 %v4146_v5 }
 0x4cd   : > { %v4011_v57 = vpop.trf.xlu0 }
 0x4ce   : > { %5739 = vmatprep.mubr.msk.bf16.mxu0 %vm4035_vm6, %v4011_v57 }
 0x4d1   : > { %v4012_v42 = vpop.trf.xlu0 }
 0x4d2   : > { %5740 = vmatmul.mubr.msk.bf16.vlgmr.msra.gmra.mrb[16].mxu0 %vm4035_vm6, %v4012_v42 }
 0x4d3   : > { %5756 = vmatpush3.bf16.msra.mxu0 %v6024_v16 }
 0x4d4   : > { %5757 = vmatprep.subr.bf16.mxu0 %v6025_v17 }
 0x4d7   : > { %5758 = vmatpush3.bf16.msra.mxu0 %v6025_v17 }
 0x510   : > { %v4127_v19 = vpop.xlane.xlu1 %4126  ;;  %v4133_v25 = vpop.xlane.xlu0 %4132 }
 0x511   : > { %v4149_v28 = vadd.f32 1e-06, %v4127_v19  ;;  %v4151_v29 = vadd.f32 1e-06, %v4133_v25 }
 0x513   : > { %6046 = vrcp.f32 %v4149_v28 }
 0x514   : > { %6048 = vrcp.f32 %v4151_v29  ;;  %v4145_v35 = vpop.xlane.xlu0 %4144 }
 0x515   : > { %v4155_v37 = vadd.f32 1e-06, %v4145_v35 }
 0x51d   : > { %v6047_v41 = vpop.eup %6046 }
 0x51e   : > { %v6049_v45 = vpop.eup %6048 }
 0x5a5   : > { %v5741_v6 = vpop.f32.mrb[16].mxu0 }
 0x5a6   : > { %v4076_v7 = vpop.f32.mrb[17].mxu0 }
 0x5a7   : > { %v5742_v8 = vpop.f32.mrb[18].mxu0 }
 0x5a8   : > { %v4158_v11 = vpack.c.bf16 %v5742_v8, %v5741_v6  ;;  %v4079_v10 = vpop.f32.mrb[19].mxu0 }
 0x5a9   : > { %v4157_v15 = vpack.c.bf16 %v4079_v10, %v4076_v7 }
 0x5ab   : > { %5743 = vmatprep.subr.bf16.mxu1 %v4157_v15 }
 0x5ac   : > { %5744 = vmatpush3.bf16.msra.mxu1 %v4157_v15 }
 0x5ad   : > { %5745 = vmatprep.subr.bf16.mxu1 %v4158_v11 }
 0x5b0   : > { %5746 = vmatpush3.bf16.msra.mxu1 %v4158_v11 }
 0x5b3   : > { %5748 = vmatmul.mubr.msk.bf16.vlgmr.msra.gmra.mrb[16].mxu1 %vm911_vm3, %v7173_v58  ;;  %v4130_v58 = vpop.xlane.xlu1 %4129 }
 0x5b4   : > { %5751 = vmatprep.mubr.msk.bf16.mxu1 %vm911_vm3, %v7209_v33  ;;  %v4150_v34 = vadd.f32 1e-06, %v4130_v58 }
 0x5b7   : > { %v4136_v23 = vpop.xlane.xlu1 %4135 }
 0x5b8   : > { %v4152_v33 = vadd.f32 1e-06, %v4136_v23 }
 0x5ba   : > { %6050 = vrcp.f32 %v4152_v33 }
 0x5bb   : > { %5752 = vmatmul.mubr.msk.bf16.gmra.mrb[20].mxu1 %vm911_vm3, %v7206_v26  ;;  %v4139_v24 = vpop.xlane.xlu1 %4138  ;;  %6052 = vrcp.f32 %v4150_v34 }
 0x5bc   : > { %v4153_v38 = vadd.f32 1e-06, %v4139_v24  ;;  %6054 = vrcp.f32 %v4155_v37 }
 0x5be   : > { %6056 = vrcp.f32 %v4153_v38 }
 0x5bf   : > { %v4142_v26 = vpop.xlane.xlu1 %4141 }
 0x5c0   : > { %v4154_v40 = vadd.f32 1e-06, %v4142_v26 }
 0x5c3   : > { %v4148_v36 = vpop.xlane.xlu1 %4147 }
 0x5c4   : > { %v4156_v39 = vadd.f32 1e-06, %v4148_v36  ;;  %v6051_v47 = vpop.eup %6050 }
 0x5c5   : > { %v6053_v50 = vpop.eup %6052 }
 0x5c6   : > { %6058 = vrcp.f32 %v4156_v39  ;;  %v6055_v53 = vpop.eup %6054 }
 0x5c7   : > { %6060 = vrcp.f32 %v4154_v40 }
 0x5c8   : > { %v6057_v21 = vpop.eup %6056 }
 0x5d0   : > { %v6059_v54 = vpop.eup %6058 }
 0x5d1   : > { %v6061_v60 = vpop.eup %6060 }
 0x686   : > { %v5749_v44 = vpop.f32.mrb[16].mxu1 }
 0x687   : > { %v4205_v46 = vpop.f32.mrb[17].mxu1  ;;  %v4246_v18 = vmul.f32 %v6049_v45, %v5749_v44 }
 0x688   : > { %v5750_v48 = vpop.f32.mrb[18].mxu1  ;;  %v4244_v20 = vmul.f32 %v6047_v41, %v4205_v46 }
 0x689   : > { %v4247_v22 = vmul.f32 %v6051_v47, %v5750_v48  ;;  %v4208_v31 = vpop.f32.mrb[19].mxu1 }
 0x68a   : > { %v4245_v27 = vmul.f32 %v6053_v50, %v4208_v31 }
 0x68b   : > { %v4253_v32 = vpack.c.bf16 %v4247_v22, %v4246_v18 }
 0x68c   : > { %v4252_v51 = vpack.c.bf16 %v4245_v27, %v4244_v20 }
 0x68e   : > { %v5753_v52 = vpop.f32.mrb[20].mxu1  ;;  %5759 = vmatprep.mubr.msk.bf16.mxu0 %vm911_vm3, %v4252_v51 }
 0x68f   : > { %v4221_v30 = vpop.f32.mrb[21].mxu1  ;;  %5760 = vmatmul.mubr.msk.bf16.vlgmr.msra.gmra.mrb[20].mxu0 %vm911_vm3, %v4253_v32  ;;  %v4250_v61 = vmul.f32 %v6055_v53, %v5753_v52 }
 0x690   : > { %v5754_v56 = vpop.f32.mrb[22].mxu1  ;;  %v4248_v43 = vmul.f32 %v6057_v21, %v4221_v30 }
 0x691   : > { %v4251_v62 = vmul.f32 %v6059_v54, %v5754_v56  ;;  %v4224_v55 = vpop.f32.mrb[23].mxu1 }
 0x692   : > { %v4249_v63 = vmul.f32 %v6061_v60, %v4224_v55 }
 0x693   : > { %v4255_v0 = vpack.c.bf16 %v4251_v62, %v4250_v61 }
 0x694   : > { %v4254_v59 = vpack.c.bf16 %v4249_v63, %v4248_v43 }
 0x696   : > { %5763 = vmatprep.mubr.msk.bf16.mxu0 %vm911_vm3, %v4254_v59 }
 0x697   : > { %5764 = vmatmul.mubr.msk.bf16.gmra.mrb[24].mxu0 %vm911_vm3, %v4255_v0 }
 0x762   : > { %v5761_v5 = vpop.f32.mrb[20].mxu0 }
 0x763   : > { %v4325_v57 = vpop.f32.mrb[21].mxu0  ;;  %v4334_v42 = vadd.f32 %v5761_v5, %v5309_v49 }
 0x764   : > { %v4326_v6 = vadd.f32 %v5309_v49, %v4325_v57  ;;  %v5762_v7 = vpop.f32.mrb[22].mxu0 }
 0x765   : > { %v4328_v8 = vpop.f32.mrb[23].mxu0  ;;  %v4337_v11 = vadd.f32 %v5762_v7, %v5309_v49  ;;  %v4358_v19 = vadd.f32 %v4334_v42, %v7098_v4 }
 0x766   : > { %v4329_v10 = vadd.f32 %v5309_v49, %v4328_v8  ;;  %v4356_v15 = vadd.f32 %v4326_v6, %v7094_v3 }
 0x767   : > { %v4359_v24 = vadd.f32 %v4337_v11, %v7092_v2  ;;  %v4372_v33 = vsel %vm911_vm3, %v4358_v19, 0.0 }
 0x768   : > { %v4366_v16 = vsel %vm911_vm3, %v4356_v15, 0.0  ;;  %v4357_v17 = vadd.f32 %v4329_v10, %v7096_v1 }
 0x769   : > { %4367 = vadd.xlane.f32.xlu0 %v4366_v16  ;;  %v4375_v1 = vsel %vm911_vm3, %v4359_v24, 0.0  ;;  %v6027_v16 = vld [vmem:[%s7534_s12 + $0x8] sm:$0xff]  }
 0x76a   : > { %v5765_v58 = vpop.f32.mrb[24].mxu0  ;;  %v4369_v23 = vsel %vm911_vm3, %v4357_v17, 0.0 }
 0x76b   : > { %4370 = vadd.xlane.f32.xlu1 %v4369_v23  ;;  %v4341_v25 = vpop.f32.mrb[25].mxu0  ;;  %v4350_v28 = vadd.f32 %v5765_v58, %v5309_v49 }
 0x76c   : > { %v4342_v29 = vadd.f32 %v5309_v49, %v4341_v25  ;;  %v5766_v26 = vpop.f32.mrb[26].mxu0 }
 0x76d   : > { %4373 = vadd.xlane.f32.xlu0 %v4372_v33  ;;  %v4344_v3 = vpop.f32.mrb[27].mxu0  ;;  %v4353_v34 = vadd.f32 %v5766_v26, %v5309_v49  ;;  %v4362_v37 = vadd.f32 %v4350_v28, %v7112_v14 }
 0x76e   : > { %v4345_v35 = vadd.f32 %v5309_v49, %v4344_v3  ;;  %v4360_v4 = vadd.f32 %v4342_v29, %v7108_v12 }
 0x76f   : > { %4376 = vadd.xlane.f32.xlu1 %v4375_v1  ;;  %v4363_v39 = vadd.f32 %v4353_v34, %v7106_v9  ;;  %v4384_v40 = vsel %vm911_vm3, %v4362_v37, 0.0 }
 0x770   : > { %v4378_v36 = vsel %vm911_vm3, %v4360_v4, 0.0  ;;  %v4361_v2 = vadd.f32 %v4345_v35, %v7110_v13 }
 0x771   : > { %4379 = vadd.xlane.f32.xlu0 %v4378_v36  ;;  %v4387_v41 = vsel %vm911_vm3, %v4363_v39, 0.0 }
 0x772   : > { %v4381_v38 = vsel %vm911_vm3, %v4361_v2, 0.0 }
 0x773   : > { %4382 = vadd.xlane.f32.xlu1 %v4381_v38 }
 0x775   : > { %4385 = vadd.xlane.f32.xlu0 %v4384_v40 }
 0x777   : > { %4388 = vadd.xlane.f32.xlu1 %v4387_v41 }
 0x7f6   : > { %v4368_v12 = vpop.xlane.xlu0 %4367 }
 0x7f7   : > { %v4391_v44 = vmul.f32 0.03125, %v4368_v12  ;;  %v5316_v12 = vld [vmem:[%s7532_s10] ss:$0 sm:$0xff] }
 0x7f8   : > { %v4371_v45 = vpop.xlane.xlu1 %4370 }
 0x7f9   : > { %v7275_v46 = vsub.f32 %v4356_v15, %v4391_v44  ;;  %v4392_v13 = vmul.f32 0.03125, %v4371_v45  ;;  %v6026_v15 = vld [vmem:[%s7534_s12] sm:$0xff]  }
 0x7fa   : > { %v4374_v47 = vpop.xlane.xlu0 %4373  ;;  %5767 = vmatprep.subr.bf16.mxu1 %v6026_v15 }
 0x7fb   : > { %v7277_v14 = vsub.f32 %v4357_v17, %v4392_v13  ;;  %v4393_v48 = vmul.f32 0.03125, %v4374_v47  ;;  %v4407_v9 = vmul.f32 %v7275_v46, %v7275_v46  ;;  %5768 = vmatpush3.bf16.msra.mxu1 %v6026_v15  ;;  %v6028_v15 = vld [vmem:[%s7536_s14] sm:$0xff]  }
 0x7fc   : > { %v4377_v50 = vpop.xlane.xlu1 %4376  ;;  %5769 = vmatprep.subr.bf16.mxu1 %v6027_v16  ;;  %5779 = vmatprep.subr.bf16.mxu0 %v6028_v15 }
 0x7fd   : > { %v7281_v18 = vsub.f32 %v4358_v19, %v4393_v48  ;;  %v4394_v22 = vmul.f32 0.03125, %v4377_v50  ;;  %v4415_v31 = vsel %vm911_vm3, %v4407_v9, 0.0  ;;  %v4408_v20 = vmul.f32 %v7277_v14, %v7277_v14  ;;  %5780 = vmatpush3.bf16.msra.mxu0 %v6028_v15 }
 0x7fe   : > { %4416 = vadd.xlane.f32.xlu0 %v4415_v31  ;;  %v4380_v27 = vpop.xlane.xlu0 %4379  ;;  %v5317_v31 = vld [vmem:[%s7533_s11] ss:$0 sm:$0xff] }
 0x7ff   : > { %v7286_v32 = vsub.f32 %v4359_v24, %v4394_v22  ;;  %v4395_v51 = vmul.f32 0.03125, %v4380_v27  ;;  %v4418_v53 = vsel %vm911_vm3, %v4408_v20, 0.0  ;;  %v4409_v52 = vmul.f32 %v7281_v18, %v7281_v18  ;;  %5770 = vmatpush3.bf16.msra.mxu1 %v6027_v16  ;;  %v6029_v16 = vld [vmem:[%s7536_s14 + $0x8] sm:$0xff]  }
 0x800   : > { %4419 = vadd.xlane.f32.xlu1 %v4418_v53  ;;  %v4383_v21 = vpop.xlane.xlu1 %4382  ;;  %5781 = vmatprep.subr.bf16.mxu0 %v6029_v16 }
 0x801   : > { %v7291_v30 = vsub.f32 %v4360_v4, %v4395_v51  ;;  %v4396_v54 = vmul.f32 0.03125, %v4383_v21  ;;  %v4421_v56 = vsel %vm911_vm3, %v4409_v52, 0.0  ;;  %v4410_v60 = vmul.f32 %v7286_v32, %v7286_v32  ;;  %5782 = vmatpush3.bf16.msra.mxu0 %v6029_v16 }
 0x802   : > { %4422 = vadd.xlane.f32.xlu0 %v4421_v56  ;;  %v4386_v61 = vpop.xlane.xlu0 %4385 }
 0x803   : > { %v7296_v62 = vsub.f32 %v4361_v2, %v4396_v54  ;;  %v4397_v55 = vmul.f32 0.03125, %v4386_v61  ;;  %v4424_v43 = vsel %vm911_vm3, %v4410_v60, 0.0  ;;  %v4411_v63 = vmul.f32 %v7291_v30, %v7291_v30 }
 0x804   : > { %4425 = vadd.xlane.f32.xlu1 %v4424_v43  ;;  %v4389_v0 = vpop.xlane.xlu1 %4388 }
 0x805   : > { %v7301_v59 = vsub.f32 %v4362_v37, %v4397_v55  ;;  %v4398_v49 = vmul.f32 0.03125, %v4389_v0  ;;  %v4427_v5 = vsel %vm911_vm3, %v4411_v63, 0.0  ;;  %v4412_v57 = vmul.f32 %v7296_v62, %v7296_v62 }
 0x806   : > { %4428 = vadd.xlane.f32.xlu0 %v4427_v5 }
 0x807   : > { %v7306_v42 = vsub.f32 %v4363_v39, %v4398_v49  ;;  %v4430_v6 = vsel %vm911_vm3, %v4412_v57, 0.0  ;;  %v4413_v7 = vmul.f32 %v7301_v59, %v7301_v59 }
 0x808   : > { %4431 = vadd.xlane.f32.xlu1 %v4430_v6 }
 0x809   : > { %v4433_v8 = vsel %vm911_vm3, %v4413_v7, 0.0  ;;  %v4414_v11 = vmul.f32 %v7306_v42, %v7306_v42 }
 0x80a   : > { %4434 = vadd.xlane.f32.xlu0 %v4433_v8 }
 0x80b   : > { %v4436_v10 = vsel %vm911_vm3, %v4414_v11, 0.0 }
 0x80c   : > { %4437 = vadd.xlane.f32.xlu1 %v4436_v10 }
 0x88b   : > { %v4417_v17 = vpop.xlane.xlu0 %4416 }
 0x88c   : > { %v4439_v19 = vmul.f32 0.03125, %v4417_v17  ;;  %v5318_v17 = vld [vmem:[%s7535_s13] ss:$0 sm:$0xff] }
 0x88d   : > { %v4420_v58 = vpop.xlane.xlu1 %4419 }
 0x88e   : > { %v4447_v23 = vadd.f32 1e-05, %v4439_v19  ;;  %v4440_v24 = vmul.f32 0.03125, %v4420_v58 }
 0x88f   : > { %v4423_v25 = vpop.xlane.xlu0 %4422 }
 0x890   : > { %6062 = vrsqrt.f32 %v4447_v23  ;;  %v4448_v28 = vadd.f32 1e-05, %v4440_v24  ;;  %v4441_v29 = vmul.f32 0.03125, %v4423_v25 }
 0x891   : > { %v4426_v26 = vpop.xlane.xlu1 %4425 }
 0x892   : > { %6064 = vrsqrt.f32 %v4448_v28  ;;  %v4449_v33 = vadd.f32 1e-05, %v4441_v29  ;;  %v4442_v3 = vmul.f32 0.03125, %v4426_v26 }
 0x893   : > { %v4429_v34 = vpop.xlane.xlu0 %4428 }
 0x894   : > { %6066 = vrsqrt.f32 %v4449_v33  ;;  %v4450_v35 = vadd.f32 1e-05, %v4442_v3  ;;  %v4443_v1 = vmul.f32 0.03125, %v4429_v34 }
 0x895   : > { %v4432_v4 = vpop.xlane.xlu1 %4431 }
 0x896   : > { %6068 = vrsqrt.f32 %v4450_v35  ;;  %v4451_v36 = vadd.f32 1e-05, %v4443_v1  ;;  %v4444_v2 = vmul.f32 0.03125, %v4432_v4 }
 0x897   : > { %v4435_v37 = vpop.xlane.xlu0 %4434 }
 0x898   : > { %6070 = vrsqrt.f32 %v4451_v36  ;;  %v4452_v38 = vadd.f32 1e-05, %v4444_v2  ;;  %v4445_v39 = vmul.f32 0.03125, %v4435_v37 }
 0x899   : > { %v4438_v40 = vpop.xlane.xlu1 %4437 }
 0x89a   : > { %v6063_v41 = vpop.eup %6062  ;;  %6072 = vrsqrt.f32 %v4452_v38  ;;  %v4453_v44 = vadd.f32 1e-05, %v4445_v39  ;;  %v4446_v45 = vmul.f32 0.03125, %v4438_v40 }
 0x89b   : > { %v4463_v13 = vmul.f32 %v6063_v41, %v7275_v46 }
 0x89c   : > { %v6065_v47 = vpop.eup %6064  ;;  %6074 = vrsqrt.f32 %v4453_v44  ;;  %v4454_v48 = vadd.f32 1e-05, %v4446_v45 }
 0x89d   : > { %v4464_v9 = vmul.f32 %v6065_v47, %v7277_v14  ;;  %v4477_v50 = vmul.f32 %v5316_v12, %v4463_v13 }
 0x89e   : > { %v6067_v22 = vpop.eup %6066  ;;  %6076 = vrsqrt.f32 %v4454_v48 }
 0x89f   : > { %v4465_v20 = vmul.f32 %v6067_v22, %v7281_v18  ;;  %v4478_v27 = vmul.f32 %v5316_v12, %v4464_v9  ;;  %v7331_v46 = vadd.f32 %v5317_v31, %v4477_v50  ;;  %v5325_v50 = vld [vmem:[%s7537_s15] ss:$0 sm:$0xff] }
 0x8a0   : > { %v6069_v51 = vpop.eup %6068 }
 0x8a1   : > { %v4479_v53 = vmul.f32 %v5316_v12, %v4465_v20  ;;  %v4466_v52 = vmul.f32 %v6069_v51, %v7286_v32  ;;  %v7333_v21 = vadd.f32 %v5317_v31, %v4478_v27 }
 0x8a2   : > { %v6071_v54 = vpop.eup %6070 }
 0x8a3   : > { %v4480_v14 = vmul.f32 %v5316_v12, %v4466_v52  ;;  %v4467_v56 = vmul.f32 %v6071_v54, %v7291_v30  ;;  %v4499_v60 = vpack.c.bf16 %v7333_v21, %v7331_v46  ;;  %v7338_v55 = vadd.f32 %v5317_v31, %v4479_v53 }
 0x8a4   : > { %v6073_v61 = vpop.eup %6072 }
 0x8a5   : > { %v7340_v18 = vadd.f32 %v5317_v31, %v4480_v14  ;;  %v4468_v43 = vmul.f32 %v6073_v61, %v7296_v62  ;;  %5771 = vmatprep.mubr.msk.bf16.mxu1 %vm911_vm3, %v4499_v60  ;;  %v4481_v32 = vmul.f32 %v5316_v12, %v4467_v56 }
 0x8a6   : > { %v6075_v63 = vpop.eup %6074 }
 0x8a7   : > { %v4469_v0 = vmul.f32 %v6075_v63, %v7301_v59  ;;  %v4500_v49 = vpack.c.bf16 %v7340_v18, %v7338_v55  ;;  %v4482_v30 = vmul.f32 %v5316_v12, %v4468_v43  ;;  %v7349_v6 = vadd.f32 %v5317_v31, %v4481_v32 }
 0x8a8   : > { %v6077_v5 = vpop.eup %6076 }
 0x8a9   : > { %v4470_v57 = vmul.f32 %v6077_v5, %v7306_v42  ;;  %5772 = vmatmul.mubr.msk.bf16.vlgmr.msra.gmra.mrb[24].mxu1 %vm911_vm3, %v4500_v49  ;;  %v7351_v7 = vadd.f32 %v5317_v31, %v4482_v30  ;;  %v4483_v62 = vmul.f32 %v5316_v12, %v4469_v0 }
 0x8ab   : > { %v4501_v8 = vpack.c.bf16 %v7351_v7, %v7349_v6  ;;  %v4484_v11 = vmul.f32 %v5316_v12, %v4470_v57  ;;  %v7356_v59 = vadd.f32 %v5317_v31, %v4483_v62 }
 0x8ad   : > { %5775 = vmatprep.mubr.msk.bf16.mxu1 %vm911_vm3, %v4501_v8  ;;  %v7358_v10 = vadd.f32 %v5317_v31, %v4484_v11 }
 0x8af   : > { %v4502_v42 = vpack.c.bf16 %v7358_v10, %v7356_v59 }
 0x8b1   : > { %5776 = vmatmul.mubr.msk.bf16.gmra.mrb[28].mxu1 %vm911_vm3, %v4502_v42 }
 0x97c   : > { %v5773_v19 = vpop.f32.mrb[24].mxu1 }
 0x97d   : > { %v4581_v58 = vadd.f32 %v5773_v19, %v5318_v17  ;;  %v4572_v23 = vpop.f32.mrb[25].mxu1 }
 0x97e   : > { %v4573_v24 = vadd.f32 %v5318_v17, %v4572_v23  ;;  %v5774_v25 = vpop.f32.mrb[26].mxu1 }
 0x97f   : > { %v4584_v28 = vadd.f32 %v5774_v25, %v5318_v17  ;;  %v4575_v29 = vpop.f32.mrb[27].mxu1  ;;  %v4605_v33 = vmax.f32 %v4581_v58, 0.0 }
 0x980   : > { %v4576_v26 = vadd.f32 %v5318_v17, %v4575_v29  ;;  %v4603_v34 = vmax.f32 %v4573_v24, 0.0 }
 0x981   : > { %v4606_v3 = vmax.f32 %v4584_v28, 0.0 }
 0x982   : > { %v4604_v35 = vmax.f32 %v4576_v26, 0.0 }
 0x983   : > { %v4612_v1 = vpack.c.bf16 %v4606_v3, %v4605_v33 }
 0x984   : > { %v4611_v4 = vpack.c.bf16 %v4604_v35, %v4603_v34  ;;  %v5777_v36 = vpop.f32.mrb[28].mxu1 }
 0x985   : > { %v4597_v2 = vadd.f32 %v5777_v36, %v5318_v17  ;;  %v4588_v37 = vpop.f32.mrb[29].mxu1 }
 0x986   : > { %v4589_v38 = vadd.f32 %v5318_v17, %v4588_v37  ;;  %v5778_v39 = vpop.f32.mrb[30].mxu1  ;;  %5783 = vmatprep.mubr.msk.bf16.mxu0 %vm911_vm3, %v4611_v4 }
 0x987   : > { %v4600_v40 = vadd.f32 %v5778_v39, %v5318_v17  ;;  %v4591_v41 = vpop.f32.mrb[31].mxu1  ;;  %5784 = vmatmul.mubr.msk.bf16.vlgmr.msra.gmra.mrb[28].mxu0 %vm911_vm3, %v4612_v1  ;;  %v4609_v44 = vmax.f32 %v4597_v2, 0.0 }
 0x988   : > { %v4592_v12 = vadd.f32 %v5318_v17, %v4591_v41  ;;  %v4607_v13 = vmax.f32 %v4589_v38, 0.0 }
 0x989   : > { %v4610_v45 = vmax.f32 %v4600_v40, 0.0 }
 0x98a   : > { %v4608_v47 = vmax.f32 %v4592_v12, 0.0 }
 0x98b   : > { %v4614_v48 = vpack.c.bf16 %v4610_v45, %v4609_v44 }
 0x98c   : > { %v4613_v9 = vpack.c.bf16 %v4608_v47, %v4607_v13 }
 0x98e   : > { %5787 = vmatprep.mubr.msk.bf16.mxu0 %vm911_vm3, %v4613_v9 }
 0x98f   : > { %5788 = vmatmul.mubr.msk.bf16.gmra.mrb[32].mxu0 %vm911_vm3, %v4614_v48 }
 0xa5a   : > { %v5785_v22 = vpop.f32.mrb[28].mxu0 }
 0xa5b   : > { %v4693_v31 = vadd.f32 %v5785_v22, %v5325_v50  ;;  %v4684_v20 = vpop.f32.mrb[29].mxu0 }
 0xa5c   : > { %v4685_v27 = vadd.f32 %v5325_v50, %v4684_v20  ;;  %v5786_v51 = vpop.f32.mrb[30].mxu0 }
 0xa5d   : > { %v4696_v53 = vadd.f32 %v5786_v51, %v5325_v50  ;;  %v4687_v52 = vpop.f32.mrb[31].mxu0  ;;  %v4717_v54 = vadd.f32 %v4693_v31, %v7338_v55 }
 0xa5e   : > { %v4688_v14 = vadd.f32 %v5325_v50, %v4687_v52  ;;  %v4715_v61 = vadd.f32 %v4685_v27, %v7331_v46 }
 0xa5f   : > { %v4731_v56 = vsel %vm911_vm3, %v4717_v54, 0.0  ;;  %v4718_v60 = vadd.f32 %v4696_v53, %v7340_v18 }
 0xa60   : > { %4732 = vadd.xlane.f32.xlu0 %v4731_v56  ;;  %v4716_v32 = vadd.f32 %v4688_v14, %v7333_v21  ;;  %v4725_v49 = vsel %vm911_vm3, %v4715_v61, 0.0 }
 0xa61   : > { %v4734_v43 = vsel %vm911_vm3, %v4718_v60, 0.0 }
 0xa62   : > { %4735 = vadd.xlane.f32.xlu1 %v4734_v43  ;;  %v5789_v63 = vpop.f32.mrb[32].mxu0  ;;  %v4728_v62 = vsel %vm911_vm3, %v4716_v32, 0.0 }
 0xa63   : > { %v4700_v0 = vpop.f32.mrb[33].mxu0  ;;  %v4709_v30 = vadd.f32 %v5789_v63, %v5325_v50 }
 0xa64   : > { %v4701_v5 = vadd.f32 %v5325_v50, %v4700_v0  ;;  %4726 = vadd.xlane.f32.xlu0 %v4725_v49  ;;  %v5790_v55 = vpop.f32.mrb[34].mxu0 }
 0xa65   : > { %v4703_v57 = vpop.f32.mrb[35].mxu0  ;;  %v4712_v18 = vadd.f32 %v5790_v55, %v5325_v50  ;;  %v4721_v42 = vadd.f32 %v4709_v30, %v7356_v59 }
 0xa66   : > { %v4704_v8 = vadd.f32 %v5325_v50, %v4703_v57  ;;  %4729 = vadd.xlane.f32.xlu1 %v4728_v62  ;;  %v4719_v46 = vadd.f32 %v4701_v5, %v7349_v6 }
 0xa67   : > { %v4722_v16 = vadd.f32 %v4712_v18, %v7358_v10  ;;  %v4743_v17 = vsel %vm911_vm3, %v4721_v42, 0.0 }
 0xa68   : > { %v4737_v11 = vsel %vm911_vm3, %v4719_v46, 0.0  ;;  %v4720_v21 = vadd.f32 %v4704_v8, %v7351_v7 }
 0xa69   : > { %4738 = vadd.xlane.f32.xlu0 %v4737_v11  ;;  %v4746_v19 = vsel %vm911_vm3, %v4722_v16, 0.0 }
 0xa6a   : > { %v4740_v15 = vsel %vm911_vm3, %v4720_v21, 0.0 }
 0xa6b   : > { %4741 = vadd.xlane.f32.xlu1 %v4740_v15 }
 0xa6d   : > { %4744 = vadd.xlane.f32.xlu0 %v4743_v17 }
 0xa6f   : > { %4747 = vadd.xlane.f32.xlu1 %v4746_v19 }
 0xaed   : > { %v4733_v58 = vpop.xlane.xlu0 %4732 }
 0xaee   : > { %v4751_v6 = vmul.f32 0.03125, %v4733_v58 }
 0xaef   : > { %v4736_v23 = vpop.xlane.xlu1 %4735 }
 0xaf0   : > { %v7395_v24 = vsub.f32 %v4717_v54, %v4751_v6  ;;  %v4752_v7 = vmul.f32 0.03125, %v4736_v23 }
 0xaf1   : > { %v4727_v25 = vpop.xlane.xlu0 %4726 }
 0xaf2   : > { %v7397_v59 = vsub.f32 %v4718_v60, %v4752_v7  ;;  %v4749_v28 = vmul.f32 0.03125, %v4727_v25  ;;  %v4767_v10 = vmul.f32 %v7395_v24, %v7395_v24  ;;  %v5333_v7 = vld [vmem:[%s7539_s17] ss:$0 sm:$0xff] }
 0xaf3   : > { %v4730_v29 = vpop.xlane.xlu1 %4729 }
 0xaf4   : > { %v7401_v26 = vsub.f32 %v4715_v61, %v4749_v28  ;;  %v4750_v33 = vmul.f32 0.03125, %v4730_v29  ;;  %v4779_v3 = vsel %vm911_vm3, %v4767_v10, 0.0  ;;  %v4768_v34 = vmul.f32 %v7397_v59, %v7397_v59 }
 0xaf5   : > { %4780 = vadd.xlane.f32.xlu0 %v4779_v3 }
 0xaf6   : > { %v7406_v35 = vsub.f32 %v4716_v32, %v4750_v33  ;;  %v4739_v1 = vpop.xlane.xlu0 %4738  ;;  %v4782_v4 = vsel %vm911_vm3, %v4768_v34, 0.0  ;;  %v4765_v36 = vmul.f32 %v7401_v26, %v7401_v26 }
 0xaf7   : > { %v4753_v2 = vmul.f32 0.03125, %v4739_v1  ;;  %4783 = vadd.xlane.f32.xlu1 %v4782_v4 }
 0xaf8   : > { %v4742_v37 = vpop.xlane.xlu1 %4741  ;;  %v4773_v38 = vsel %vm911_vm3, %v4765_v36, 0.0  ;;  %v4766_v39 = vmul.f32 %v7406_v35, %v7406_v35 }
 0xaf9   : > { %v7414_v40 = vsub.f32 %v4719_v46, %v4753_v2  ;;  %v4754_v41 = vmul.f32 0.03125, %v4742_v37  ;;  %4774 = vadd.xlane.f32.xlu0 %v4773_v38 }
 0xafa   : > { %v4745_v12 = vpop.xlane.xlu0 %4744  ;;  %v4776_v44 = vsel %vm911_vm3, %v4766_v39, 0.0 }
 0xafb   : > { %v7417_v45 = vsub.f32 %v4720_v21, %v4754_v41  ;;  %v4755_v13 = vmul.f32 0.03125, %v4745_v12  ;;  %4777 = vadd.xlane.f32.xlu1 %v4776_v44  ;;  %v4769_v47 = vmul.f32 %v7414_v40, %v7414_v40 }
 0xafc   : > { %v4748_v48 = vpop.xlane.xlu1 %4747 }
 0xafd   : > { %v7421_v9 = vsub.f32 %v4721_v42, %v4755_v13  ;;  %v4756_v50 = vmul.f32 0.03125, %v4748_v48  ;;  %v4785_v22 = vsel %vm911_vm3, %v4769_v47, 0.0  ;;  %v4770_v31 = vmul.f32 %v7417_v45, %v7417_v45 }
 0xafe   : > { %4786 = vadd.xlane.f32.xlu0 %v4785_v22 }
 0xaff   : > { %v7426_v20 = vsub.f32 %v4722_v16, %v4756_v50  ;;  %v4788_v27 = vsel %vm911_vm3, %v4770_v31, 0.0  ;;  %v4771_v51 = vmul.f32 %v7421_v9, %v7421_v9  ;;  %v5332_v16 = vld [vmem:[%s7538_s16] ss:$0 sm:$0xff] }
 0xb00   : > { %4789 = vadd.xlane.f32.xlu1 %v4788_v27 }
 0xb01   : > { %v4791_v53 = vsel %vm911_vm3, %v4771_v51, 0.0  ;;  %v4772_v52 = vmul.f32 %v7426_v20, %v7426_v20 }
 0xb02   : > { %4792 = vadd.xlane.f32.xlu0 %v4791_v53 }
 0xb03   : > { %v4794_v54 = vsel %vm911_vm3, %v4772_v52, 0.0 }
 0xb04   : > { %4795 = vadd.xlane.f32.xlu1 %v4794_v54 }
 0xb82   : > { %v4781_v14 = vpop.xlane.xlu0 %4780 }
 0xb83   : > { %v4799_v56 = vmul.f32 0.03125, %v4781_v14 }
 0xb84   : > { %v4784_v60 = vpop.xlane.xlu1 %4783 }
 0xb85   : > { %v4807_v61 = vadd.f32 1e-05, %v4799_v56  ;;  %v4800_v43 = vmul.f32 0.03125, %v4784_v60 }
 0xb86   : > { %v4775_v32 = vpop.xlane.xlu0 %4774 }
 0xb87   : > { %6078 = vrsqrt.f32 %v4807_v61  ;;  %v4808_v63 = vadd.f32 1e-05, %v4800_v43  ;;  %v4797_v0 = vmul.f32 0.03125, %v4775_v32 }
 0xb88   : > { %v4778_v49 = vpop.xlane.xlu1 %4777 }
 0xb89   : > { %6080 = vrsqrt.f32 %v4808_v63  ;;  %v4805_v30 = vadd.f32 1e-05, %v4797_v0  ;;  %v4798_v5 = vmul.f32 0.03125, %v4778_v49 }
 0xb8b   : > { %6082 = vrsqrt.f32 %v4805_v30  ;;  %v4806_v55 = vadd.f32 1e-05, %v4798_v5  ;;  %v4787_v57 = vpop.xlane.xlu0 %4786 }
 0xb8c   : > { %v4801_v62 = vmul.f32 0.03125, %v4787_v57 }
 0xb8d   : > { %6084 = vrsqrt.f32 %v4806_v55  ;;  %v4790_v18 = vpop.xlane.xlu1 %4789 }
 0xb8e   : > { %v4809_v8 = vadd.f32 1e-05, %v4801_v62  ;;  %v4802_v46 = vmul.f32 0.03125, %v4790_v18 }
 0xb8f   : > { %v4793_v11 = vpop.xlane.xlu0 %4792 }
 0xb90   : > { %6086 = vrsqrt.f32 %v4809_v8  ;;  %v4810_v21 = vadd.f32 1e-05, %v4802_v46  ;;  %v4803_v42 = vmul.f32 0.03125, %v4793_v11 }
 0xb91   : > { %v6079_v15 = vpop.eup %6078  ;;  %v4796_v17 = vpop.xlane.xlu1 %4795 }
 0xb92   : > { %v4823_v19 = vmul.f32 %v6079_v15, %v7395_v24  ;;  %6088 = vrsqrt.f32 %v4810_v21  ;;  %v4811_v58 = vadd.f32 1e-05, %v4803_v42  ;;  %v4804_v6 = vmul.f32 0.03125, %v4796_v17 }
 0xb93   : > { %v6081_v23 = vpop.eup %6080 }
 0xb94   : > { %v4837_v25 = vmul.f32 %v5332_v16, %v4823_v19  ;;  %v4824_v28 = vmul.f32 %v6081_v23, %v7397_v59  ;;  %6090 = vrsqrt.f32 %v4811_v58  ;;  %v4812_v10 = vadd.f32 1e-05, %v4804_v6 }
 0xb95   : > { %v6083_v29 = vpop.eup %6082 }
 0xb96   : > { %v4851_v33 = vadd.f32 %v5333_v7, %v4837_v25  ;;  %v4838_v3 = vmul.f32 %v5332_v16, %v4824_v28  ;;  %v4821_v34 = vmul.f32 %v6083_v29, %v7401_v26  ;;  %6092 = vrsqrt.f32 %v4812_v10 }
 0xb97   : > { %v6085_v24 = vpop.eup %6084 }
 0xb98   : > { %4859 = vst.msk [vmem:[%s7447_s1 + $0x10] sm:$0xff] %vm911_vm3, %v4851_v33  ;;  %v4852_v1 = vadd.f32 %v5333_v7, %v4838_v3  ;;  %v4835_v4 = vmul.f32 %v5332_v16, %v4821_v34  ;;  %v4822_v59 = vmul.f32 %v6085_v24, %v7406_v35 }
 0xb9a   : > { %v6087_v36 = vpop.eup %6086  ;;  %4860 = vst.msk [vmem:[%s7447_s1 + $0x18] sm:$0xff] %vm911_vm3, %v4852_v1  ;;  %v4849_v2 = vadd.f32 %v5333_v7, %v4835_v4  ;;  %v4836_v26 = vmul.f32 %v5332_v16, %v4822_v59 }
 0xb9b   : > { %v4825_v37 = vmul.f32 %v6087_v36, %v7414_v40 }
 0xb9c   : > { %v6089_v38 = vpop.eup %6088  ;;  %4857 = vst.msk [vmem:[%s7447_s1] sm:$0xff] %vm911_vm3, %v4849_v2  ;;  %v4850_v39 = vadd.f32 %v5333_v7, %v4836_v26 }
 0xb9d   : > { %v4839_v41 = vmul.f32 %v5332_v16, %v4825_v37  ;;  %v4826_v12 = vmul.f32 %v6089_v38, %v7417_v45 }
 0xb9e   : > { %v6091_v44 = vpop.eup %6090  ;;  %4858 = vst.msk [vmem:[%s7447_s1 + $0x8] sm:$0xff] %vm911_vm3, %v4850_v39 }
 0xb9f   : > { %v4853_v35 = vadd.f32 %v5333_v7, %v4839_v41  ;;  %v4840_v13 = vmul.f32 %v5332_v16, %v4826_v12  ;;  %v4827_v47 = vmul.f32 %v6091_v44, %v7421_v9 }
 0xba0   : > { %v6093_v40 = vpop.eup %6092 }
 0xba1   : > { %4861 = vst.msk [vmem:[%s7447_s1 + $0x20] sm:$0xff] %vm911_vm3, %v4853_v35  ;;  %v4854_v48 = vadd.f32 %v5333_v7, %v4840_v13  ;;  %v4841_v50 = vmul.f32 %v5332_v16, %v4827_v47  ;;  %v4828_v22 = vmul.f32 %v6093_v40, %v7426_v20 }
 0xba3   : > { %4862 = vst.msk [vmem:[%s7447_s1 + $0x28] sm:$0xff] %vm911_vm3, %v4854_v48  ;;  %v4855_v45 = vadd.f32 %v5333_v7, %v4841_v50  ;;  %v4842_v31 = vmul.f32 %v5332_v16, %v4828_v22 }
 0xba5   : > { %4863 = vst.msk [vmem:[%s7447_s1 + $0x30] sm:$0xff] %vm911_vm3, %v4855_v45  ;;  %v4856_v9 = vadd.f32 %v5333_v7, %v4842_v31 }
 0xba7   : > { %4864 = vst.msk [vmem:[%s7447_s1 + $0x38] sm:$0xff] %vm911_vm3, %v4856_v9 }
 0xba8   : > { %6107 = shalt.err (!%p6104_p3)
}
 0xba9   : > { %s6108_s24 = scalar_lea.hbm %s7471_s20, 1024  ;;  %s6112_s22 = scalar_lea.hbm %s7540_s18, 2048 }
 0xbaa   : > { %p6109_p4 = scmp.ne.s32.totalorder %s7471_s20, %s6108_s24  ;;  %p6113_p9 = scmp.lt.u32.totalorder %s7471_s20, %s7540_s18 }
 0xbab   : > { %p6114_p10 = scmp.lt.u32.totalorder %s6112_s22, %s6108_s24  ;;  %p6116_p12 = scmp.lt.u32.totalorder %s6108_s24, %s7471_s20 }
 0xbac   : > { %p6110_p7 = pnand %p6109_p4, %p6298_p5 }
 0xbad   : > { %p6115_p11 = por %p6114_p10, %p6113_p9 }
 0xbae   : > { %p6111_p8 = pneg %p6110_p7 }
 0xbaf   : > { %p6117_p13 = por %p6116_p12, %p6115_p11 }
 0xbb1   : > { %p6118_p0 = pnand %p6117_p13, %p6111_p8 }
 0xbb3   : > { %6121 = shalt.err (!%p6118_p0)
}
 0xbb4   : > { %s6163_s21 = smov 128   ;;  %s6164_s19 = smov 8  }
 0xbb5   : > { %5919 = dma.vmem_to_hbm [thread:$0]  (%p6298_p5), %s7473_s25, 1024, %s7471_s20, %s7481_s0, %s6163_s21, %s6163_s21, %s6164_s19  }
 0xbb6 PF: > { %p5925_p1 = scmp.ge.s32.totalorder %s6156_s30, 2  ;;  %s4894_s4 = sand.u32 1, %s6144_s27  }
 0xbb7   : > { %s4895_s24 = scalar_lea.sflag [#allocation4], %s4894_s4 }
 0xbb8   : > { %p5922_p2 = pnand %p5925_p1, %p6302_p6 }
 0xbba   : > { %6139 = dma.done.wait (!%p5922_p2), %s4895_s24, 1024  }
 0xbbb   : > { %6141 = vsyncadd (!%p5922_p2), %s4895_s24, 4294966272  ;;  %s7570_s30 = sld [smem:[#allocation7_spill]]  ;;  %s7571_s1 = sld [smem:[#allocation6_spill]] }
 0xbbc   : > { %s7572_s29 = sld [smem:[#allocation8_spill]]  ;;  %s7573_s27 = smov %s6148_s28 }
 0xbc1   : > { %p28_p3 = scmp.ge.s32.totalorder %s7570_s30, 4   ;;  %s7574_s28 = smov %s7571_s1 }
 0xbc3   :  { %30 = sbr.rel (!%p28_p3) target bundleno = 9 (0x9), region = 150 }
 0xbca   :  { %4900 = vsyncpa [#allocation4], 1 }
 0xbcb   :  { %4902 = vsyncpa [#allocation4 + $0x1], 1 }

</bundles_post_ra>
